<compile_context>
chip_gen: v6e
topology: v6e:2x2x1
jax: 0.10.0
libtpu: 0.0.40
codegen_flags: <defaults>
</compile_context>

<pallas_src>
import math

import jax
import jax.numpy as jnp
from jax.experimental import pallas as pl
from jax.experimental.pallas import tpu as pltpu  # noqa: F401  (TPU backend)

LN_EPS = 1e-5       # torch.nn.LayerNorm default
P_PAD = 128         # lane-dense padding of the SWD projection count


def _layernorm(h, g, b):
    mu = jnp.mean(h, axis=-1, keepdims=True)
    var = jnp.mean((h - mu) ** 2, axis=-1, keepdims=True)
    return (h - mu) * jax.lax.rsqrt(var + LN_EPS) * g + b


def _sorted_rows(mat, row0, S):
    """Ascending sort (per column) of S consecutive rows of `mat` via an
    odd-even transposition compare-exchange network (S passes, VPU min/max on
    (1, P) sublane slices)."""
    rows = [mat[row0 + i:row0 + i + 1, :] for i in range(S)]
    for p in range(S):
        for i in range(p % 2, S - 1, 2):
            a, b = rows[i], rows[i + 1]
            rows[i] = jnp.minimum(a, b)
            rows[i + 1] = jnp.maximum(a, b)
    return rows


def make_fused_kernel(B, S, D, heads, depth, num_proj):
    dh = D // heads
    N = B * S
    G = heads * B
    # lucidrains-style Transformer (older ViT variant, no dim_head arg):
    # inner_dim == dim, scale = dim ** -0.5.
    scale = D ** -0.5
    inv_sqrt2 = 1.0 / math.sqrt(2.0)
    inv_count = 1.0 / float(B * S * num_proj)

    def kernel(*refs):
        it = iter(refs)
        x_ref = next(it)
        e_w1, e_b1, e_g, e_be, e_w2, e_b2 = [next(it) for _ in range(6)]
        layer_refs = [tuple(next(it) for _ in range(11)) for _ in range(depth)]
        s_w1, s_b1, s_w2, s_b2 = [next(it) for _ in range(4)]
        theta_ref = next(it)
        score_ref = next(it)
        wloss_ref = next(it)

        x = x_ref[...]                                                # (N, D)

        # ---- encoder: Linear -> LayerNorm -> ReLU -> Dropout(id) -> Linear
        h = jnp.dot(x, e_w1[...], preferred_element_type=jnp.float32) + e_b1[...]
        h = jnp.maximum(_layernorm(h, e_g[...], e_be[...]), 0.0)
        z = jnp.dot(h, e_w2[...], preferred_element_type=jnp.float32) + e_b2[...]

        # ---- transformer: pre-norm MHSA + pre-norm FFN, residuals
        t = z
        for (ln1g, ln1b, wqkv_h, wo_h, bo,
             ln2g, ln2b, wf1, bf1, wf2, bf2) in layer_refs:
            xn = _layernorm(t, ln1g[...], ln1b[...])                  # (N, D)
            xb = jnp.broadcast_to(xn, (3 * heads, N, D))
            qkv = jnp.einsum('gnd,gde->gne', xb, wqkv_h[...],
                             preferred_element_type=jnp.float32)      # (3h, N, dh)
            q = qkv[:heads] * scale                                   # scale folded into q
            k = qkv[heads:2 * heads]
            v = qkv[2 * heads:]
            # (heads, B*S, dh) -> (heads*B, S, dh): tile-aligned regrouping only
            qg = q.reshape(G, S, dh)
            kg = k.reshape(G, S, dh)
            vg = v.reshape(G, S, dh)
            dots = jnp.einsum('gsd,gtd->gst', qg, kg,
                              preferred_element_type=jnp.float32)     # (G, S, S)
            dots = dots - jnp.max(dots, axis=-1, keepdims=True)
            e = jnp.exp(dots)
            attn = e * pl.reciprocal(jnp.sum(e, axis=-1, keepdims=True), approx=True)
            og = jnp.einsum('gst,gtd->gsd', attn, vg,
                            preferred_element_type=jnp.float32)       # (G, S, dh)
            oh = og.reshape(heads, N, dh)
            proj = jnp.einsum('hne,hej->hnj', oh, wo_h[...],
                              preferred_element_type=jnp.float32)     # (heads, N, D)
            attn_out = bo[...]
            for hh in range(heads):
                attn_out = attn_out + proj[hh]
            t = t + attn_out

            tn = _layernorm(t, ln2g[...], ln2b[...])
            mid = jnp.dot(tn, wf1[...], preferred_element_type=jnp.float32) + bf1[...]
            mid = 0.5 * mid * (1.0 + jax.lax.erf(mid * inv_sqrt2))    # exact GELU
            t = t + jnp.dot(mid, wf2[...], preferred_element_type=jnp.float32) + bf2[...]

        # ---- score head (Linear -> ReLU -> Linear) + sigmoid (applied in the
        #      module's forward after squeeze(-1))
        sh = jnp.maximum(
            jnp.dot(t, s_w1[...], preferred_element_type=jnp.float32) + s_b1[...], 0.0)
        logits = jnp.dot(sh, s_w2[...], preferred_element_type=jnp.float32) + s_b2[...]
        score_ref[...] = jax.nn.sigmoid(logits)                       # (N, 1)

        # ---- SWD: lane-dense projections, in-kernel per-batch sort + mean
        th = theta_ref[...]                                           # (D, 128), cols >= num_proj are 0
        xp = jnp.dot(x, th, preferred_element_type=jnp.float32)       # (N, 128)
        zp = jnp.dot(z, th, preferred_element_type=jnp.float32)       # (N, 128)
        acc = jnp.zeros((1, P_PAD), jnp.float32)
        for b in range(B):
            xs = _sorted_rows(xp, b * S, S)
            zs = _sorted_rows(zp, b * S, S)
            for i in range(S):
                d = xs[i] - zs[i]
                acc = acc + d * d
        # per-batch mean then average over batches == global mean (equal sizes)
        wloss_ref[...] = jnp.reshape(jnp.sum(acc) * inv_count, (1, 1))

    return kernel


def make_forward(depth, heads, num_proj):
    @jax.jit
    def forward(x, params, key):
        B, S, D = x.shape
        dh = D // heads
        x2d = x.reshape(B * S, D)

        # SWD random projection directions (normalized rows), then transposed
        # and zero-padded to 128 lane-dense columns.
        # TODO(synk): torch.randn's RNG stream cannot be reproduced bit-exactly;
        # the projections are drawn with jax.random outside the kernel.
        theta = jax.random.normal(key, (num_proj, D), jnp.float32)
        theta = theta / jnp.linalg.norm(theta, axis=1, keepdims=True)
        theta_t = jnp.zeros((D, P_PAD), jnp.float32).at[:, :num_proj].set(theta.T)

        enc = params["encoder"]
        inputs = [x2d, enc["w1"], enc["b1"], enc["g"], enc["be"], enc["w2"], enc["b2"]]
        for lp in params["layers"]:
            wqkv = lp["wqkv"]                                         # (D, 3D)
            wq = wqkv[:, :D].reshape(D, heads, dh)
            wk = wqkv[:, D:2 * D].reshape(D, heads, dh)
            wv = wqkv[:, 2 * D:].reshape(D, heads, dh)
            wqkv_h = jnp.transpose(jnp.concatenate([wq, wk, wv], axis=1), (1, 0, 2))
            wo_h = lp["wo"].reshape(heads, dh, D)
            inputs += [lp["ln1g"], lp["ln1b"], wqkv_h, wo_h, lp["bo"],
                       lp["ln2g"], lp["ln2b"], lp["wf1"], lp["bf1"], lp["wf2"], lp["bf2"]]
        sc = params["score"]
        inputs += [sc["w1"], sc["b1"], sc["w2"], sc["b2"], theta_t]

        kernel = make_fused_kernel(B, S, D, heads, depth, num_proj)
        score2d, wloss = pl.pallas_call(
            kernel,
            out_shape=(jax.ShapeDtypeStruct((B * S, 1), jnp.float32),
                       jax.ShapeDtypeStruct((1, 1), jnp.float32)),
        )(*inputs)
        return score2d.reshape(B, S), wloss[0, 0]

    return forward


def init_params(key, D, mlp_dim, heads, depth):
    keys = iter(jax.random.split(key, 64))

    def w(shape, scl):
        return jax.random.normal(next(keys), shape, jnp.float32) * scl

    params = {
        "encoder": {
            "w1": w((D, mlp_dim), 1.0 / math.sqrt(D)),
            "b1": jnp.zeros((1, mlp_dim), jnp.float32),
            "g": jnp.ones((1, mlp_dim), jnp.float32),
            "be": jnp.zeros((1, mlp_dim), jnp.float32),
            "w2": w((mlp_dim, D), 1.0 / math.sqrt(mlp_dim)),
            "b2": jnp.zeros((1, D), jnp.float32),
        },
        "layers": [],
        "score": {
            "w1": w((D, D // 2), 1.0 / math.sqrt(D)),
            "b1": jnp.zeros((1, D // 2), jnp.float32),
            "w2": w((D // 2, 1), 1.0 / math.sqrt(D // 2)),
            "b2": jnp.zeros((1, 1), jnp.float32),
        },
    }
    for _ in range(depth):
        params["layers"].append({
            "ln1g": jnp.ones((1, D), jnp.float32),
            "ln1b": jnp.zeros((1, D), jnp.float32),
            "wqkv": w((D, 3 * D), 1.0 / math.sqrt(D)),
            "wo": w((D, D), 1.0 / math.sqrt(D)),
            "bo": jnp.zeros((1, D), jnp.float32),
            "ln2g": jnp.ones((1, D), jnp.float32),
            "ln2b": jnp.zeros((1, D), jnp.float32),
            "wf1": w((D, mlp_dim), 1.0 / math.sqrt(D)),
            "bf1": jnp.zeros((1, mlp_dim), jnp.float32),
            "wf2": w((mlp_dim, D), 1.0 / math.sqrt(mlp_dim)),
            "bf2": jnp.zeros((1, D), jnp.float32),
        })
    return params


if __name__ == "__main__":
    B, S, D = 2, 8, 32             # batch, sequence, input_dim
    mlp_dim, heads, depth = 64, 4, 2
    num_proj = 50

    key = jax.random.PRNGKey(0)
    k_x, k_p, k_swd = jax.random.split(key, 3)
    x = jax.random.normal(k_x, (B, S, D), jnp.float32)
    params = init_params(k_p, D, mlp_dim, heads, depth)

    forward = make_forward(depth=depth, heads=heads, num_proj=num_proj)
    score, wloss = forward(x, params, k_swd)
    jax.block_until_ready((score, wloss))
    assert score.shape == (B, S)
    assert wloss.shape == ()
    print("KERNEL_OK")
</pallas_src>

<mosaic_0001>
module attributes {stable_mosaic.version = 11 : i64} {
  func.func @kernel(%arg0: memref<16x32xf32, #tpu.memory_space<vmem>>, %arg1: memref<32x64xf32, #tpu.memory_space<vmem>>, %arg2: memref<1x64xf32, #tpu.memory_space<vmem>>, %arg3: memref<1x64xf32, #tpu.memory_space<vmem>>, %arg4: memref<1x64xf32, #tpu.memory_space<vmem>>, %arg5: memref<64x32xf32, #tpu.memory_space<vmem>>, %arg6: memref<1x32xf32, #tpu.memory_space<vmem>>, %arg7: memref<1x32xf32, #tpu.memory_space<vmem>>, %arg8: memref<1x32xf32, #tpu.memory_space<vmem>>, %arg9: memref<12x32x8xf32, #tpu.memory_space<vmem>>, %arg10: memref<4x8x32xf32, #tpu.memory_space<vmem>>, %arg11: memref<1x32xf32, #tpu.memory_space<vmem>>, %arg12: memref<1x32xf32, #tpu.memory_space<vmem>>, %arg13: memref<1x32xf32, #tpu.memory_space<vmem>>, %arg14: memref<32x64xf32, #tpu.memory_space<vmem>>, %arg15: memref<1x64xf32, #tpu.memory_space<vmem>>, %arg16: memref<64x32xf32, #tpu.memory_space<vmem>>, %arg17: memref<1x32xf32, #tpu.memory_space<vmem>>, %arg18: memref<1x32xf32, #tpu.memory_space<vmem>>, %arg19: memref<1x32xf32, #tpu.memory_space<vmem>>, %arg20: memref<12x32x8xf32, #tpu.memory_space<vmem>>, %arg21: memref<4x8x32xf32, #tpu.memory_space<vmem>>, %arg22: memref<1x32xf32, #tpu.memory_space<vmem>>, %arg23: memref<1x32xf32, #tpu.memory_space<vmem>>, %arg24: memref<1x32xf32, #tpu.memory_space<vmem>>, %arg25: memref<32x64xf32, #tpu.memory_space<vmem>>, %arg26: memref<1x64xf32, #tpu.memory_space<vmem>>, %arg27: memref<64x32xf32, #tpu.memory_space<vmem>>, %arg28: memref<1x32xf32, #tpu.memory_space<vmem>>, %arg29: memref<32x16xf32, #tpu.memory_space<vmem>>, %arg30: memref<1x16xf32, #tpu.memory_space<vmem>>, %arg31: memref<16x1xf32, #tpu.memory_space<vmem>>, %arg32: memref<1x1xf32, #tpu.memory_space<vmem>>, %arg33: memref<32x128xf32, #tpu.memory_space<vmem>>, %arg34: memref<16x1xf32, #tpu.memory_space<vmem>>, %arg35: memref<1x1xf32, #tpu.memory_space<vmem>>) attributes {dimension_semantics = [], scalar_prefetch = 0 : i64, scratch_operands = 0 : i64, tpu.core_type = #tpu.core_type<tc>} {
    %c0 = arith.constant 0 : index
    %c0_0 = arith.constant 0 : index
    %0 = vector.load %arg0[%c0, %c0_0] : memref<16x32xf32, #tpu.memory_space<vmem>>, vector<16x32xf32>
    %c0_1 = arith.constant 0 : index
    %c0_2 = arith.constant 0 : index
    %1 = vector.load %arg1[%c0_1, %c0_2] : memref<32x64xf32, #tpu.memory_space<vmem>>, vector<32x64xf32>
    %cst = arith.constant dense<0.000000e+00> : vector<16x64xf32>
    %2 = tpu.matmul %0, %1, %cst {dimension_numbers = #tpu.dot_dimension_numbers<[1], [0], [0], [1], [0, 0, 1, 1], [], []>} : vector<16x32xf32>, vector<32x64xf32>, vector<16x64xf32> -> vector<16x64xf32>
    %c0_3 = arith.constant 0 : index
    %c0_4 = arith.constant 0 : index
    %3 = vector.load %arg2[%c0_3, %c0_4] : memref<1x64xf32, #tpu.memory_space<vmem>>, vector<1x64xf32>
    %4 = vector.broadcast %3 : vector<1x64xf32> to vector<16x64xf32>
    %5 = arith.addf %2, %4 : vector<16x64xf32>
    %c0_5 = arith.constant 0 : index
    %c0_6 = arith.constant 0 : index
    %6 = vector.load %arg3[%c0_5, %c0_6] : memref<1x64xf32, #tpu.memory_space<vmem>>, vector<1x64xf32>
    %c0_7 = arith.constant 0 : index
    %c0_8 = arith.constant 0 : index
    %7 = vector.load %arg4[%c0_7, %c0_8] : memref<1x64xf32, #tpu.memory_space<vmem>>, vector<1x64xf32>
    %cst_9 = arith.constant dense<0.000000e+00> : vector<16xf32>
    %8 = vector.multi_reduction <add>, %5, %cst_9 [1] : vector<16x64xf32> to vector<16xf32>
    %9 = vector.shape_cast %8 : vector<16xf32> to vector<16x1xf32>
    %cst_10 = arith.constant 6.400000e+01 : f32
    %10 = vector.broadcast %cst_10 : f32 to vector<16x1xf32>
    %11 = arith.divf %9, %10 : vector<16x1xf32>
    %12 = vector.broadcast %11 : vector<16x1xf32> to vector<16x64xf32>
    %13 = arith.subf %5, %12 : vector<16x64xf32>
    %14 = arith.mulf %13, %13 : vector<16x64xf32>
    %cst_11 = arith.constant dense<0.000000e+00> : vector<16xf32>
    %15 = vector.multi_reduction <add>, %14, %cst_11 [1] : vector<16x64xf32> to vector<16xf32>
    %16 = vector.shape_cast %15 : vector<16xf32> to vector<16x1xf32>
    %cst_12 = arith.constant 6.400000e+01 : f32
    %17 = vector.broadcast %cst_12 : f32 to vector<16x1xf32>
    %18 = arith.divf %16, %17 : vector<16x1xf32>
    %19 = vector.broadcast %11 : vector<16x1xf32> to vector<16x64xf32>
    %20 = arith.subf %5, %19 : vector<16x64xf32>
    %cst_13 = arith.constant 9.99999974E-6 : f32
    %21 = vector.broadcast %cst_13 : f32 to vector<16x1xf32>
    %22 = arith.addf %18, %21 : vector<16x1xf32>
    %23 = math.rsqrt %22 : vector<16x1xf32>
    %24 = vector.broadcast %23 : vector<16x1xf32> to vector<16x64xf32>
    %25 = arith.mulf %20, %24 : vector<16x64xf32>
    %26 = vector.broadcast %6 : vector<1x64xf32> to vector<16x64xf32>
    %27 = arith.mulf %25, %26 : vector<16x64xf32>
    %28 = vector.broadcast %7 : vector<1x64xf32> to vector<16x64xf32>
    %29 = arith.addf %27, %28 : vector<16x64xf32>
    %cst_14 = arith.constant 0.000000e+00 : f32
    %30 = vector.broadcast %cst_14 : f32 to vector<16x64xf32>
    %31 = arith.maximumf %29, %30 : vector<16x64xf32>
    %c0_15 = arith.constant 0 : index
    %c0_16 = arith.constant 0 : index
    %32 = vector.load %arg5[%c0_15, %c0_16] : memref<64x32xf32, #tpu.memory_space<vmem>>, vector<64x32xf32>
    %cst_17 = arith.constant dense<0.000000e+00> : vector<16x32xf32>
    %33 = tpu.matmul %31, %32, %cst_17 {dimension_numbers = #tpu.dot_dimension_numbers<[1], [0], [0], [1], [0, 0, 1, 1], [], []>} : vector<16x64xf32>, vector<64x32xf32>, vector<16x32xf32> -> vector<16x32xf32>
    %c0_18 = arith.constant 0 : index
    %c0_19 = arith.constant 0 : index
    %34 = vector.load %arg6[%c0_18, %c0_19] : memref<1x32xf32, #tpu.memory_space<vmem>>, vector<1x32xf32>
    %35 = vector.broadcast %34 : vector<1x32xf32> to vector<16x32xf32>
    %36 = arith.addf %33, %35 : vector<16x32xf32>
    %c0_20 = arith.constant 0 : index
    %c0_21 = arith.constant 0 : index
    %37 = vector.load %arg7[%c0_20, %c0_21] : memref<1x32xf32, #tpu.memory_space<vmem>>, vector<1x32xf32>
    %c0_22 = arith.constant 0 : index
    %c0_23 = arith.constant 0 : index
    %38 = vector.load %arg8[%c0_22, %c0_23] : memref<1x32xf32, #tpu.memory_space<vmem>>, vector<1x32xf32>
    %cst_24 = arith.constant dense<0.000000e+00> : vector<16xf32>
    %39 = vector.multi_reduction <add>, %36, %cst_24 [1] : vector<16x32xf32> to vector<16xf32>
    %40 = vector.shape_cast %39 : vector<16xf32> to vector<16x1xf32>
    %cst_25 = arith.constant 3.200000e+01 : f32
    %41 = vector.broadcast %cst_25 : f32 to vector<16x1xf32>
    %42 = arith.divf %40, %41 : vector<16x1xf32>
    %43 = vector.broadcast %42 : vector<16x1xf32> to vector<16x32xf32>
    %44 = arith.subf %36, %43 : vector<16x32xf32>
    %45 = arith.mulf %44, %44 : vector<16x32xf32>
    %cst_26 = arith.constant dense<0.000000e+00> : vector<16xf32>
    %46 = vector.multi_reduction <add>, %45, %cst_26 [1] : vector<16x32xf32> to vector<16xf32>
    %47 = vector.shape_cast %46 : vector<16xf32> to vector<16x1xf32>
    %cst_27 = arith.constant 3.200000e+01 : f32
    %48 = vector.broadcast %cst_27 : f32 to vector<16x1xf32>
    %49 = arith.divf %47, %48 : vector<16x1xf32>
    %50 = vector.broadcast %42 : vector<16x1xf32> to vector<16x32xf32>
    %51 = arith.subf %36, %50 : vector<16x32xf32>
    %cst_28 = arith.constant 9.99999974E-6 : f32
    %52 = vector.broadcast %cst_28 : f32 to vector<16x1xf32>
    %53 = arith.addf %49, %52 : vector<16x1xf32>
    %54 = math.rsqrt %53 : vector<16x1xf32>
    %55 = vector.broadcast %54 : vector<16x1xf32> to vector<16x32xf32>
    %56 = arith.mulf %51, %55 : vector<16x32xf32>
    %57 = vector.broadcast %37 : vector<1x32xf32> to vector<16x32xf32>
    %58 = arith.mulf %56, %57 : vector<16x32xf32>
    %59 = vector.broadcast %38 : vector<1x32xf32> to vector<16x32xf32>
    %60 = arith.addf %58, %59 : vector<16x32xf32>
    %61 = vector.shape_cast %60 : vector<16x32xf32> to vector<1x16x32xf32>
    %62 = vector.broadcast %61 : vector<1x16x32xf32> to vector<12x16x32xf32>
    %c0_29 = arith.constant 0 : index
    %c0_30 = arith.constant 0 : index
    %c0_31 = arith.constant 0 : index
    %63 = vector.load %arg9[%c0_29, %c0_30, %c0_31] : memref<12x32x8xf32, #tpu.memory_space<vmem>>, vector<12x32x8xf32>
    "tpu.trace_start"() <{level = 10 : i32, message = "gnd,gde->gne"}> : () -> ()
    %cst_32 = arith.constant dense<0.000000e+00> : vector<12x16x8xf32>
    %64 = tpu.matmul %62, %63, %cst_32 {dimension_numbers = #tpu.dot_dimension_numbers<[2], [1], [1], [2], [0, 0, 0, 1, 1, 2], [0], [0]>} : vector<12x16x32xf32>, vector<12x32x8xf32>, vector<12x16x8xf32> -> vector<12x16x8xf32>
    "tpu.trace_stop"() : () -> ()
    %65 = vector.extract_strided_slice %64 {offsets = [0, 0, 0], sizes = [4, 16, 8], strides = [1, 1, 1]} : vector<12x16x8xf32> to vector<4x16x8xf32>
    %cst_33 = arith.constant 0.176776692 : f32
    %66 = vector.broadcast %cst_33 : f32 to vector<4x16x8xf32>
    %67 = arith.mulf %65, %66 : vector<4x16x8xf32>
    %68 = vector.extract_strided_slice %64 {offsets = [4, 0, 0], sizes = [4, 16, 8], strides = [1, 1, 1]} : vector<12x16x8xf32> to vector<4x16x8xf32>
    %69 = vector.extract_strided_slice %64 {offsets = [8, 0, 0], sizes = [4, 16, 8], strides = [1, 1, 1]} : vector<12x16x8xf32> to vector<4x16x8xf32>
    %70 = vector.shape_cast %67 : vector<4x16x8xf32> to vector<8x8x8xf32>
    %71 = vector.shape_cast %68 : vector<4x16x8xf32> to vector<8x8x8xf32>
    %72 = vector.shape_cast %69 : vector<4x16x8xf32> to vector<8x8x8xf32>
    "tpu.trace_start"() <{level = 10 : i32, message = "gsd,gtd->gst"}> : () -> ()
    %cst_34 = arith.constant dense<0.000000e+00> : vector<8x8x8xf32>
    %73 = tpu.matmul %70, %71, %cst_34 {dimension_numbers = #tpu.dot_dimension_numbers<[2], [2], [1], [1], [0, 0, 0, 1, 1, 1], [0], [0]>} : vector<8x8x8xf32>, vector<8x8x8xf32>, vector<8x8x8xf32> -> vector<8x8x8xf32>
    "tpu.trace_stop"() : () -> ()
    %cst_35 = arith.constant dense<0xFF800000> : vector<8x8xf32>
    %74 = vector.multi_reduction <maximumf>, %73, %cst_35 [2] : vector<8x8x8xf32> to vector<8x8xf32>
    %75 = vector.shape_cast %74 : vector<8x8xf32> to vector<8x8x1xf32>
    %76 = vector.broadcast %75 : vector<8x8x1xf32> to vector<8x8x8xf32>
    %77 = arith.subf %73, %76 : vector<8x8x8xf32>
    %78 = math.exp %77 : vector<8x8x8xf32>
    %cst_36 = arith.constant dense<0.000000e+00> : vector<8x8xf32>
    %79 = vector.multi_reduction <add>, %78, %cst_36 [2] : vector<8x8x8xf32> to vector<8x8xf32>
    %80 = vector.shape_cast %79 : vector<8x8xf32> to vector<8x8x1xf32>
    %81 = tpu.reciprocal %80 {approx = true} : vector<8x8x1xf32> -> vector<8x8x1xf32>
    %82 = vector.broadcast %81 : vector<8x8x1xf32> to vector<8x8x8xf32>
    %83 = arith.mulf %78, %82 : vector<8x8x8xf32>
    "tpu.trace_start"() <{level = 10 : i32, message = "gst,gtd->gsd"}> : () -> ()
    %cst_37 = arith.constant dense<0.000000e+00> : vector<8x8x8xf32>
    %84 = tpu.matmul %83, %72, %cst_37 {dimension_numbers = #tpu.dot_dimension_numbers<[2], [1], [1], [2], [0, 0, 0, 1, 1, 2], [0], [0]>} : vector<8x8x8xf32>, vector<8x8x8xf32>, vector<8x8x8xf32> -> vector<8x8x8xf32>
    "tpu.trace_stop"() : () -> ()
    %85 = vector.shape_cast %84 : vector<8x8x8xf32> to vector<4x16x8xf32>
    %c0_38 = arith.constant 0 : index
    %c0_39 = arith.constant 0 : index
    %c0_40 = arith.constant 0 : index
    %86 = vector.load %arg10[%c0_38, %c0_39, %c0_40] : memref<4x8x32xf32, #tpu.memory_space<vmem>>, vector<4x8x32xf32>
    "tpu.trace_start"() <{level = 10 : i32, message = "hne,hej->hnj"}> : () -> ()
    %cst_41 = arith.constant dense<0.000000e+00> : vector<4x16x32xf32>
    %87 = tpu.matmul %85, %86, %cst_41 {dimension_numbers = #tpu.dot_dimension_numbers<[2], [1], [1], [2], [0, 0, 0, 1, 1, 2], [0], [0]>} : vector<4x16x8xf32>, vector<4x8x32xf32>, vector<4x16x32xf32> -> vector<4x16x32xf32>
    "tpu.trace_stop"() : () -> ()
    %c0_42 = arith.constant 0 : index
    %c0_43 = arith.constant 0 : index
    %88 = vector.load %arg11[%c0_42, %c0_43] : memref<1x32xf32, #tpu.memory_space<vmem>>, vector<1x32xf32>
    %89 = vector.extract_strided_slice %87 {offsets = [0, 0, 0], sizes = [1, 16, 32], strides = [1, 1, 1]} : vector<4x16x32xf32> to vector<1x16x32xf32>
    %90 = vector.shape_cast %89 : vector<1x16x32xf32> to vector<16x32xf32>
    %91 = vector.broadcast %88 : vector<1x32xf32> to vector<16x32xf32>
    %92 = arith.addf %91, %90 : vector<16x32xf32>
    %93 = vector.extract_strided_slice %87 {offsets = [1, 0, 0], sizes = [1, 16, 32], strides = [1, 1, 1]} : vector<4x16x32xf32> to vector<1x16x32xf32>
    %94 = vector.shape_cast %93 : vector<1x16x32xf32> to vector<16x32xf32>
    %95 = arith.addf %92, %94 : vector<16x32xf32>
    %96 = vector.extract_strided_slice %87 {offsets = [2, 0, 0], sizes = [1, 16, 32], strides = [1, 1, 1]} : vector<4x16x32xf32> to vector<1x16x32xf32>
    %97 = vector.shape_cast %96 : vector<1x16x32xf32> to vector<16x32xf32>
    %98 = arith.addf %95, %97 : vector<16x32xf32>
    %99 = vector.extract_strided_slice %87 {offsets = [3, 0, 0], sizes = [1, 16, 32], strides = [1, 1, 1]} : vector<4x16x32xf32> to vector<1x16x32xf32>
    %100 = vector.shape_cast %99 : vector<1x16x32xf32> to vector<16x32xf32>
    %101 = arith.addf %98, %100 : vector<16x32xf32>
    %102 = arith.addf %36, %101 : vector<16x32xf32>
    %c0_44 = arith.constant 0 : index
    %c0_45 = arith.constant 0 : index
    %103 = vector.load %arg12[%c0_44, %c0_45] : memref<1x32xf32, #tpu.memory_space<vmem>>, vector<1x32xf32>
    %c0_46 = arith.constant 0 : index
    %c0_47 = arith.constant 0 : index
    %104 = vector.load %arg13[%c0_46, %c0_47] : memref<1x32xf32, #tpu.memory_space<vmem>>, vector<1x32xf32>
    %cst_48 = arith.constant dense<0.000000e+00> : vector<16xf32>
    %105 = vector.multi_reduction <add>, %102, %cst_48 [1] : vector<16x32xf32> to vector<16xf32>
    %106 = vector.shape_cast %105 : vector<16xf32> to vector<16x1xf32>
    %cst_49 = arith.constant 3.200000e+01 : f32
    %107 = vector.broadcast %cst_49 : f32 to vector<16x1xf32>
    %108 = arith.divf %106, %107 : vector<16x1xf32>
    %109 = vector.broadcast %108 : vector<16x1xf32> to vector<16x32xf32>
    %110 = arith.subf %102, %109 : vector<16x32xf32>
    %111 = arith.mulf %110, %110 : vector<16x32xf32>
    %cst_50 = arith.constant dense<0.000000e+00> : vector<16xf32>
    %112 = vector.multi_reduction <add>, %111, %cst_50 [1] : vector<16x32xf32> to vector<16xf32>
    %113 = vector.shape_cast %112 : vector<16xf32> to vector<16x1xf32>
    %cst_51 = arith.constant 3.200000e+01 : f32
    %114 = vector.broadcast %cst_51 : f32 to vector<16x1xf32>
    %115 = arith.divf %113, %114 : vector<16x1xf32>
    %116 = vector.broadcast %108 : vector<16x1xf32> to vector<16x32xf32>
    %117 = arith.subf %102, %116 : vector<16x32xf32>
    %cst_52 = arith.constant 9.99999974E-6 : f32
    %118 = vector.broadcast %cst_52 : f32 to vector<16x1xf32>
    %119 = arith.addf %115, %118 : vector<16x1xf32>
    %120 = math.rsqrt %119 : vector<16x1xf32>
    %121 = vector.broadcast %120 : vector<16x1xf32> to vector<16x32xf32>
    %122 = arith.mulf %117, %121 : vector<16x32xf32>
    %123 = vector.broadcast %103 : vector<1x32xf32> to vector<16x32xf32>
    %124 = arith.mulf %122, %123 : vector<16x32xf32>
    %125 = vector.broadcast %104 : vector<1x32xf32> to vector<16x32xf32>
    %126 = arith.addf %124, %125 : vector<16x32xf32>
    %c0_53 = arith.constant 0 : index
    %c0_54 = arith.constant 0 : index
    %127 = vector.load %arg14[%c0_53, %c0_54] : memref<32x64xf32, #tpu.memory_space<vmem>>, vector<32x64xf32>
    %cst_55 = arith.constant dense<0.000000e+00> : vector<16x64xf32>
    %128 = tpu.matmul %126, %127, %cst_55 {dimension_numbers = #tpu.dot_dimension_numbers<[1], [0], [0], [1], [0, 0, 1, 1], [], []>} : vector<16x32xf32>, vector<32x64xf32>, vector<16x64xf32> -> vector<16x64xf32>
    %c0_56 = arith.constant 0 : index
    %c0_57 = arith.constant 0 : index
    %129 = vector.load %arg15[%c0_56, %c0_57] : memref<1x64xf32, #tpu.memory_space<vmem>>, vector<1x64xf32>
    %130 = vector.broadcast %129 : vector<1x64xf32> to vector<16x64xf32>
    %131 = arith.addf %128, %130 : vector<16x64xf32>
    %cst_58 = arith.constant 5.000000e-01 : f32
    %132 = vector.broadcast %cst_58 : f32 to vector<16x64xf32>
    %133 = arith.mulf %132, %131 : vector<16x64xf32>
    %cst_59 = arith.constant 0.707106769 : f32
    %134 = vector.broadcast %cst_59 : f32 to vector<16x64xf32>
    %135 = arith.mulf %131, %134 : vector<16x64xf32>
    %136 = math.erf %135 : vector<16x64xf32>
    %cst_60 = arith.constant 1.000000e+00 : f32
    %137 = vector.broadcast %cst_60 : f32 to vector<16x64xf32>
    %138 = arith.addf %137, %136 : vector<16x64xf32>
    %139 = arith.mulf %133, %138 : vector<16x64xf32>
    %c0_61 = arith.constant 0 : index
    %c0_62 = arith.constant 0 : index
    %140 = vector.load %arg16[%c0_61, %c0_62] : memref<64x32xf32, #tpu.memory_space<vmem>>, vector<64x32xf32>
    %cst_63 = arith.constant dense<0.000000e+00> : vector<16x32xf32>
    %141 = tpu.matmul %139, %140, %cst_63 {dimension_numbers = #tpu.dot_dimension_numbers<[1], [0], [0], [1], [0, 0, 1, 1], [], []>} : vector<16x64xf32>, vector<64x32xf32>, vector<16x32xf32> -> vector<16x32xf32>
    %142 = arith.addf %102, %141 : vector<16x32xf32>
    %c0_64 = arith.constant 0 : index
    %c0_65 = arith.constant 0 : index
    %143 = vector.load %arg17[%c0_64, %c0_65] : memref<1x32xf32, #tpu.memory_space<vmem>>, vector<1x32xf32>
    %144 = vector.broadcast %143 : vector<1x32xf32> to vector<16x32xf32>
    %145 = arith.addf %142, %144 : vector<16x32xf32>
    %c0_66 = arith.constant 0 : index
    %c0_67 = arith.constant 0 : index
    %146 = vector.load %arg18[%c0_66, %c0_67] : memref<1x32xf32, #tpu.memory_space<vmem>>, vector<1x32xf32>
    %c0_68 = arith.constant 0 : index
    %c0_69 = arith.constant 0 : index
    %147 = vector.load %arg19[%c0_68, %c0_69] : memref<1x32xf32, #tpu.memory_space<vmem>>, vector<1x32xf32>
    %cst_70 = arith.constant dense<0.000000e+00> : vector<16xf32>
    %148 = vector.multi_reduction <add>, %145, %cst_70 [1] : vector<16x32xf32> to vector<16xf32>
    %149 = vector.shape_cast %148 : vector<16xf32> to vector<16x1xf32>
    %cst_71 = arith.constant 3.200000e+01 : f32
    %150 = vector.broadcast %cst_71 : f32 to vector<16x1xf32>
    %151 = arith.divf %149, %150 : vector<16x1xf32>
    %152 = vector.broadcast %151 : vector<16x1xf32> to vector<16x32xf32>
    %153 = arith.subf %145, %152 : vector<16x32xf32>
    %154 = arith.mulf %153, %153 : vector<16x32xf32>
    %cst_72 = arith.constant dense<0.000000e+00> : vector<16xf32>
    %155 = vector.multi_reduction <add>, %154, %cst_72 [1] : vector<16x32xf32> to vector<16xf32>
    %156 = vector.shape_cast %155 : vector<16xf32> to vector<16x1xf32>
    %cst_73 = arith.constant 3.200000e+01 : f32
    %157 = vector.broadcast %cst_73 : f32 to vector<16x1xf32>
    %158 = arith.divf %156, %157 : vector<16x1xf32>
    %159 = vector.broadcast %151 : vector<16x1xf32> to vector<16x32xf32>
    %160 = arith.subf %145, %159 : vector<16x32xf32>
    %cst_74 = arith.constant 9.99999974E-6 : f32
    %161 = vector.broadcast %cst_74 : f32 to vector<16x1xf32>
    %162 = arith.addf %158, %161 : vector<16x1xf32>
    %163 = math.rsqrt %162 : vector<16x1xf32>
    %164 = vector.broadcast %163 : vector<16x1xf32> to vector<16x32xf32>
    %165 = arith.mulf %160, %164 : vector<16x32xf32>
    %166 = vector.broadcast %146 : vector<1x32xf32> to vector<16x32xf32>
    %167 = arith.mulf %165, %166 : vector<16x32xf32>
    %168 = vector.broadcast %147 : vector<1x32xf32> to vector<16x32xf32>
    %169 = arith.addf %167, %168 : vector<16x32xf32>
    %170 = vector.shape_cast %169 : vector<16x32xf32> to vector<1x16x32xf32>
    %171 = vector.broadcast %170 : vector<1x16x32xf32> to vector<12x16x32xf32>
    %c0_75 = arith.constant 0 : index
    %c0_76 = arith.constant 0 : index
    %c0_77 = arith.constant 0 : index
    %172 = vector.load %arg20[%c0_75, %c0_76, %c0_77] : memref<12x32x8xf32, #tpu.memory_space<vmem>>, vector<12x32x8xf32>
    "tpu.trace_start"() <{level = 10 : i32, message = "gnd,gde->gne"}> : () -> ()
    %cst_78 = arith.constant dense<0.000000e+00> : vector<12x16x8xf32>
    %173 = tpu.matmul %171, %172, %cst_78 {dimension_numbers = #tpu.dot_dimension_numbers<[2], [1], [1], [2], [0, 0, 0, 1, 1, 2], [0], [0]>} : vector<12x16x32xf32>, vector<12x32x8xf32>, vector<12x16x8xf32> -> vector<12x16x8xf32>
    "tpu.trace_stop"() : () -> ()
    %174 = vector.extract_strided_slice %173 {offsets = [0, 0, 0], sizes = [4, 16, 8], strides = [1, 1, 1]} : vector<12x16x8xf32> to vector<4x16x8xf32>
    %cst_79 = arith.constant 0.176776692 : f32
    %175 = vector.broadcast %cst_79 : f32 to vector<4x16x8xf32>
    %176 = arith.mulf %174, %175 : vector<4x16x8xf32>
    %177 = vector.extract_strided_slice %173 {offsets = [4, 0, 0], sizes = [4, 16, 8], strides = [1, 1, 1]} : vector<12x16x8xf32> to vector<4x16x8xf32>
    %178 = vector.extract_strided_slice %173 {offsets = [8, 0, 0], sizes = [4, 16, 8], strides = [1, 1, 1]} : vector<12x16x8xf32> to vector<4x16x8xf32>
    %179 = vector.shape_cast %176 : vector<4x16x8xf32> to vector<8x8x8xf32>
    %180 = vector.shape_cast %177 : vector<4x16x8xf32> to vector<8x8x8xf32>
    %181 = vector.shape_cast %178 : vector<4x16x8xf32> to vector<8x8x8xf32>
    "tpu.trace_start"() <{level = 10 : i32, message = "gsd,gtd->gst"}> : () -> ()
    %cst_80 = arith.constant dense<0.000000e+00> : vector<8x8x8xf32>
    %182 = tpu.matmul %179, %180, %cst_80 {dimension_numbers = #tpu.dot_dimension_numbers<[2], [2], [1], [1], [0, 0, 0, 1, 1, 1], [0], [0]>} : vector<8x8x8xf32>, vector<8x8x8xf32>, vector<8x8x8xf32> -> vector<8x8x8xf32>
    "tpu.trace_stop"() : () -> ()
    %cst_81 = arith.constant dense<0xFF800000> : vector<8x8xf32>
    %183 = vector.multi_reduction <maximumf>, %182, %cst_81 [2] : vector<8x8x8xf32> to vector<8x8xf32>
    %184 = vector.shape_cast %183 : vector<8x8xf32> to vector<8x8x1xf32>
    %185 = vector.broadcast %184 : vector<8x8x1xf32> to vector<8x8x8xf32>
    %186 = arith.subf %182, %185 : vector<8x8x8xf32>
    %187 = math.exp %186 : vector<8x8x8xf32>
    %cst_82 = arith.constant dense<0.000000e+00> : vector<8x8xf32>
    %188 = vector.multi_reduction <add>, %187, %cst_82 [2] : vector<8x8x8xf32> to vector<8x8xf32>
    %189 = vector.shape_cast %188 : vector<8x8xf32> to vector<8x8x1xf32>
    %190 = tpu.reciprocal %189 {approx = true} : vector<8x8x1xf32> -> vector<8x8x1xf32>
    %191 = vector.broadcast %190 : vector<8x8x1xf32> to vector<8x8x8xf32>
    %192 = arith.mulf %187, %191 : vector<8x8x8xf32>
    "tpu.trace_start"() <{level = 10 : i32, message = "gst,gtd->gsd"}> : () -> ()
    %cst_83 = arith.constant dense<0.000000e+00> : vector<8x8x8xf32>
    %193 = tpu.matmul %192, %181, %cst_83 {dimension_numbers = #tpu.dot_dimension_numbers<[2], [1], [1], [2], [0, 0, 0, 1, 1, 2], [0], [0]>} : vector<8x8x8xf32>, vector<8x8x8xf32>, vector<8x8x8xf32> -> vector<8x8x8xf32>
    "tpu.trace_stop"() : () -> ()
    %194 = vector.shape_cast %193 : vector<8x8x8xf32> to vector<4x16x8xf32>
    %c0_84 = arith.constant 0 : index
    %c0_85 = arith.constant 0 : index
    %c0_86 = arith.constant 0 : index
    %195 = vector.load %arg21[%c0_84, %c0_85, %c0_86] : memref<4x8x32xf32, #tpu.memory_space<vmem>>, vector<4x8x32xf32>
    "tpu.trace_start"() <{level = 10 : i32, message = "hne,hej->hnj"}> : () -> ()
    %cst_87 = arith.constant dense<0.000000e+00> : vector<4x16x32xf32>
    %196 = tpu.matmul %194, %195, %cst_87 {dimension_numbers = #tpu.dot_dimension_numbers<[2], [1], [1], [2], [0, 0, 0, 1, 1, 2], [0], [0]>} : vector<4x16x8xf32>, vector<4x8x32xf32>, vector<4x16x32xf32> -> vector<4x16x32xf32>
    "tpu.trace_stop"() : () -> ()
    %c0_88 = arith.constant 0 : index
    %c0_89 = arith.constant 0 : index
    %197 = vector.load %arg22[%c0_88, %c0_89] : memref<1x32xf32, #tpu.memory_space<vmem>>, vector<1x32xf32>
    %198 = vector.extract_strided_slice %196 {offsets = [0, 0, 0], sizes = [1, 16, 32], strides = [1, 1, 1]} : vector<4x16x32xf32> to vector<1x16x32xf32>
    %199 = vector.shape_cast %198 : vector<1x16x32xf32> to vector<16x32xf32>
    %200 = vector.broadcast %197 : vector<1x32xf32> to vector<16x32xf32>
    %201 = arith.addf %200, %199 : vector<16x32xf32>
    %202 = vector.extract_strided_slice %196 {offsets = [1, 0, 0], sizes = [1, 16, 32], strides = [1, 1, 1]} : vector<4x16x32xf32> to vector<1x16x32xf32>
    %203 = vector.shape_cast %202 : vector<1x16x32xf32> to vector<16x32xf32>
    %204 = arith.addf %201, %203 : vector<16x32xf32>
    %205 = vector.extract_strided_slice %196 {offsets = [2, 0, 0], sizes = [1, 16, 32], strides = [1, 1, 1]} : vector<4x16x32xf32> to vector<1x16x32xf32>
    %206 = vector.shape_cast %205 : vector<1x16x32xf32> to vector<16x32xf32>
    %207 = arith.addf %204, %206 : vector<16x32xf32>
    %208 = vector.extract_strided_slice %196 {offsets = [3, 0, 0], sizes = [1, 16, 32], strides = [1, 1, 1]} : vector<4x16x32xf32> to vector<1x16x32xf32>
    %209 = vector.shape_cast %208 : vector<1x16x32xf32> to vector<16x32xf32>
    %210 = arith.addf %207, %209 : vector<16x32xf32>
    %211 = arith.addf %145, %210 : vector<16x32xf32>
    %c0_90 = arith.constant 0 : index
    %c0_91 = arith.constant 0 : index
    %212 = vector.load %arg23[%c0_90, %c0_91] : memref<1x32xf32, #tpu.memory_space<vmem>>, vector<1x32xf32>
    %c0_92 = arith.constant 0 : index
    %c0_93 = arith.constant 0 : index
    %213 = vector.load %arg24[%c0_92, %c0_93] : memref<1x32xf32, #tpu.memory_space<vmem>>, vector<1x32xf32>
    %cst_94 = arith.constant dense<0.000000e+00> : vector<16xf32>
    %214 = vector.multi_reduction <add>, %211, %cst_94 [1] : vector<16x32xf32> to vector<16xf32>
    %215 = vector.shape_cast %214 : vector<16xf32> to vector<16x1xf32>
    %cst_95 = arith.constant 3.200000e+01 : f32
    %216 = vector.broadcast %cst_95 : f32 to vector<16x1xf32>
    %217 = arith.divf %215, %216 : vector<16x1xf32>
    %218 = vector.broadcast %217 : vector<16x1xf32> to vector<16x32xf32>
    %219 = arith.subf %211, %218 : vector<16x32xf32>
    %220 = arith.mulf %219, %219 : vector<16x32xf32>
    %cst_96 = arith.constant dense<0.000000e+00> : vector<16xf32>
    %221 = vector.multi_reduction <add>, %220, %cst_96 [1] : vector<16x32xf32> to vector<16xf32>
    %222 = vector.shape_cast %221 : vector<16xf32> to vector<16x1xf32>
    %cst_97 = arith.constant 3.200000e+01 : f32
    %223 = vector.broadcast %cst_97 : f32 to vector<16x1xf32>
    %224 = arith.divf %222, %223 : vector<16x1xf32>
    %225 = vector.broadcast %217 : vector<16x1xf32> to vector<16x32xf32>
    %226 = arith.subf %211, %225 : vector<16x32xf32>
    %cst_98 = arith.constant 9.99999974E-6 : f32
    %227 = vector.broadcast %cst_98 : f32 to vector<16x1xf32>
    %228 = arith.addf %224, %227 : vector<16x1xf32>
    %229 = math.rsqrt %228 : vector<16x1xf32>
    %230 = vector.broadcast %229 : vector<16x1xf32> to vector<16x32xf32>
    %231 = arith.mulf %226, %230 : vector<16x32xf32>
    %232 = vector.broadcast %212 : vector<1x32xf32> to vector<16x32xf32>
    %233 = arith.mulf %231, %232 : vector<16x32xf32>
    %234 = vector.broadcast %213 : vector<1x32xf32> to vector<16x32xf32>
    %235 = arith.addf %233, %234 : vector<16x32xf32>
    %c0_99 = arith.constant 0 : index
    %c0_100 = arith.constant 0 : index
    %236 = vector.load %arg25[%c0_99, %c0_100] : memref<32x64xf32, #tpu.memory_space<vmem>>, vector<32x64xf32>
    %cst_101 = arith.constant dense<0.000000e+00> : vector<16x64xf32>
    %237 = tpu.matmul %235, %236, %cst_101 {dimension_numbers = #tpu.dot_dimension_numbers<[1], [0], [0], [1], [0, 0, 1, 1], [], []>} : vector<16x32xf32>, vector<32x64xf32>, vector<16x64xf32> -> vector<16x64xf32>
    %c0_102 = arith.constant 0 : index
    %c0_103 = arith.constant 0 : index
    %238 = vector.load %arg26[%c0_102, %c0_103] : memref<1x64xf32, #tpu.memory_space<vmem>>, vector<1x64xf32>
    %239 = vector.broadcast %238 : vector<1x64xf32> to vector<16x64xf32>
    %240 = arith.addf %237, %239 : vector<16x64xf32>
    %cst_104 = arith.constant 5.000000e-01 : f32
    %241 = vector.broadcast %cst_104 : f32 to vector<16x64xf32>
    %242 = arith.mulf %241, %240 : vector<16x64xf32>
    %cst_105 = arith.constant 0.707106769 : f32
    %243 = vector.broadcast %cst_105 : f32 to vector<16x64xf32>
    %244 = arith.mulf %240, %243 : vector<16x64xf32>
    %245 = math.erf %244 : vector<16x64xf32>
    %cst_106 = arith.constant 1.000000e+00 : f32
    %246 = vector.broadcast %cst_106 : f32 to vector<16x64xf32>
    %247 = arith.addf %246, %245 : vector<16x64xf32>
    %248 = arith.mulf %242, %247 : vector<16x64xf32>
    %c0_107 = arith.constant 0 : index
    %c0_108 = arith.constant 0 : index
    %249 = vector.load %arg27[%c0_107, %c0_108] : memref<64x32xf32, #tpu.memory_space<vmem>>, vector<64x32xf32>
    %cst_109 = arith.constant dense<0.000000e+00> : vector<16x32xf32>
    %250 = tpu.matmul %248, %249, %cst_109 {dimension_numbers = #tpu.dot_dimension_numbers<[1], [0], [0], [1], [0, 0, 1, 1], [], []>} : vector<16x64xf32>, vector<64x32xf32>, vector<16x32xf32> -> vector<16x32xf32>
    %251 = arith.addf %211, %250 : vector<16x32xf32>
    %c0_110 = arith.constant 0 : index
    %c0_111 = arith.constant 0 : index
    %252 = vector.load %arg28[%c0_110, %c0_111] : memref<1x32xf32, #tpu.memory_space<vmem>>, vector<1x32xf32>
    %253 = vector.broadcast %252 : vector<1x32xf32> to vector<16x32xf32>
    %254 = arith.addf %251, %253 : vector<16x32xf32>
    %c0_112 = arith.constant 0 : index
    %c0_113 = arith.constant 0 : index
    %255 = vector.load %arg29[%c0_112, %c0_113] : memref<32x16xf32, #tpu.memory_space<vmem>>, vector<32x16xf32>
    %cst_114 = arith.constant dense<0.000000e+00> : vector<16x16xf32>
    %256 = tpu.matmul %254, %255, %cst_114 {dimension_numbers = #tpu.dot_dimension_numbers<[1], [0], [0], [1], [0, 0, 1, 1], [], []>} : vector<16x32xf32>, vector<32x16xf32>, vector<16x16xf32> -> vector<16x16xf32>
    %c0_115 = arith.constant 0 : index
    %c0_116 = arith.constant 0 : index
    %257 = vector.load %arg30[%c0_115, %c0_116] : memref<1x16xf32, #tpu.memory_space<vmem>>, vector<1x16xf32>
    %258 = vector.broadcast %257 : vector<1x16xf32> to vector<16x16xf32>
    %259 = arith.addf %256, %258 : vector<16x16xf32>
    %cst_117 = arith.constant 0.000000e+00 : f32
    %260 = vector.broadcast %cst_117 : f32 to vector<16x16xf32>
    %261 = arith.maximumf %259, %260 : vector<16x16xf32>
    %c0_118 = arith.constant 0 : index
    %c0_119 = arith.constant 0 : index
    %262 = vector.load %arg31[%c0_118, %c0_119] : memref<16x1xf32, #tpu.memory_space<vmem>>, vector<16x1xf32>
    %cst_120 = arith.constant dense<0.000000e+00> : vector<16x1xf32>
    %263 = tpu.matmul %261, %262, %cst_120 {dimension_numbers = #tpu.dot_dimension_numbers<[1], [0], [0], [1], [0, 0, 1, 1], [], []>} : vector<16x16xf32>, vector<16x1xf32>, vector<16x1xf32> -> vector<16x1xf32>
    %c0_121 = arith.constant 0 : index
    %c0_122 = arith.constant 0 : index
    %264 = vector.load %arg32[%c0_121, %c0_122] : memref<1x1xf32, #tpu.memory_space<vmem>>, vector<1x1xf32>
    %265 = vector.broadcast %264 : vector<1x1xf32> to vector<16x1xf32>
    %266 = arith.addf %263, %265 : vector<16x1xf32>
    %267 = arith.negf %266 : vector<16x1xf32>
    %268 = math.exp %267 : vector<16x1xf32>
    %cst_123 = arith.constant 1.000000e+00 : f32
    %269 = vector.broadcast %cst_123 : f32 to vector<16x1xf32>
    %270 = arith.addf %269, %268 : vector<16x1xf32>
    %271 = arith.divf %269, %270 : vector<16x1xf32>
    %c0_124 = arith.constant 0 : index
    %c0_125 = arith.constant 0 : index
    %272 = vector.load %arg34[%c0_124, %c0_125] : memref<16x1xf32, #tpu.memory_space<vmem>>, vector<16x1xf32>
    tpu.vector_store %arg34[%c0_124, %c0_125], %271 {strides = array<i32>} : memref<16x1xf32, #tpu.memory_space<vmem>>, vector<16x1xf32>,
    %c0_126 = arith.constant 0 : index
    %c0_127 = arith.constant 0 : index
    %273 = vector.load %arg33[%c0_126, %c0_127] : memref<32x128xf32, #tpu.memory_space<vmem>>, vector<32x128xf32>
    %cst_128 = arith.constant dense<0.000000e+00> : vector<16x128xf32>
    %274 = tpu.matmul %0, %273, %cst_128 {dimension_numbers = #tpu.dot_dimension_numbers<[1], [0], [0], [1], [0, 0, 1, 1], [], []>} : vector<16x32xf32>, vector<32x128xf32>, vector<16x128xf32> -> vector<16x128xf32>
    %cst_129 = arith.constant dense<0.000000e+00> : vector<16x128xf32>
    %275 = tpu.matmul %36, %273, %cst_129 {dimension_numbers = #tpu.dot_dimension_numbers<[1], [0], [0], [1], [0, 0, 1, 1], [], []>} : vector<16x32xf32>, vector<32x128xf32>, vector<16x128xf32> -> vector<16x128xf32>
    %cst_130 = arith.constant 0.000000e+00 : f32
    %276 = vector.broadcast %cst_130 : f32 to vector<1x128xf32>
    %277 = vector.extract_strided_slice %274 {offsets = [0, 0], sizes = [1, 128], strides = [1, 1]} : vector<16x128xf32> to vector<1x128xf32>
    %278 = vector.extract_strided_slice %274 {offsets = [1, 0], sizes = [1, 128], strides = [1, 1]} : vector<16x128xf32> to vector<1x128xf32>
    %279 = vector.extract_strided_slice %274 {offsets = [2, 0], sizes = [1, 128], strides = [1, 1]} : vector<16x128xf32> to vector<1x128xf32>
    %280 = vector.extract_strided_slice %274 {offsets = [3, 0], sizes = [1, 128], strides = [1, 1]} : vector<16x128xf32> to vector<1x128xf32>
    %281 = vector.extract_strided_slice %274 {offsets = [4, 0], sizes = [1, 128], strides = [1, 1]} : vector<16x128xf32> to vector<1x128xf32>
    %282 = vector.extract_strided_slice %274 {offsets = [5, 0], sizes = [1, 128], strides = [1, 1]} : vector<16x128xf32> to vector<1x128xf32>
    %283 = vector.extract_strided_slice %274 {offsets = [6, 0], sizes = [1, 128], strides = [1, 1]} : vector<16x128xf32> to vector<1x128xf32>
    %284 = vector.extract_strided_slice %274 {offsets = [7, 0], sizes = [1, 128], strides = [1, 1]} : vector<16x128xf32> to vector<1x128xf32>
    %285 = arith.minimumf %277, %278 : vector<1x128xf32>
    %286 = arith.maximumf %277, %278 : vector<1x128xf32>
    %287 = arith.minimumf %279, %280 : vector<1x128xf32>
    %288 = arith.maximumf %279, %280 : vector<1x128xf32>
    %289 = arith.minimumf %281, %282 : vector<1x128xf32>
    %290 = arith.maximumf %281, %282 : vector<1x128xf32>
    %291 = arith.minimumf %283, %284 : vector<1x128xf32>
    %292 = arith.maximumf %283, %284 : vector<1x128xf32>
    %293 = arith.minimumf %286, %287 : vector<1x128xf32>
    %294 = arith.maximumf %286, %287 : vector<1x128xf32>
    %295 = arith.minimumf %288, %289 : vector<1x128xf32>
    %296 = arith.maximumf %288, %289 : vector<1x128xf32>
    %297 = arith.minimumf %290, %291 : vector<1x128xf32>
    %298 = arith.maximumf %290, %291 : vector<1x128xf32>
    %299 = arith.minimumf %285, %293 : vector<1x128xf32>
    %300 = arith.maximumf %285, %293 : vector<1x128xf32>
    %301 = arith.minimumf %294, %295 : vector<1x128xf32>
    %302 = arith.maximumf %294, %295 : vector<1x128xf32>
    %303 = arith.minimumf %296, %297 : vector<1x128xf32>
    %304 = arith.maximumf %296, %297 : vector<1x128xf32>
    %305 = arith.minimumf %298, %292 : vector<1x128xf32>
    %306 = arith.maximumf %298, %292 : vector<1x128xf32>
    %307 = arith.minimumf %300, %301 : vector<1x128xf32>
    %308 = arith.maximumf %300, %301 : vector<1x128xf32>
    %309 = arith.minimumf %302, %303 : vector<1x128xf32>
    %310 = arith.maximumf %302, %303 : vector<1x128xf32>
    %311 = arith.minimumf %304, %305 : vector<1x128xf32>
    %312 = arith.maximumf %304, %305 : vector<1x128xf32>
    %313 = arith.minimumf %299, %307 : vector<1x128xf32>
    %314 = arith.maximumf %299, %307 : vector<1x128xf32>
    %315 = arith.minimumf %308, %309 : vector<1x128xf32>
    %316 = arith.maximumf %308, %309 : vector<1x128xf32>
    %317 = arith.minimumf %310, %311 : vector<1x128xf32>
    %318 = arith.maximumf %310, %311 : vector<1x128xf32>
    %319 = arith.minimumf %312, %306 : vector<1x128xf32>
    %320 = arith.maximumf %312, %306 : vector<1x128xf32>
    %321 = arith.minimumf %314, %315 : vector<1x128xf32>
    %322 = arith.maximumf %314, %315 : vector<1x128xf32>
    %323 = arith.minimumf %316, %317 : vector<1x128xf32>
    %324 = arith.maximumf %316, %317 : vector<1x128xf32>
    %325 = arith.minimumf %318, %319 : vector<1x128xf32>
    %326 = arith.maximumf %318, %319 : vector<1x128xf32>
    %327 = arith.minimumf %313, %321 : vector<1x128xf32>
    %328 = arith.maximumf %313, %321 : vector<1x128xf32>
    %329 = arith.minimumf %322, %323 : vector<1x128xf32>
    %330 = arith.maximumf %322, %323 : vector<1x128xf32>
    %331 = arith.minimumf %324, %325 : vector<1x128xf32>
    %332 = arith.maximumf %324, %325 : vector<1x128xf32>
    %333 = arith.minimumf %326, %320 : vector<1x128xf32>
    %334 = arith.maximumf %326, %320 : vector<1x128xf32>
    %335 = arith.minimumf %328, %329 : vector<1x128xf32>
    %336 = arith.maximumf %328, %329 : vector<1x128xf32>
    %337 = arith.minimumf %330, %331 : vector<1x128xf32>
    %338 = arith.maximumf %330, %331 : vector<1x128xf32>
    %339 = arith.minimumf %332, %333 : vector<1x128xf32>
    %340 = arith.maximumf %332, %333 : vector<1x128xf32>
    %341 = vector.extract_strided_slice %275 {offsets = [0, 0], sizes = [1, 128], strides = [1, 1]} : vector<16x128xf32> to vector<1x128xf32>
    %342 = vector.extract_strided_slice %275 {offsets = [1, 0], sizes = [1, 128], strides = [1, 1]} : vector<16x128xf32> to vector<1x128xf32>
    %343 = vector.extract_strided_slice %275 {offsets = [2, 0], sizes = [1, 128], strides = [1, 1]} : vector<16x128xf32> to vector<1x128xf32>
    %344 = vector.extract_strided_slice %275 {offsets = [3, 0], sizes = [1, 128], strides = [1, 1]} : vector<16x128xf32> to vector<1x128xf32>
    %345 = vector.extract_strided_slice %275 {offsets = [4, 0], sizes = [1, 128], strides = [1, 1]} : vector<16x128xf32> to vector<1x128xf32>
    %346 = vector.extract_strided_slice %275 {offsets = [5, 0], sizes = [1, 128], strides = [1, 1]} : vector<16x128xf32> to vector<1x128xf32>
    %347 = vector.extract_strided_slice %275 {offsets = [6, 0], sizes = [1, 128], strides = [1, 1]} : vector<16x128xf32> to vector<1x128xf32>
    %348 = vector.extract_strided_slice %275 {offsets = [7, 0], sizes = [1, 128], strides = [1, 1]} : vector<16x128xf32> to vector<1x128xf32>
    %349 = arith.minimumf %341, %342 : vector<1x128xf32>
    %350 = arith.maximumf %341, %342 : vector<1x128xf32>
    %351 = arith.minimumf %343, %344 : vector<1x128xf32>
    %352 = arith.maximumf %343, %344 : vector<1x128xf32>
    %353 = arith.minimumf %345, %346 : vector<1x128xf32>
    %354 = arith.maximumf %345, %346 : vector<1x128xf32>
    %355 = arith.minimumf %347, %348 : vector<1x128xf32>
    %356 = arith.maximumf %347, %348 : vector<1x128xf32>
    %357 = arith.minimumf %350, %351 : vector<1x128xf32>
    %358 = arith.maximumf %350, %351 : vector<1x128xf32>
    %359 = arith.minimumf %352, %353 : vector<1x128xf32>
    %360 = arith.maximumf %352, %353 : vector<1x128xf32>
    %361 = arith.minimumf %354, %355 : vector<1x128xf32>
    %362 = arith.maximumf %354, %355 : vector<1x128xf32>
    %363 = arith.minimumf %349, %357 : vector<1x128xf32>
    %364 = arith.maximumf %349, %357 : vector<1x128xf32>
    %365 = arith.minimumf %358, %359 : vector<1x128xf32>
    %366 = arith.maximumf %358, %359 : vector<1x128xf32>
    %367 = arith.minimumf %360, %361 : vector<1x128xf32>
    %368 = arith.maximumf %360, %361 : vector<1x128xf32>
    %369 = arith.minimumf %362, %356 : vector<1x128xf32>
    %370 = arith.maximumf %362, %356 : vector<1x128xf32>
    %371 = arith.minimumf %364, %365 : vector<1x128xf32>
    %372 = arith.maximumf %364, %365 : vector<1x128xf32>
    %373 = arith.minimumf %366, %367 : vector<1x128xf32>
    %374 = arith.maximumf %366, %367 : vector<1x128xf32>
    %375 = arith.minimumf %368, %369 : vector<1x128xf32>
    %376 = arith.maximumf %368, %369 : vector<1x128xf32>
    %377 = arith.minimumf %363, %371 : vector<1x128xf32>
    %378 = arith.maximumf %363, %371 : vector<1x128xf32>
    %379 = arith.minimumf %372, %373 : vector<1x128xf32>
    %380 = arith.maximumf %372, %373 : vector<1x128xf32>
    %381 = arith.minimumf %374, %375 : vector<1x128xf32>
    %382 = arith.maximumf %374, %375 : vector<1x128xf32>
    %383 = arith.minimumf %376, %370 : vector<1x128xf32>
    %384 = arith.maximumf %376, %370 : vector<1x128xf32>
    %385 = arith.minimumf %378, %379 : vector<1x128xf32>
    %386 = arith.maximumf %378, %379 : vector<1x128xf32>
    %387 = arith.minimumf %380, %381 : vector<1x128xf32>
    %388 = arith.maximumf %380, %381 : vector<1x128xf32>
    %389 = arith.minimumf %382, %383 : vector<1x128xf32>
    %390 = arith.maximumf %382, %383 : vector<1x128xf32>
    %391 = arith.minimumf %377, %385 : vector<1x128xf32>
    %392 = arith.maximumf %377, %385 : vector<1x128xf32>
    %393 = arith.minimumf %386, %387 : vector<1x128xf32>
    %394 = arith.maximumf %386, %387 : vector<1x128xf32>
    %395 = arith.minimumf %388, %389 : vector<1x128xf32>
    %396 = arith.maximumf %388, %389 : vector<1x128xf32>
    %397 = arith.minimumf %390, %384 : vector<1x128xf32>
    %398 = arith.maximumf %390, %384 : vector<1x128xf32>
    %399 = arith.minimumf %392, %393 : vector<1x128xf32>
    %400 = arith.maximumf %392, %393 : vector<1x128xf32>
    %401 = arith.minimumf %394, %395 : vector<1x128xf32>
    %402 = arith.maximumf %394, %395 : vector<1x128xf32>
    %403 = arith.minimumf %396, %397 : vector<1x128xf32>
    %404 = arith.maximumf %396, %397 : vector<1x128xf32>
    %405 = arith.subf %327, %391 : vector<1x128xf32>
    %406 = arith.mulf %405, %405 : vector<1x128xf32>
    %407 = arith.addf %276, %406 : vector<1x128xf32>
    %408 = arith.subf %335, %399 : vector<1x128xf32>
    %409 = arith.mulf %408, %408 : vector<1x128xf32>
    %410 = arith.addf %407, %409 : vector<1x128xf32>
    %411 = arith.subf %336, %400 : vector<1x128xf32>
    %412 = arith.mulf %411, %411 : vector<1x128xf32>
    %413 = arith.addf %410, %412 : vector<1x128xf32>
    %414 = arith.subf %337, %401 : vector<1x128xf32>
    %415 = arith.mulf %414, %414 : vector<1x128xf32>
    %416 = arith.addf %413, %415 : vector<1x128xf32>
    %417 = arith.subf %338, %402 : vector<1x128xf32>
    %418 = arith.mulf %417, %417 : vector<1x128xf32>
    %419 = arith.addf %416, %418 : vector<1x128xf32>
    %420 = arith.subf %339, %403 : vector<1x128xf32>
    %421 = arith.mulf %420, %420 : vector<1x128xf32>
    %422 = arith.addf %419, %421 : vector<1x128xf32>
    %423 = arith.subf %340, %404 : vector<1x128xf32>
    %424 = arith.mulf %423, %423 : vector<1x128xf32>
    %425 = arith.addf %422, %424 : vector<1x128xf32>
    %426 = arith.subf %334, %398 : vector<1x128xf32>
    %427 = arith.mulf %426, %426 : vector<1x128xf32>
    %428 = arith.addf %425, %427 : vector<1x128xf32>
    %429 = vector.extract_strided_slice %274 {offsets = [8, 0], sizes = [1, 128], strides = [1, 1]} : vector<16x128xf32> to vector<1x128xf32>
    %430 = vector.extract_strided_slice %274 {offsets = [9, 0], sizes = [1, 128], strides = [1, 1]} : vector<16x128xf32> to vector<1x128xf32>
    %431 = vector.extract_strided_slice %274 {offsets = [10, 0], sizes = [1, 128], strides = [1, 1]} : vector<16x128xf32> to vector<1x128xf32>
    %432 = vector.extract_strided_slice %274 {offsets = [11, 0], sizes = [1, 128], strides = [1, 1]} : vector<16x128xf32> to vector<1x128xf32>
    %433 = vector.extract_strided_slice %274 {offsets = [12, 0], sizes = [1, 128], strides = [1, 1]} : vector<16x128xf32> to vector<1x128xf32>
    %434 = vector.extract_strided_slice %274 {offsets = [13, 0], sizes = [1, 128], strides = [1, 1]} : vector<16x128xf32> to vector<1x128xf32>
    %435 = vector.extract_strided_slice %274 {offsets = [14, 0], sizes = [1, 128], strides = [1, 1]} : vector<16x128xf32> to vector<1x128xf32>
    %436 = vector.extract_strided_slice %274 {offsets = [15, 0], sizes = [1, 128], strides = [1, 1]} : vector<16x128xf32> to vector<1x128xf32>
    %437 = arith.minimumf %429, %430 : vector<1x128xf32>
    %438 = arith.maximumf %429, %430 : vector<1x128xf32>
    %439 = arith.minimumf %431, %432 : vector<1x128xf32>
    %440 = arith.maximumf %431, %432 : vector<1x128xf32>
    %441 = arith.minimumf %433, %434 : vector<1x128xf32>
    %442 = arith.maximumf %433, %434 : vector<1x128xf32>
    %443 = arith.minimumf %435, %436 : vector<1x128xf32>
    %444 = arith.maximumf %435, %436 : vector<1x128xf32>
    %445 = arith.minimumf %438, %439 : vector<1x128xf32>
    %446 = arith.maximumf %438, %439 : vector<1x128xf32>
    %447 = arith.minimumf %440, %441 : vector<1x128xf32>
    %448 = arith.maximumf %440, %441 : vector<1x128xf32>
    %449 = arith.minimumf %442, %443 : vector<1x128xf32>
    %450 = arith.maximumf %442, %443 : vector<1x128xf32>
    %451 = arith.minimumf %437, %445 : vector<1x128xf32>
    %452 = arith.maximumf %437, %445 : vector<1x128xf32>
    %453 = arith.minimumf %446, %447 : vector<1x128xf32>
    %454 = arith.maximumf %446, %447 : vector<1x128xf32>
    %455 = arith.minimumf %448, %449 : vector<1x128xf32>
    %456 = arith.maximumf %448, %449 : vector<1x128xf32>
    %457 = arith.minimumf %450, %444 : vector<1x128xf32>
    %458 = arith.maximumf %450, %444 : vector<1x128xf32>
    %459 = arith.minimumf %452, %453 : vector<1x128xf32>
    %460 = arith.maximumf %452, %453 : vector<1x128xf32>
    %461 = arith.minimumf %454, %455 : vector<1x128xf32>
    %462 = arith.maximumf %454, %455 : vector<1x128xf32>
    %463 = arith.minimumf %456, %457 : vector<1x128xf32>
    %464 = arith.maximumf %456, %457 : vector<1x128xf32>
    %465 = arith.minimumf %451, %459 : vector<1x128xf32>
    %466 = arith.maximumf %451, %459 : vector<1x128xf32>
    %467 = arith.minimumf %460, %461 : vector<1x128xf32>
    %468 = arith.maximumf %460, %461 : vector<1x128xf32>
    %469 = arith.minimumf %462, %463 : vector<1x128xf32>
    %470 = arith.maximumf %462, %463 : vector<1x128xf32>
    %471 = arith.minimumf %464, %458 : vector<1x128xf32>
    %472 = arith.maximumf %464, %458 : vector<1x128xf32>
    %473 = arith.minimumf %466, %467 : vector<1x128xf32>
    %474 = arith.maximumf %466, %467 : vector<1x128xf32>
    %475 = arith.minimumf %468, %469 : vector<1x128xf32>
    %476 = arith.maximumf %468, %469 : vector<1x128xf32>
    %477 = arith.minimumf %470, %471 : vector<1x128xf32>
    %478 = arith.maximumf %470, %471 : vector<1x128xf32>
    %479 = arith.minimumf %465, %473 : vector<1x128xf32>
    %480 = arith.maximumf %465, %473 : vector<1x128xf32>
    %481 = arith.minimumf %474, %475 : vector<1x128xf32>
    %482 = arith.maximumf %474, %475 : vector<1x128xf32>
    %483 = arith.minimumf %476, %477 : vector<1x128xf32>
    %484 = arith.maximumf %476, %477 : vector<1x128xf32>
    %485 = arith.minimumf %478, %472 : vector<1x128xf32>
    %486 = arith.maximumf %478, %472 : vector<1x128xf32>
    %487 = arith.minimumf %480, %481 : vector<1x128xf32>
    %488 = arith.maximumf %480, %481 : vector<1x128xf32>
    %489 = arith.minimumf %482, %483 : vector<1x128xf32>
    %490 = arith.maximumf %482, %483 : vector<1x128xf32>
    %491 = arith.minimumf %484, %485 : vector<1x128xf32>
    %492 = arith.maximumf %484, %485 : vector<1x128xf32>
    %493 = vector.extract_strided_slice %275 {offsets = [8, 0], sizes = [1, 128], strides = [1, 1]} : vector<16x128xf32> to vector<1x128xf32>
    %494 = vector.extract_strided_slice %275 {offsets = [9, 0], sizes = [1, 128], strides = [1, 1]} : vector<16x128xf32> to vector<1x128xf32>
    %495 = vector.extract_strided_slice %275 {offsets = [10, 0], sizes = [1, 128], strides = [1, 1]} : vector<16x128xf32> to vector<1x128xf32>
    %496 = vector.extract_strided_slice %275 {offsets = [11, 0], sizes = [1, 128], strides = [1, 1]} : vector<16x128xf32> to vector<1x128xf32>
    %497 = vector.extract_strided_slice %275 {offsets = [12, 0], sizes = [1, 128], strides = [1, 1]} : vector<16x128xf32> to vector<1x128xf32>
    %498 = vector.extract_strided_slice %275 {offsets = [13, 0], sizes = [1, 128], strides = [1, 1]} : vector<16x128xf32> to vector<1x128xf32>
    %499 = vector.extract_strided_slice %275 {offsets = [14, 0], sizes = [1, 128], strides = [1, 1]} : vector<16x128xf32> to vector<1x128xf32>
    %500 = vector.extract_strided_slice %275 {offsets = [15, 0], sizes = [1, 128], strides = [1, 1]} : vector<16x128xf32> to vector<1x128xf32>
    %501 = arith.minimumf %493, %494 : vector<1x128xf32>
    %502 = arith.maximumf %493, %494 : vector<1x128xf32>
    %503 = arith.minimumf %495, %496 : vector<1x128xf32>
    %504 = arith.maximumf %495, %496 : vector<1x128xf32>
    %505 = arith.minimumf %497, %498 : vector<1x128xf32>
    %506 = arith.maximumf %497, %498 : vector<1x128xf32>
    %507 = arith.minimumf %499, %500 : vector<1x128xf32>
    %508 = arith.maximumf %499, %500 : vector<1x128xf32>
    %509 = arith.minimumf %502, %503 : vector<1x128xf32>
    %510 = arith.maximumf %502, %503 : vector<1x128xf32>
    %511 = arith.minimumf %504, %505 : vector<1x128xf32>
    %512 = arith.maximumf %504, %505 : vector<1x128xf32>
    %513 = arith.minimumf %506, %507 : vector<1x128xf32>
    %514 = arith.maximumf %506, %507 : vector<1x128xf32>
    %515 = arith.minimumf %501, %509 : vector<1x128xf32>
    %516 = arith.maximumf %501, %509 : vector<1x128xf32>
    %517 = arith.minimumf %510, %511 : vector<1x128xf32>
    %518 = arith.maximumf %510, %511 : vector<1x128xf32>
    %519 = arith.minimumf %512, %513 : vector<1x128xf32>
    %520 = arith.maximumf %512, %513 : vector<1x128xf32>
    %521 = arith.minimumf %514, %508 : vector<1x128xf32>
    %522 = arith.maximumf %514, %508 : vector<1x128xf32>
    %523 = arith.minimumf %516, %517 : vector<1x128xf32>
    %524 = arith.maximumf %516, %517 : vector<1x128xf32>
    %525 = arith.minimumf %518, %519 : vector<1x128xf32>
    %526 = arith.maximumf %518, %519 : vector<1x128xf32>
    %527 = arith.minimumf %520, %521 : vector<1x128xf32>
    %528 = arith.maximumf %520, %521 : vector<1x128xf32>
    %529 = arith.minimumf %515, %523 : vector<1x128xf32>
    %530 = arith.maximumf %515, %523 : vector<1x128xf32>
    %531 = arith.minimumf %524, %525 : vector<1x128xf32>
    %532 = arith.maximumf %524, %525 : vector<1x128xf32>
    %533 = arith.minimumf %526, %527 : vector<1x128xf32>
    %534 = arith.maximumf %526, %527 : vector<1x128xf32>
    %535 = arith.minimumf %528, %522 : vector<1x128xf32>
    %536 = arith.maximumf %528, %522 : vector<1x128xf32>
    %537 = arith.minimumf %530, %531 : vector<1x128xf32>
    %538 = arith.maximumf %530, %531 : vector<1x128xf32>
    %539 = arith.minimumf %532, %533 : vector<1x128xf32>
    %540 = arith.maximumf %532, %533 : vector<1x128xf32>
    %541 = arith.minimumf %534, %535 : vector<1x128xf32>
    %542 = arith.maximumf %534, %535 : vector<1x128xf32>
    %543 = arith.minimumf %529, %537 : vector<1x128xf32>
    %544 = arith.maximumf %529, %537 : vector<1x128xf32>
    %545 = arith.minimumf %538, %539 : vector<1x128xf32>
    %546 = arith.maximumf %538, %539 : vector<1x128xf32>
    %547 = arith.minimumf %540, %541 : vector<1x128xf32>
    %548 = arith.maximumf %540, %541 : vector<1x128xf32>
    %549 = arith.minimumf %542, %536 : vector<1x128xf32>
    %550 = arith.maximumf %542, %536 : vector<1x128xf32>
    %551 = arith.minimumf %544, %545 : vector<1x128xf32>
    %552 = arith.maximumf %544, %545 : vector<1x128xf32>
    %553 = arith.minimumf %546, %547 : vector<1x128xf32>
    %554 = arith.maximumf %546, %547 : vector<1x128xf32>
    %555 = arith.minimumf %548, %549 : vector<1x128xf32>
    %556 = arith.maximumf %548, %549 : vector<1x128xf32>
    %557 = arith.subf %479, %543 : vector<1x128xf32>
    %558 = arith.mulf %557, %557 : vector<1x128xf32>
    %559 = arith.addf %428, %558 : vector<1x128xf32>
    %560 = arith.subf %487, %551 : vector<1x128xf32>
    %561 = arith.mulf %560, %560 : vector<1x128xf32>
    %562 = arith.addf %559, %561 : vector<1x128xf32>
    %563 = arith.subf %488, %552 : vector<1x128xf32>
    %564 = arith.mulf %563, %563 : vector<1x128xf32>
    %565 = arith.addf %562, %564 : vector<1x128xf32>
    %566 = arith.subf %489, %553 : vector<1x128xf32>
    %567 = arith.mulf %566, %566 : vector<1x128xf32>
    %568 = arith.addf %565, %567 : vector<1x128xf32>
    %569 = arith.subf %490, %554 : vector<1x128xf32>
    %570 = arith.mulf %569, %569 : vector<1x128xf32>
    %571 = arith.addf %568, %570 : vector<1x128xf32>
    %572 = arith.subf %491, %555 : vector<1x128xf32>
    %573 = arith.mulf %572, %572 : vector<1x128xf32>
    %574 = arith.addf %571, %573 : vector<1x128xf32>
    %575 = arith.subf %492, %556 : vector<1x128xf32>
    %576 = arith.mulf %575, %575 : vector<1x128xf32>
    %577 = arith.addf %574, %576 : vector<1x128xf32>
    %578 = arith.subf %486, %550 : vector<1x128xf32>
    %579 = arith.mulf %578, %578 : vector<1x128xf32>
    %580 = arith.addf %577, %579 : vector<1x128xf32>
    %581 = vector.shape_cast %580 : vector<1x128xf32> to vector<1x1x128xf32>
    %cst_131 = arith.constant dense<0.000000e+00> : vector<1xf32>
    %582 = vector.multi_reduction <add>, %581, %cst_131 [1, 2] : vector<1x1x128xf32> to vector<1xf32>
    %583 = vector.shape_cast %582 : vector<1xf32> to vector<1x1x1xf32>
    %584 = vector.extract %583[0, 0, 0] : f32 from vector<1x1x1xf32>
    %cst_132 = arith.constant 1.250000e-03 : f32
    %585 = arith.mulf %584, %cst_132 : f32
    %586 = vector.broadcast %585 : f32 to vector<1x1xf32>
    %c0_133 = arith.constant 0 : index
    %c0_134 = arith.constant 0 : index
    %587 = vector.load %arg35[%c0_133, %c0_134] : memref<1x1xf32, #tpu.memory_space<vmem>>, vector<1x1xf32>
    tpu.vector_store %arg35[%c0_133, %c0_134], %586 {strides = array<i32>} : memref<1x1xf32, #tpu.memory_space<vmem>>, vector<1x1xf32>,
    return
  }
}

</mosaic_0001>

<bundles_post_ra>
// kernel: forward.1
= control target key start
LH: loop header
LB: loop body
LE: loop exit
PB: predicated region body
PF: predicated region fallthrough
CT: control target
= control target key end

     0   :  { %s8129_s6 = smov 1   ;;  %s8130_s10 = smov 2   ;;  %s9085_s0 = inlined_call_operand.smem [shape: u32[36], index: -1, kind: input, shape index: {}] }
   0x1   :  { %s8175_s5 = sld [smem:[%s9085_s0]]   ;;  %s8131_s14 = smov 3  }
   0x2   :  { %s8180_s9 = sld [smem:[%s9085_s0 + %s8129_s6]]   ;;  %s8132_s18 = smov 4  }
   0x3   :  { %s8185_s13 = sld [smem:[%s9085_s0 + %s8130_s10]]   ;;  %s8133_s22 = smov 5  }
   0x4   :  { %s8190_s17 = sld [smem:[%s9085_s0 + %s8131_s14]]   ;;  %s8134_s26 = smov 6  }
   0x5   :  { %s8195_s21 = sld [smem:[%s9085_s0 + %s8132_s18]]   ;;  %s8135_s30 = smov 7  }
   0x6   :  { %s8200_s25 = sld [smem:[%s9085_s0 + %s8133_s22]]   ;;  %s8136_s4 = smov 8  }
   0x7   :  { %s8205_s29 = sld [smem:[%s9085_s0 + %s8134_s26]]   ;;  %s8137_s10 = smov 9  }
   0x8   :  { %s8210_s3 = sld [smem:[%s9085_s0 + %s8135_s30]]   ;;  %s8138_s15 = smov 10  }
   0x9   :  { %s8215_s8 = sld [smem:[%s9085_s0 + %s8136_s4]]   ;;  %s8139_s20 = smov 11  }
   0xa   :  { %s8220_s14 = sld [smem:[%s9085_s0 + %s8137_s10]]   ;;  %s8140_s26 = smov 12  }
   0xb   :  { %s8225_s19 = sld [smem:[%s9085_s0 + %s8138_s15]]   ;;  %s8141_s1 = smov 13  }
   0xc   :  { %s8230_s24 = sld [smem:[%s9085_s0 + %s8139_s20]]   ;;  %s8142_s7 = smov 14  }
   0xd   :  { %s8235_s30 = sld [smem:[%s9085_s0 + %s8140_s26]]   ;;  %s8143_s15 = smov 15  }
   0xe   :  { %s8240_s6 = sld [smem:[%s9085_s0 + %s8141_s1]]   ;;  %s8144_s22 = smov 16  }
   0xf   :  { %s8245_s12 = sld [smem:[%s9085_s0 + %s8142_s7]]   ;;  %s8145_s28 = smov 17  }
  0x10   :  { %s8250_s20 = sld [smem:[%s9085_s0 + %s8143_s15]]   ;;  %s8146_s7 = smov 18  }
  0x11   :  { %s8255_s27 = sld [smem:[%s9085_s0 + %s8144_s22]]   ;;  %s8147_s15 = smov 19  }
  0x12   :  { %s8260_s4 = sld [smem:[%s9085_s0 + %s8145_s28]]   ;;  %s8148_s22 = smov 20  }
  0x13   :  { %s8149_s28 = smov 21   ;;  %s8161_s1 = smov 33  }
  0x14   :  { %9093 = sst [smem:[#allocation6_spill]] %s8240_s6  ;;  %s8162_s10 = smov 34  }
  0x15   :  { %s8265_s6 = sld [smem:[%s9085_s0 + %s8146_s7]]   ;;  %s8150_s7 = smov 22  }
  0x16   :  { %9094 = sst [smem:[#allocation7_spill]] %s8250_s20  ;;  %s8163_s16 = smov 35  }
  0x17   :  { %9095 = sst [smem:[#allocation8_spill]] %s8255_s27 }
  0x18   :  { %9096 = sst [smem:[#allocation9_spill]] %s8260_s4 }
  0x19   :  { %s8270_s20 = sld [smem:[%s9085_s0 + %s8147_s15]]   ;;  %s8151_s15 = smov 23  }
  0x1a   :  { %s8275_s27 = sld [smem:[%s9085_s0 + %s8148_s22]]   ;;  %s8152_s22 = smov 24  }
  0x1b   :  { %9097 = sst [smem:[#allocation10_spill]] %s8265_s6 }
  0x1c   :  { %s8280_s4 = sld [smem:[%s9085_s0 + %s8149_s28]]   ;;  %s8153_s28 = smov 25  }
  0x1d   :  { %s8285_s6 = sld [smem:[%s9085_s0 + %s8150_s7]]   ;;  %s8154_s7 = smov 26  }
  0x1f   :  { %9098 = sst [smem:[#allocation11_spill]] %s8270_s20 }
  0x20   :  { %9099 = sst [smem:[#allocation12_spill]] %s8275_s27 }
  0x21   :  { %s8290_s20 = sld [smem:[%s9085_s0 + %s8151_s15]]   ;;  %s8155_s15 = smov 27  }
  0x22   :  { %9100 = sst [smem:[#allocation13_spill]] %s8280_s4 }
  0x23   :  { %9101 = sst [smem:[#allocation14_spill]] %s8285_s6 }
  0x24   :  { %s8295_s27 = sld [smem:[%s9085_s0 + %s8152_s22]]   ;;  %s8156_s22 = smov 28  }
  0x25   :  { %s8300_s4 = sld [smem:[%s9085_s0 + %s8153_s28]]   ;;  %s8157_s28 = smov 29  }
  0x26   :  { %s8305_s6 = sld [smem:[%s9085_s0 + %s8154_s7]]   ;;  %s8158_s7 = smov 30  }
  0x27   :  { %9102 = sst [smem:[#allocation15_spill]] %s8290_s20 }
  0x28   :  { %s8310_s20 = sld [smem:[%s9085_s0 + %s8155_s15]]   ;;  %s8159_s15 = smov 31  }
  0x2a   :  { %9103 = sst [smem:[#allocation16_spill]] %s8295_s27 }
  0x2b   :  { %9104 = sst [smem:[#allocation17_spill]] %s8300_s4 }
  0x2c   :  { %9105 = sst [smem:[#allocation18_spill]] %s8305_s6 }
  0x2d   :  { %s8315_s27 = sld [smem:[%s9085_s0 + %s8156_s22]]   ;;  %s8160_s22 = smov 32  }
  0x2e   :  { %9106 = sst [smem:[#allocation19_spill]] %s8310_s20 }
  0x2f   :  { %s8320_s4 = sld [smem:[%s9085_s0 + %s8157_s28]]  }
  0x30   :  { %s8325_s6 = sld [smem:[%s9085_s0 + %s8158_s7]]  }
  0x31   :  { %s8330_s20 = sld [smem:[%s9085_s0 + %s8159_s15]]  }
  0x33   :  { %9107 = sst [smem:[#allocation20_spill]] %s8315_s27 }
  0x34   :  { %s6911_s27 = sld [smem:[%s9085_s0 + %s8160_s22]]  }
  0x35   :  { %9108 = sst [smem:[#allocation21_spill]] %s8320_s4 }
  0x36   :  { %9109 = sst [smem:[#allocation22_spill]] %s8325_s6 }
  0x37   :  { %9110 = sst [smem:[#allocation23_spill]] %s8330_s20 }
  0x38   :  { %s8338_s4 = sld [smem:[%s9085_s0 + %s8161_s1]]  }
  0x39   :  { %s8343_s6 = sld [smem:[%s9085_s0 + %s8162_s10]]  }
  0x3a   :  { %s8348_s20 = sld [smem:[%s9085_s0 + %s8163_s16]]   ;;  %v77_v0 = vstv %s6911_s27 }
  0x3b   :  { %78 = vst [vmem:[#allocation2] sm:$0x1] %v77_v0 }
  0x3c   :  { %v153_v1 = vld [vmem:[%s8180_s9 + $0x18] sm:$0xff]  ;;  %v152_v2 = vld [vmem:[%s8180_s9 + $0x10] sm:$0xff]  ;;  %vm161_vm0 = vcmask 261120   ;;  %v148_v3 = vld [vmem:[%s8175_s5] sm:$0xff] }
  0x3d   :  { %7371 = vmatprep.subr.mxu0 %v153_v1  ;;  %v151_v4 = vld [vmem:[%s8180_s9 + $0x8] sm:$0xff]  ;;  %7379 = vmatprep.mubr.msk.f32.mxu0 %vm161_vm0, %v148_v3 }
  0x3e   :  { %7372 = vmatpush3.msra.mxu0 %v153_v1 }
  0x3f   :  { %79 = vsyncpa [#allocation4], 0  ;;  %7373 = vmatprep.subr.mxu0 %v152_v2  ;;  %v150_v5 = vld [vmem:[%s8180_s9] sm:$0xff]  ;;  %v149_v6 = vld [vmem:[%s8175_s5 + $0x8] sm:$0xff]  ;;  %vm245_vm1 = vcmask 523264   ;;  %vm8165_vm2 = vmmov 0  }
  0x40   :  { %7374 = vmatpush3.msra.mxu0 %v152_v2  ;;  %v6915_v8 = vld [vmem:[%s8185_s13] ss:$0 sm:$0xff]  ;;  %v298_v24 = vld [vmem:[%s8200_s25 + $0x38] sm:$0xff]  ;;  %v297_v25 = vld [vmem:[%s8200_s25 + $0x30] sm:$0xff]  ;;  %vm1394_vm3 = vcmask 64512   ;;  %s9111_s0 = sld [smem:[#allocation6_spill]] }
  0x41   :  { %7375 = vmatprep.subr.mxu0 %v151_v4  ;;  %7382 = vmatprep.subr.mxu1 %v298_v24  ;;  %v296_v26 = vld [vmem:[%s8200_s25 + $0x28] sm:$0xff]  ;;  %v295_v27 = vld [vmem:[%s8200_s25 + $0x20] sm:$0xff]  ;;  %v294_v28 = vld [vmem:[%s8200_s25 + $0x18] sm:$0xff]  ;;  %s9112_s9 = sld [smem:[#allocation8_spill]]  ;;  %vm6246_vm4 = vcmask 130048   ;;  %vm6340_vm5 = vcmask 7168  }
  0x42   :  { %7376 = vmatpush3.msra.mxu0 %v151_v4  ;;  %7383 = vmatpush3.msra.mxu1 %v298_v24  ;;  %v293_v29 = vld [vmem:[%s8200_s25 + $0x10] sm:$0xff]  ;;  %v292_v30 = vld [vmem:[%s8200_s25 + $0x8] sm:$0xff]  ;;  %v291_v31 = vld [vmem:[%s8200_s25] sm:$0xff]  ;;  %s9113_s13 = sld [smem:[#allocation7_spill]]  ;;  %vm6847_vm6 = vcmask 1040384   ;;  %vm6860_vm7 = vcmask 0  }
  0x43   :  { %7377 = vmatprep.subr.mxu0 %v150_v5  ;;  %7384 = vmatprep.subr.mxu1 %v297_v25  ;;  %v6918_v39 = vld [vmem:[%s8190_s17] ss:$0 sm:$0xff]  ;;  %v435_v3 = vld [vmem:[%s8220_s14 + $0x18] sm:$0xff]  ;;  %s9114_s17 = sld [smem:[#allocation9_spill]] }
  0x44   :  { %7378 = vmatpush3.msra.mxu0 %v150_v5  ;;  %7385 = vmatpush3.msra.mxu1 %v297_v25  ;;  %v6919_v41 = vld [vmem:[%s8195_s21] ss:$0 sm:$0xff]  ;;  %v443_v4 = vld [vmem:[%s8220_s14 + $0x58] sm:$0xff]  ;;  %v434_v5 = vld [vmem:[%s8220_s14 + $0x10] sm:$0xff]  ;;  %s9115_s21 = sld [smem:[#allocation12_spill]] }
  0x45   :  { %7380 = vmatmul.mubr.msk.f32.vlgmr.msra.gmra.mxu0 %vm161_vm0, %v149_v6  ;;  %7386 = vmatprep.subr.mxu1 %v296_v26  ;;  %v6920_v50 = vld [vmem:[%s8205_s29] ss:$0 sm:$0xff]  ;;  %v442_v6 = vld [vmem:[%s8220_s14 + $0x50] sm:$0xff]  ;;  %s9116_s25 = sld [smem:[#allocation10_spill]] }
  0x46   :  { %7387 = vmatpush3.msra.mxu1 %v296_v26  ;;  %7401 = vmatprep.subr.mxu0 %v435_v3  ;;  %v6924_v25 = vld [vmem:[%s8215_s8] ss:$0 sm:$0xff]  ;;  %s9117_s29 = sld [smem:[#allocation11_spill]] }
  0x47   :  { %7388 = vmatprep.subr.mxu1 %v295_v27  ;;  %7402 = vmatpush3.msra.mxu0 %v435_v3  ;;  %v477_v3 = vld [vmem:[%s8220_s14 + $0x168] sm:$0xff]  ;;  %s9119_s8 = sld [smem:[#allocation14_spill]] }
  0x48   :  { %7389 = vmatpush3.msra.mxu1 %v295_v27  ;;  %7403 = vmatprep.subr.mxu0 %v434_v5  ;;  %s9125_s27 = sld [smem:[#allocation21_spill]] }
  0x49   :  { %7390 = vmatprep.subr.mxu1 %v294_v28  ;;  %7404 = vmatpush3.msra.mxu0 %v434_v5  ;;  %v8164_v5 = vmov 0.0   ;;  %s9126_s22 = sld [smem:[#allocation20_spill]] }
  0x4a   :  { %7391 = vmatpush3.msra.mxu1 %v294_v28  ;;  %s9127_s23 = sld [smem:[#allocation23_spill]] }
  0x4b   :  { %7392 = vmatprep.subr.mxu1 %v293_v29  ;;  %s9128_s26 = sld [smem:[#allocation22_spill]] }
  0x4c   :  { %7393 = vmatpush3.msra.mxu1 %v293_v29  ;;  %v438_v29 = vld [vmem:[%s8220_s14 + $0x30] sm:$0xff] }
  0x4d   :  { %7394 = vmatprep.subr.mxu1 %v292_v30 }
  0x4e   :  { %7395 = vmatpush3.msra.mxu1 %v292_v30  ;;  %v450_v30 = vld [vmem:[%s8220_s14 + $0x90] sm:$0xff] }
  0x4f   :  { %7396 = vmatprep.subr.mxu1 %v291_v31 }
  0x50   :  { %7397 = vmatpush3.msra.mxu1 %v291_v31  ;;  %v437_v31 = vld [vmem:[%s8220_s14 + $0x28] sm:$0xff] }
  0x51   :  { %7423 = vmatprep.subr.mxu1 %v443_v4 }
 0x105   :  { %v7381_v7 = vpop.f32.mrf.mxu0 }
 0x106   :  { %v240_v11 = vadd.f32 %v7381_v7, %v6915_v8  ;;  %v433_v7 = vld [vmem:[%s8220_s14 + $0x8] sm:$0xff] }
 0x107   :  { %v234_v9 = vpop.f32.mrf.mxu0  ;;  %7405 = vmatprep.subr.mxu0 %v433_v7 }
 0x108   :  { %v235_v10 = vadd.f32 %v6915_v8, %v234_v9  ;;  %v249_v13 = vsel %vm245_vm1, %v240_v11, 0.0  ;;  %v441_v8 = vld [vmem:[%s8220_s14 + $0x48] sm:$0xff]  ;;  %7406 = vmatpush3.msra.mxu0 %v433_v7  ;;  %v432_v9 = vld [vmem:[%s8220_s14] sm:$0xff] }
 0x109   :  { %7407 = vmatprep.subr.mxu0 %v432_v9 }
 0x10a   :  { %v246_v12 = vsel %vm245_vm1, %v235_v10, 0.0  ;;  %7408 = vmatpush3.msra.mxu0 %v432_v9 }
 0x10b   :  { %247 = vadd.xlane.f32.xlu0 %v246_v12  ;;  %v451_v12 = vld [vmem:[%s8220_s14 + $0x98] sm:$0xff] }
 0x10f   :  { %250 = vadd.xlane.f32.xlu0 %v249_v13 }
 0x194   :  { %v248_v14 = vpop.xlane.xlu0 %247 }
 0x195   :  { %v253_v15 = vmul.f32 0.015625, %v248_v14 }
 0x197   :  { %v255_v16 = vsub.f32 %v235_v10, %v253_v15  ;;  %v440_v10 = vld [vmem:[%s8220_s14 + $0x40] sm:$0xff] }
 0x198   :  { %v251_v17 = vpop.xlane.xlu0 %250 }
 0x199   :  { %v254_v18 = vmul.f32 0.015625, %v251_v17  ;;  %v257_v19 = vmul.f32 %v255_v16, %v255_v16 }
 0x19b   :  { %v256_v20 = vsub.f32 %v240_v11, %v254_v18  ;;  %v259_v21 = vsel %vm245_vm1, %v257_v19, 0.0  ;;  %v439_v11 = vld [vmem:[%s8220_s14 + $0x38] sm:$0xff] }
 0x19c   :  { %260 = vadd.xlane.f32.xlu1 %v259_v21  ;;  %7412 = vmatprep.subr.mxu0 %v439_v11 }
 0x19d   :  { %v258_v22 = vmul.f32 %v256_v20, %v256_v20 }
 0x19f   :  { %v262_v23 = vsel %vm245_vm1, %v258_v22, 0.0 }
 0x1a0   :  { %263 = vadd.xlane.f32.xlu1 %v262_v23 }
 0x225   :  { %v261_v32 = vpop.xlane.xlu1 %260 }
 0x226   :  { %v265_v33 = vmul.f32 0.015625, %v261_v32  ;;  %v449_v32 = vld [vmem:[%s8220_s14 + $0x88] sm:$0xff] }
 0x228   :  { %v267_v34 = vadd.f32 1e-05, %v265_v33  ;;  %v436_v33 = vld [vmem:[%s8220_s14 + $0x20] sm:$0xff] }
 0x229   :  { %v264_v35 = vpop.xlane.xlu1 %263 }
 0x22a   :  { %8005 = vrsqrt.f32 %v267_v34  ;;  %v266_v36 = vmul.f32 0.015625, %v264_v35  ;;  %v448_v34 = vld [vmem:[%s8220_s14 + $0x80] sm:$0xff]  ;;  %v447_v35 = vld [vmem:[%s8220_s14 + $0x78] sm:$0xff] }
 0x22c   :  { %v268_v37 = vadd.f32 1e-05, %v266_v36  ;;  %v459_v36 = vld [vmem:[%s8220_s14 + $0xd8] sm:$0xff] }
 0x22e   :  { %8007 = vrsqrt.f32 %v268_v37  ;;  %v446_v37 = vld [vmem:[%s8220_s14 + $0x70] sm:$0xff] }
 0x237   :  { %v8006_v38 = vpop.eup %8005 }
 0x238   :  { %v271_v40 = vmul.f32 %v8006_v38, %v255_v16  ;;  %v458_v38 = vld [vmem:[%s8220_s14 + $0xd0] sm:$0xff] }
 0x23a   :  { %v279_v42 = vmul.f32 %v6918_v39, %v271_v40  ;;  %v457_v40 = vld [vmem:[%s8220_s14 + $0xc8] sm:$0xff] }
 0x23b   :  { %v8008_v43 = vpop.eup %8007 }
 0x23c   :  { %v272_v44 = vmul.f32 %v8008_v43, %v256_v20  ;;  %v287_v45 = vadd.f32 %v6919_v41, %v279_v42  ;;  %v6923_v20 = vld [vmem:[%s8210_s3] ss:$0 sm:$0xff]  ;;  %v455_v43 = vld [vmem:[%s8220_s14 + $0xb8] sm:$0xff]  ;;  %s9118_s3 = sld [smem:[#allocation13_spill]] }
 0x23d   :  { %v456_v42 = vld [vmem:[%s8220_s14 + $0xc0] sm:$0xff] }
 0x23e   :  { %v280_v46 = vmul.f32 %v6918_v39, %v272_v44  ;;  %v289_v47 = vmax.f32 %v287_v45, 0.0  ;;  %v445_v39 = vld [vmem:[%s8220_s14 + $0x68] sm:$0xff]  ;;  %v467_v44 = vld [vmem:[%s8220_s14 + $0x118] sm:$0xff]  ;;  %v454_v45 = vld [vmem:[%s8220_s14 + $0xb0] sm:$0xff] }
 0x240   :  { %v288_v48 = vadd.f32 %v6919_v41, %v280_v46  ;;  %7398 = vmatprep.mubr.msk.f32.mxu1 %vm245_vm1, %v289_v47  ;;  %v444_v41 = vld [vmem:[%s8220_s14 + $0x60] sm:$0xff]  ;;  %v466_v46 = vld [vmem:[%s8220_s14 + $0x110] sm:$0xff]  ;;  %v453_v47 = vld [vmem:[%s8220_s14 + $0xa8] sm:$0xff] }
 0x242   :  { %v290_v49 = vmax.f32 %v288_v48, 0.0  ;;  %v465_v48 = vld [vmem:[%s8220_s14 + $0x108] sm:$0xff] }
 0x244   :  { %7399 = vmatmul.mubr.msk.f32.vlgmr.msra.gmra.mxu1 %vm245_vm1, %v290_v49  ;;  %v452_v49 = vld [vmem:[%s8220_s14 + $0xa0] sm:$0xff] }
 0x245   :  { %7424 = vmatpush3.msra.mxu1 %v443_v4  ;;  %v476_v4 = vld [vmem:[%s8220_s14 + $0x160] sm:$0xff] }
 0x246   :  { %7425 = vmatprep.subr.mxu1 %v442_v6 }
 0x247   :  { %7426 = vmatpush3.msra.mxu1 %v442_v6 }
 0x248   :  { %7427 = vmatprep.subr.mxu1 %v441_v8 }
 0x249   :  { %7428 = vmatpush3.msra.mxu1 %v441_v8 }
 0x24a   :  { %7429 = vmatprep.subr.mxu1 %v440_v10 }
 0x24b   :  { %7430 = vmatpush3.msra.mxu1 %v440_v10 }
 0x24c   :  { %7445 = vmatprep.subr.mxu1 %v451_v12 }
 0x304   :  { %v7400_v51 = vpop.f32.mrf.mxu1 }
 0x305   :  { %v8376_v52 = vadd.f32 %v7400_v51, %v6920_v50  ;;  %v463_v51 = vld [vmem:[%s8220_s14 + $0xf8] sm:$0xff] }
 0x306   :  { %v378_v53 = vpop.f32.mrf.mxu1 }
 0x307   :  { %v8378_v54 = vadd.f32 %v6920_v50, %v378_v53  ;;  %v392_v55 = vsel %vm161_vm0, %v8376_v52, 0.0  ;;  %v464_v50 = vld [vmem:[%s8220_s14 + $0x100] sm:$0xff]  ;;  %v475_v53 = vld [vmem:[%s8220_s14 + $0x158] sm:$0xff] }
 0x308   :  { %393 = vadd.xlane.f32.xlu1 %v392_v55  ;;  %v462_v55 = vld [vmem:[%s8220_s14 + $0xf0] sm:$0xff] }
 0x309   :  { %v389_v56 = vsel %vm161_vm0, %v8378_v54, 0.0 }
 0x30a   :  { %390 = vadd.xlane.f32.xlu0 %v389_v56  ;;  %v474_v56 = vld [vmem:[%s8220_s14 + $0x150] sm:$0xff] }
 0x391   :  { %v394_v57 = vpop.xlane.xlu1 %393 }
 0x392   :  { %v397_v58 = vmul.f32 0.03125, %v394_v57  ;;  %v461_v57 = vld [vmem:[%s8220_s14 + $0xe8] sm:$0xff] }
 0x393   :  { %v391_v59 = vpop.xlane.xlu0 %390 }
 0x394   :  { %v399_v60 = vsub.f32 %v8376_v52, %v397_v58  ;;  %v396_v61 = vmul.f32 0.03125, %v391_v59  ;;  %v473_v58 = vld [vmem:[%s8220_s14 + $0x148] sm:$0xff]  ;;  %v460_v59 = vld [vmem:[%s8220_s14 + $0xe0] sm:$0xff] }
 0x396   :  { %v398_v62 = vsub.f32 %v8378_v54, %v396_v61  ;;  %v401_v63 = vmul.f32 %v399_v60, %v399_v60  ;;  %v471_v61 = vld [vmem:[%s8220_s14 + $0x138] sm:$0xff] }
 0x398   :  { %v405_v0 = vsel %vm161_vm0, %v401_v63, 0.0  ;;  %v400_v1 = vmul.f32 %v398_v62, %v398_v62  ;;  %v469_v63 = vld [vmem:[%s8220_s14 + $0x128] sm:$0xff] }
 0x399   :  { %406 = vadd.xlane.f32.xlu1 %v405_v0  ;;  %v468_v0 = vld [vmem:[%s8220_s14 + $0x120] sm:$0xff] }
 0x39a   :  { %v402_v2 = vsel %vm161_vm0, %v400_v1, 0.0  ;;  %v479_v1 = vld [vmem:[%s8220_s14 + $0x178] sm:$0xff] }
 0x39b   :  { %403 = vadd.xlane.f32.xlu0 %v402_v2  ;;  %v478_v2 = vld [vmem:[%s8220_s14 + $0x170] sm:$0xff] }
 0x422   :  { %v407_v13 = vpop.xlane.xlu1 %406 }
 0x423   :  { %v409_v14 = vmul.f32 0.03125, %v407_v13 }
 0x424   :  { %v404_v15 = vpop.xlane.xlu0 %403 }
 0x425   :  { %v411_v16 = vadd.f32 1e-05, %v409_v14  ;;  %v408_v17 = vmul.f32 0.03125, %v404_v15 }
 0x427   :  { %8009 = vrsqrt.f32 %v411_v16  ;;  %v410_v18 = vadd.f32 1e-05, %v408_v17 }
 0x429   :  { %8011 = vrsqrt.f32 %v410_v18 }
 0x434   :  { %v8010_v19 = vpop.eup %8009 }
 0x435   :  { %v415_v21 = vmul.f32 %v8010_v19, %v399_v60  ;;  %v472_v60 = vld [vmem:[%s8220_s14 + $0x140] sm:$0xff] }
 0x436   :  { %v8012_v22 = vpop.eup %8011 }
 0x437   :  { %v414_v23 = vmul.f32 %v8012_v22, %v398_v62  ;;  %v423_v24 = vmul.f32 %v6923_v20, %v415_v21  ;;  %v470_v62 = vld [vmem:[%s8220_s14 + $0x130] sm:$0xff]  ;;  %s9120_s14 = sld [smem:[#allocation17_spill]] }
 0x439   :  { %v422_v26 = vmul.f32 %v6923_v20, %v414_v23  ;;  %v8402_v28 = vadd.f32 %v6924_v25, %v423_v24 }
 0x43b   :  { %v8400_v27 = vadd.f32 %v6924_v25, %v422_v26 }
 0x43d   :  { %7409 = vmatprep.mubr.msk.f32.mxu0 %vm161_vm0, %v8400_v27  ;;  %7431 = vmatprep.mubr.msk.f32.mxu1 %vm161_vm0, %v8400_v27 }
 0x43e   :  { %7410 = vmatmul.mubr.msk.f32.vlgmr.msra.gmra.mxu0 %vm161_vm0, %v8402_v28  ;;  %7432 = vmatmul.mubr.msk.f32.vlgmr.msra.gmra.mxu1 %vm161_vm0, %v8402_v28 }
 0x43f   :  { %7413 = vmatpush3.msra.mxu0 %v439_v11  ;;  %7446 = vmatpush3.msra.mxu1 %v451_v12 }
 0x440   :  { %7414 = vmatprep.subr.mxu0 %v438_v29  ;;  %7420 = vmatprep.mubr.msk.f32.mxu0 %vm161_vm0, %v8400_v27 }
 0x441   :  { %7447 = vmatprep.subr.mxu1 %v450_v30  ;;  %7453 = vmatprep.mubr.msk.f32.mxu1 %vm161_vm0, %v8400_v27 }
 0x442   :  { %7415 = vmatpush3.msra.mxu0 %v438_v29  ;;  %7448 = vmatpush3.msra.mxu1 %v450_v30 }
 0x443   :  { %7416 = vmatprep.subr.mxu0 %v437_v31  ;;  %7449 = vmatprep.subr.mxu1 %v449_v32 }
 0x444   :  { %7417 = vmatpush3.msra.mxu0 %v437_v31  ;;  %7450 = vmatpush3.msra.mxu1 %v449_v32 }
 0x445   :  { %7418 = vmatprep.subr.mxu0 %v436_v33  ;;  %7451 = vmatprep.subr.mxu1 %v448_v34 }
 0x446   :  { %7419 = vmatpush3.msra.mxu0 %v436_v33  ;;  %7452 = vmatpush3.msra.mxu1 %v448_v34 }
 0x447   :  { %7421 = vmatmul.mubr.msk.f32.vlgmr.msra.gmra.mxu0 %vm161_vm0, %v8402_v28  ;;  %7434 = vmatprep.subr.mxu0 %v447_v35 }
 0x448   :  { %7454 = vmatmul.mubr.msk.f32.vlgmr.msra.gmra.mxu1 %vm161_vm0, %v8402_v28  ;;  %7467 = vmatprep.subr.mxu1 %v459_v36 }
 0x449   :  { %7435 = vmatpush3.msra.mxu0 %v447_v35  ;;  %7442 = vmatprep.mubr.msk.f32.mxu0 %vm161_vm0, %v8400_v27 }
 0x44a   :  { %7468 = vmatpush3.msra.mxu1 %v459_v36  ;;  %7475 = vmatprep.mubr.msk.f32.mxu1 %vm161_vm0, %v8400_v27 }
 0x44b   :  { %7436 = vmatprep.subr.mxu0 %v446_v37  ;;  %7469 = vmatprep.subr.mxu1 %v458_v38 }
 0x44c   :  { %7437 = vmatpush3.msra.mxu0 %v446_v37  ;;  %7470 = vmatpush3.msra.mxu1 %v458_v38 }
 0x44d   :  { %7438 = vmatprep.subr.mxu0 %v445_v39  ;;  %7471 = vmatprep.subr.mxu1 %v457_v40 }
 0x44e   :  { %7439 = vmatpush3.msra.mxu0 %v445_v39  ;;  %7472 = vmatpush3.msra.mxu1 %v457_v40 }
 0x44f   :  { %7440 = vmatprep.subr.mxu0 %v444_v41  ;;  %7473 = vmatprep.subr.mxu1 %v456_v42 }
 0x450   :  { %7441 = vmatpush3.msra.mxu0 %v444_v41  ;;  %7474 = vmatpush3.msra.mxu1 %v456_v42 }
 0x451   :  { %7443 = vmatmul.mubr.msk.f32.vlgmr.msra.gmra.mxu0 %vm161_vm0, %v8402_v28  ;;  %7456 = vmatprep.subr.mxu0 %v455_v43 }
 0x452   :  { %7476 = vmatmul.mubr.msk.f32.vlgmr.msra.gmra.mxu1 %vm161_vm0, %v8402_v28  ;;  %7489 = vmatprep.subr.mxu1 %v467_v44 }
 0x453   :  { %7457 = vmatpush3.msra.mxu0 %v455_v43  ;;  %7464 = vmatprep.mubr.msk.f32.mxu0 %vm161_vm0, %v8400_v27 }
 0x454   :  { %7490 = vmatpush3.msra.mxu1 %v467_v44  ;;  %7497 = vmatprep.mubr.msk.f32.mxu1 %vm161_vm0, %v8400_v27 }
 0x455   :  { %7458 = vmatprep.subr.mxu0 %v454_v45  ;;  %7491 = vmatprep.subr.mxu1 %v466_v46 }
 0x456   :  { %7459 = vmatpush3.msra.mxu0 %v454_v45  ;;  %7492 = vmatpush3.msra.mxu1 %v466_v46 }
 0x457   :  { %7460 = vmatprep.subr.mxu0 %v453_v47  ;;  %7493 = vmatprep.subr.mxu1 %v465_v48 }
 0x458   :  { %7461 = vmatpush3.msra.mxu0 %v453_v47  ;;  %7494 = vmatpush3.msra.mxu1 %v465_v48 }
 0x459   :  { %7462 = vmatprep.subr.mxu0 %v452_v49  ;;  %7495 = vmatprep.subr.mxu1 %v464_v50 }
 0x45a   :  { %7463 = vmatpush3.msra.mxu0 %v452_v49  ;;  %7496 = vmatpush3.msra.mxu1 %v464_v50 }
 0x45b   :  { %7465 = vmatmul.mubr.msk.f32.vlgmr.msra.gmra.mxu0 %vm161_vm0, %v8402_v28  ;;  %7478 = vmatprep.subr.mxu0 %v463_v51 }
 0x45c   :  { %7498 = vmatmul.mubr.msk.f32.vlgmr.msra.gmra.mxu1 %vm161_vm0, %v8402_v28  ;;  %7511 = vmatprep.subr.mxu1 %v475_v53 }
 0x45d   :  { %7479 = vmatpush3.msra.mxu0 %v463_v51  ;;  %7486 = vmatprep.mubr.msk.f32.mxu0 %vm161_vm0, %v8400_v27 }
 0x45e   :  { %7512 = vmatpush3.msra.mxu1 %v475_v53  ;;  %7519 = vmatprep.mubr.msk.f32.mxu1 %vm161_vm0, %v8400_v27 }
 0x45f   :  { %7480 = vmatprep.subr.mxu0 %v462_v55  ;;  %7513 = vmatprep.subr.mxu1 %v474_v56 }
 0x460   :  { %7481 = vmatpush3.msra.mxu0 %v462_v55  ;;  %7514 = vmatpush3.msra.mxu1 %v474_v56 }
 0x461   :  { %7482 = vmatprep.subr.mxu0 %v461_v57  ;;  %7515 = vmatprep.subr.mxu1 %v473_v58 }
 0x462   :  { %7483 = vmatpush3.msra.mxu0 %v461_v57  ;;  %7516 = vmatpush3.msra.mxu1 %v473_v58 }
 0x463   :  { %7484 = vmatprep.subr.mxu0 %v460_v59  ;;  %7517 = vmatprep.subr.mxu1 %v472_v60 }
 0x464   :  { %7485 = vmatpush3.msra.mxu0 %v460_v59  ;;  %7518 = vmatpush3.msra.mxu1 %v472_v60 }
 0x465   :  { %7487 = vmatmul.mubr.msk.f32.vlgmr.msra.gmra.mxu0 %vm161_vm0, %v8402_v28  ;;  %7500 = vmatprep.subr.mxu0 %v471_v61 }
 0x466   :  { %7520 = vmatmul.mubr.msk.f32.vlgmr.msra.gmra.mxu1 %vm161_vm0, %v8402_v28  ;;  %7501 = vmatpush3.msra.mxu0 %v471_v61 }
 0x467   :  { %7508 = vmatprep.mubr.msk.f32.mxu0 %vm161_vm0, %v8400_v27  ;;  %7502 = vmatprep.subr.mxu0 %v470_v62 }
 0x468   :  { %7503 = vmatpush3.msra.mxu0 %v470_v62  ;;  %7533 = vmatprep.subr.mxu1 %v8164_v5 }
 0x469   :  { %7504 = vmatprep.subr.mxu0 %v469_v63  ;;  %7535 = vmatprep.mubr.msk.f32.mxu1 %vm8165_vm2, %v8164_v5 }
 0x46a   :  { %7505 = vmatpush3.msra.mxu0 %v469_v63 }
 0x46b   :  { %7506 = vmatprep.subr.mxu0 %v468_v0 }
 0x46c   :  { %7507 = vmatpush3.msra.mxu0 %v468_v0 }
 0x46d   :  { %7509 = vmatmul.mubr.msk.f32.vlgmr.msra.gmra.mxu0 %vm161_vm0, %v8402_v28  ;;  %7522 = vmatprep.subr.mxu0 %v479_v1 }
 0x46e   :  { %7523 = vmatpush3.msra.mxu0 %v479_v1  ;;  %7530 = vmatprep.mubr.msk.f32.mxu0 %vm161_vm0, %v8400_v27 }
 0x46f   :  { %7524 = vmatprep.subr.mxu0 %v478_v2 }
 0x470   :  { %7525 = vmatpush3.msra.mxu0 %v478_v2 }
 0x471   :  { %7526 = vmatprep.subr.mxu0 %v477_v3 }
 0x472   :  { %7527 = vmatpush3.msra.mxu0 %v477_v3 }
 0x473   :  { %7528 = vmatprep.subr.mxu0 %v476_v4 }
 0x474   :  { %7529 = vmatpush3.msra.mxu0 %v476_v4 }
 0x475   :  { %7531 = vmatmul.mubr.msk.f32.vlgmr.msra.gmra.mxu0 %vm161_vm0, %v8402_v28  ;;  %7543 = vmatprep.subr.mxu0 %v8164_v5 }
 0x476   :  { %7545 = vmatprep.mubr.msk.f32.mxu0 %vm8165_vm2, %v8164_v5 }
 0x4fe   :  { %v7433_v6 = vpop.f32.mrf.mxu1  ;;  %v7411_v7 = vpop.f32.mrf.mxu0 }
 0x4ff   :  { %v1387_v14 = vmul.f32 0.17677669, %v7411_v7  ;;  %v1391_v23 = vmul.f32 0.17677669, %v7433_v6 }
 0x500   :  { %v702_v8 = vpop.f32.mrf.mxu1  ;;  %v552_v10 = vpop.f32.mrf.mxu0 }
 0x501   :  { %v1386_v12 = vmul.f32 0.17677669, %v552_v10  ;;  %v1390_v25 = vmul.f32 0.17677669, %v702_v8 }
 0x507   :  { %v7422_v13 = vpop.f32.mrf.mxu0 }
 0x508   :  { %v7455_v9 = vpop.f32.mrf.mxu1  ;;  %v1389_v19 = vmul.f32 0.17677669, %v7422_v13 }
 0x509   :  { %v627_v15 = vpop.f32.mrf.mxu0 }
 0x50a   :  { %v852_v11 = vpop.f32.mrf.mxu1  ;;  %v1388_v22 = vmul.f32 0.17677669, %v627_v15 }
 0x50b   :  { %7534 = vmatpush3.xpose.msk.msra.mxu1 %vm1394_vm3, %v852_v11 }
 0x50c   :  { %7538 = vmatprep.subr.mxu1 %v8164_v5 }
 0x50e   :  { %7536 = vmatmul.mubr.msk.f32.vlgmr.msra.gmra.mxu1 %vm1394_vm3, %v1386_v12 }
 0x50f   :  { %7539 = vmatpush3.xpose.msk.msra.mxu1 %vm1394_vm3, %v7455_v9  ;;  %7540 = vmatprep.mubr.msk.f32.mxu1 %vm8165_vm2, %v8164_v5 }
 0x510   :  { %7548 = vmatprep.subr.mxu1 %v8164_v5 }
 0x511   :  { %v7444_v16 = vpop.f32.mrf.mxu0 }
 0x512   :  { %7541 = vmatmul.mubr.msk.f32.vlgmr.msra.gmra.mxu1 %vm1394_vm3, %v1387_v14  ;;  %v7477_v20 = vpop.f32.mrf.mxu1  ;;  %v1393_v27 = vmul.f32 0.17677669, %v7444_v16 }
 0x513   :  { %7550 = vmatprep.mubr.msk.f32.mxu1 %vm8165_vm2, %v8164_v5  ;;  %v777_v17 = vpop.f32.mrf.mxu0 }
 0x514   :  { %v1002_v24 = vpop.f32.mrf.mxu1  ;;  %v1392_v30 = vmul.f32 0.17677669, %v777_v17 }
 0x51b   :  { %v7466_v18 = vpop.f32.mrf.mxu0 }
 0x51c   :  { %7549 = vmatpush3.xpose.msk.msra.mxu1 %vm1394_vm3, %v7466_v18  ;;  %v7499_v28 = vpop.f32.mrf.mxu1 }
 0x51d   :  { %v927_v21 = vpop.f32.mrf.mxu0  ;;  %7558 = vmatprep.subr.mxu1 %v8164_v5 }
 0x51e   :  { %7544 = vmatpush3.xpose.msk.msra.mxu0 %vm1394_vm3, %v927_v21  ;;  %v1152_v31 = vpop.f32.mrf.mxu1 }
 0x51f   :  { %7551 = vmatmul.mubr.msk.f32.vlgmr.msra.gmra.mxu1 %vm1394_vm3, %v1389_v19  ;;  %7553 = vmatprep.subr.mxu0 %v8164_v5 }
 0x520   :  { %7559 = vmatpush3.xpose.msk.msra.mxu1 %vm1394_vm3, %v7477_v20  ;;  %7560 = vmatprep.mubr.msk.f32.mxu1 %vm8165_vm2, %v8164_v5 }
 0x521   :  { %7546 = vmatmul.mubr.msk.f32.vlgmr.msra.gmra.mxu0 %vm1394_vm3, %v1388_v22  ;;  %7568 = vmatprep.subr.mxu1 %v8164_v5 }
 0x522   :  { %7554 = vmatpush3.xpose.msk.msra.mxu0 %vm1394_vm3, %v1002_v24  ;;  %7555 = vmatprep.mubr.msk.f32.mxu0 %vm8165_vm2, %v8164_v5 }
 0x523   :  { %7561 = vmatmul.mubr.msk.f32.vlgmr.msra.gmra.mxu1 %vm1394_vm3, %v1391_v23  ;;  %7563 = vmatprep.subr.mxu0 %v8164_v5 }
 0x524   :  { %7570 = vmatprep.mubr.msk.f32.mxu1 %vm8165_vm2, %v8164_v5 }
 0x525   :  { %v7488_v26 = vpop.f32.mrf.mxu0  ;;  %7556 = vmatmul.mubr.msk.f32.vlgmr.msra.gmra.mxu0 %vm1394_vm3, %v1390_v25 }
 0x526   :  { %7569 = vmatpush3.xpose.msk.msra.mxu1 %vm1394_vm3, %v7488_v26  ;;  %7565 = vmatprep.mubr.msk.f32.mxu0 %vm8165_vm2, %v8164_v5  ;;  %v8538_v32 = vpop.f32.mrf.mxu1 }
 0x527   :  { %v1077_v29 = vpop.f32.mrf.mxu0  ;;  %7578 = vmatprep.subr.mxu1 %v8164_v5 }
 0x528   :  { %7564 = vmatpush3.xpose.msk.msra.mxu0 %vm1394_vm3, %v1077_v29  ;;  %v8540_v33 = vpop.f32.mrf.mxu1 }
 0x529   :  { %7571 = vmatmul.mubr.msk.f32.vlgmr.msra.gmra.mxu1 %vm1394_vm3, %v1393_v27  ;;  %7573 = vmatprep.subr.mxu0 %v8164_v5 }
 0x52a   :  { %7579 = vmatpush3.msra.mxu1 %v7499_v28  ;;  %7580 = vmatprep.mubr.msk.f32.mxu1 %vm8165_vm2, %v8164_v5 }
 0x52b   :  { %7566 = vmatmul.mubr.msk.f32.vlgmr.msra.gmra.mxu0 %vm1394_vm3, %v1392_v30  ;;  %7588 = vmatprep.subr.mxu1 %v8164_v5 }
 0x52c   :  { %7574 = vmatpush3.msra.mxu0 %v1152_v31  ;;  %7575 = vmatprep.mubr.msk.f32.mxu0 %vm8165_vm2, %v8164_v5 }
 0x52d   :  { %7583 = vmatprep.subr.mxu0 %v8164_v5  ;;  %v8544_v40 = vpop.f32.mrf.mxu0 }
 0x52f   :  { %v8546_v41 = vpop.f32.mrf.mxu0 }
 0x535   :  { %v8548_v42 = vpop.f32.mrf.mxu0 }
 0x537   :  { %v8550_v43 = vpop.f32.mrf.mxu0 }
 0x5ce   :  { %v1467_v34 = vpop.f32.mrf.mxu1 }
 0x5cf   :  { %v2003_v35 = vsel %vm1394_vm3, %v1467_v34, -inf }
 0x5d0   :  { %2004 = vmax.xlane.f32.xlu0 %v2003_v35  ;;  %v7537_v36 = vpop.f32.mrf.mxu1 }
 0x5d2   :  { %v1543_v37 = vpop.f32.mrf.mxu1 }
 0x5d3   :  { %v2006_v38 = vsel %vm1394_vm3, %v1543_v37, -inf }
 0x5d4   :  { %2007 = vmax.xlane.f32.xlu1 %v2006_v38  ;;  %v7542_v39 = vpop.f32.mrf.mxu1 }
 0x5df   :  { %v1695_v44 = vpop.f32.mrf.mxu1 }
 0x5e0   :  { %v2012_v45 = vsel %vm1394_vm3, %v1695_v44, -inf }
 0x5e1   :  { %2013 = vmax.xlane.f32.xlu1 %v2012_v45  ;;  %v1619_v46 = vpop.f32.mrf.mxu0  ;;  %v7552_v47 = vpop.f32.mrf.mxu1 }
 0x5e2   :  { %v2009_v48 = vsel %vm1394_vm3, %v1619_v46, -inf }
 0x5e3   :  { %v1847_v49 = vpop.f32.mrf.mxu1  ;;  %2010 = vmax.xlane.f32.xlu0 %v2009_v48  ;;  %v7547_v50 = vpop.f32.mrf.mxu0 }
 0x5e4   :  { %v2018_v51 = vsel %vm1394_vm3, %v1847_v49, -inf }
 0x5e5   :  { %2019 = vmax.xlane.f32.xlu1 %v2018_v51  ;;  %v1771_v53 = vpop.f32.mrf.mxu0  ;;  %v7562_v55 = vpop.f32.mrf.mxu1 }
 0x5e6   :  { %v2015_v56 = vsel %vm1394_vm3, %v1771_v53, -inf }
 0x5e7   :  { %2016 = vmax.xlane.f32.xlu0 %v2015_v56  ;;  %v7557_v57 = vpop.f32.mrf.mxu0 }
 0x5e9   :  { %v1999_v58 = vpop.f32.mrf.mxu1 }
 0x5ea   :  { %v2024_v59 = vsel %vm1394_vm3, %v1999_v58, -inf }
 0x5eb   :  { %2025 = vmax.xlane.f32.xlu1 %v2024_v59  ;;  %v1923_v60 = vpop.f32.mrf.mxu0  ;;  %v7572_v61 = vpop.f32.mrf.mxu1 }
 0x5ec   :  { %v2021_v62 = vsel %vm1394_vm3, %v1923_v60, -inf }
 0x5ed   :  { %2022 = vmax.xlane.f32.xlu0 %v2021_v62  ;;  %v7567_v63 = vpop.f32.mrf.mxu0 }
 0x659   :  { %v2005_v0 = vpop.xlane.xlu0 %2004 }
 0x65a   :  { %v2027_v1 = vsub.f32 %v1467_v34, %v2005_v0 }
 0x65c   :  { %v2035_v2 = vmul.f32 1.442695, %v2027_v1 }
 0x65d   :  { %v2008_v3 = vpop.xlane.xlu1 %2007 }
 0x65e   :  { %8013 = vpow2.f32 %v2035_v2  ;;  %v2028_v4 = vsub.f32 %v1543_v37, %v2008_v3 }
 0x660   :  { %v2037_v6 = vmul.f32 1.442695, %v2028_v4 }
 0x662   :  { %8015 = vpow2.f32 %v2037_v6  ;;  %v2676_v6 = vld [vmem:[%s8225_s19 + $0x8] sm:$0xff] }
 0x66a   :  { %v2014_v7 = vpop.xlane.xlu1 %2013 }
 0x66b   :  { %v8014_v8 = vpop.eup %8013  ;;  %v2030_v9 = vsub.f32 %v1695_v44, %v2014_v7  ;;  %v2677_v7 = vld [vmem:[%s8225_s19 + $0x10] sm:$0xff] }
 0x66c   :  { %v2011_v10 = vpop.xlane.xlu0 %2010  ;;  %v2051_v11 = vsel %vm1394_vm3, %v8014_v8, 0.0 }
 0x66d   :  { %v2041_v12 = vmul.f32 1.442695, %v2030_v9  ;;  %v2029_v13 = vsub.f32 %v1619_v46, %v2011_v10  ;;  %2052 = vadd.xlane.f32.xlu0 %v2051_v11 }
 0x66e   :  { %v2020_v14 = vpop.xlane.xlu1 %2019 }
 0x66f   :  { %v8016_v15 = vpop.eup %8015  ;;  %8017 = vpow2.f32 %v2041_v12  ;;  %v2039_v16 = vmul.f32 1.442695, %v2029_v13  ;;  %v2032_v17 = vsub.f32 %v1847_v49, %v2020_v14 }
 0x670   :  { %v2017_v18 = vpop.xlane.xlu0 %2016  ;;  %v2054_v19 = vsel %vm1394_vm3, %v8016_v15, 0.0 }
 0x671   :  { %8019 = vpow2.f32 %v2039_v16  ;;  %v2045_v20 = vmul.f32 1.442695, %v2032_v17  ;;  %v2031_v21 = vsub.f32 %v1771_v53, %v2017_v18  ;;  %2055 = vadd.xlane.f32.xlu1 %v2054_v19 }
 0x673   :  { %8021 = vpow2.f32 %v2045_v20  ;;  %v2043_v22 = vmul.f32 1.442695, %v2031_v21 }
 0x674   :  { %v2026_v23 = vpop.xlane.xlu1 %2025 }
 0x675   :  { %8023 = vpow2.f32 %v2043_v22  ;;  %v2034_v24 = vsub.f32 %v1999_v58, %v2026_v23 }
 0x676   :  { %v2023_v25 = vpop.xlane.xlu0 %2022 }
 0x677   :  { %v2049_v26 = vmul.f32 1.442695, %v2034_v24  ;;  %v2033_v27 = vsub.f32 %v1923_v60, %v2023_v25  ;;  %v6981_v25 = vld [vmem:[%s8230_s24] ss:$0 sm:$0xff]  ;;  %s9122_s24 = sld [smem:[#allocation16_spill]] }
 0x679   :  { %8025 = vpow2.f32 %v2049_v26  ;;  %v2047_v28 = vmul.f32 1.442695, %v2033_v27 }
 0x67b   :  { %8027 = vpow2.f32 %v2047_v28 }
 0x67c   :  { %v8018_v29 = vpop.eup %8017 }
 0x67d   :  { %v2060_v30 = vsel %vm1394_vm3, %v8018_v29, 0.0 }
 0x67e   :  { %v8020_v31 = vpop.eup %8019  ;;  %2061 = vadd.xlane.f32.xlu1 %v2060_v30 }
 0x67f   :  { %v2057_v34 = vsel %vm1394_vm3, %v8020_v31, 0.0 }
 0x680   :  { %v8022_v35 = vpop.eup %8021  ;;  %2058 = vadd.xlane.f32.xlu0 %v2057_v34 }
 0x681   :  { %v2066_v36 = vsel %vm1394_vm3, %v8022_v35, 0.0 }
 0x682   :  { %v8024_v37 = vpop.eup %8023  ;;  %2067 = vadd.xlane.f32.xlu1 %v2066_v36 }
 0x683   :  { %v2063_v38 = vsel %vm1394_vm3, %v8024_v37, 0.0 }
 0x684   :  { %2064 = vadd.xlane.f32.xlu0 %v2063_v38 }
 0x686   :  { %v8026_v39 = vpop.eup %8025 }
 0x687   :  { %v2072_v44 = vsel %vm1394_vm3, %v8026_v39, 0.0 }
 0x688   :  { %v8028_v45 = vpop.eup %8027  ;;  %2073 = vadd.xlane.f32.xlu1 %v2072_v44 }
 0x689   :  { %v2069_v46 = vsel %vm1394_vm3, %v8028_v45, 0.0 }
 0x68a   :  { %2070 = vadd.xlane.f32.xlu0 %v2069_v46 }
 0x6f6   :  { %v2053_v47 = vpop.xlane.xlu0 %2052 }
 0x6f7   :  { %8029 = vrcp.f32 %v2053_v47 }
 0x6fa   :  { %v2056_v48 = vpop.xlane.xlu1 %2055 }
 0x6fb   :  { %8031 = vrcp.f32 %v2056_v48 }
 0x704   :  { %v8030_v49 = vpop.eup %8029 }
 0x705   :  { %v2083_v50 = vmul.f32 %v8030_v49, %v8014_v8  ;;  %v2678_v8 = vld [vmem:[%s8225_s19 + $0x18] sm:$0xff] }
 0x707   :  { %v2062_v51 = vpop.xlane.xlu1 %2061  ;;  %7576 = vmatmul.mubr.msk.f32.vlgmr.msra.gmra.mxu0 %vm1394_vm3, %v2083_v50 }
 0x708   :  { %v8032_v53 = vpop.eup %8031  ;;  %8033 = vrcp.f32 %v2062_v51  ;;  %7584 = vmatpush3.msra.mxu0 %v8546_v41  ;;  %7585 = vmatprep.mubr.msk.f32.mxu0 %vm8165_vm2, %v8164_v5 }
 0x709   :  { %v2059_v55 = vpop.xlane.xlu0 %2058  ;;  %v2084_v56 = vmul.f32 %v8032_v53, %v8016_v15  ;;  %7593 = vmatprep.subr.mxu0 %v8164_v5 }
 0x70a   :  { %8035 = vrcp.f32 %v2059_v55 }
 0x70b   :  { %v2068_v57 = vpop.xlane.xlu1 %2067  ;;  %7581 = vmatmul.mubr.msk.f32.vlgmr.msra.gmra.mxu1 %vm1394_vm3, %v2084_v56 }
 0x70c   :  { %8037 = vrcp.f32 %v2068_v57  ;;  %7589 = vmatpush3.msra.mxu1 %v8544_v40  ;;  %7590 = vmatprep.mubr.msk.f32.mxu1 %vm8165_vm2, %v8164_v5 }
 0x70d   :  { %v2065_v58 = vpop.xlane.xlu0 %2064  ;;  %7598 = vmatprep.subr.mxu1 %v8164_v5 }
 0x70e   :  { %8039 = vrcp.f32 %v2065_v58 }
 0x711   :  { %v2074_v41 = vpop.xlane.xlu1 %2073 }
 0x712   :  { %8041 = vrcp.f32 %v2074_v41 }
 0x713   :  { %v2071_v59 = vpop.xlane.xlu0 %2070 }
 0x714   :  { %8043 = vrcp.f32 %v2071_v59 }
 0x715   :  { %v8034_v60 = vpop.eup %8033 }
 0x716   :  { %v2086_v61 = vmul.f32 %v8034_v60, %v8018_v29 }
 0x717   :  { %v8036_v62 = vpop.eup %8035 }
 0x718   :  { %7591 = vmatmul.mubr.msk.f32.vlgmr.msra.gmra.mxu1 %vm1394_vm3, %v2086_v61  ;;  %v2085_v63 = vmul.f32 %v8036_v62, %v8020_v31  ;;  %v3067_v62 = vld [vmem:[%s8245_s12 + $0x18] sm:$0xff] }
 0x719   :  { %v8038_v0 = vpop.eup %8037  ;;  %7599 = vmatpush3.msra.mxu1 %v8538_v32  ;;  %7600 = vmatprep.mubr.msk.f32.mxu1 %vm8165_vm2, %v8164_v5 }
 0x71a   :  { %7586 = vmatmul.mubr.msk.f32.vlgmr.msra.gmra.mxu0 %vm1394_vm3, %v2085_v63  ;;  %7608 = vmatprep.subr.mxu1 %v8164_v5  ;;  %v2088_v40 = vmul.f32 %v8038_v0, %v8022_v35  ;;  %v3066_v63 = vld [vmem:[%s8245_s12 + $0x10] sm:$0xff]  ;;  %v3065_v0 = vld [vmem:[%s8245_s12 + $0x8] sm:$0xff] }
 0x71b   :  { %v8040_v1 = vpop.eup %8039  ;;  %7594 = vmatpush3.msra.mxu0 %v8540_v33  ;;  %7595 = vmatprep.mubr.msk.f32.mxu0 %vm8165_vm2, %v8164_v5 }
 0x71c   :  { %7601 = vmatmul.mubr.msk.f32.vlgmr.msra.gmra.mxu1 %vm1394_vm3, %v2088_v40  ;;  %7603 = vmatprep.subr.mxu0 %v8164_v5  ;;  %v2087_v32 = vmul.f32 %v8040_v1, %v8024_v37  ;;  %v3064_v40 = vld [vmem:[%s8245_s12] sm:$0xff]  ;;  %s9124_s12 = sld [smem:[#allocation18_spill]] }
 0x71d   :  { %7609 = vmatpush3.msra.mxu1 %v8548_v42  ;;  %7610 = vmatprep.mubr.msk.f32.mxu1 %vm8165_vm2, %v8164_v5  ;;  %v2675_v42 = vld [vmem:[%s8225_s19] sm:$0xff]  ;;  %s9121_s19 = sld [smem:[#allocation15_spill]] }
 0x71e   :  { %7596 = vmatmul.mubr.msk.f32.vlgmr.msra.gmra.mxu0 %vm1394_vm3, %v2087_v32  ;;  %7618 = vmatprep.subr.mxu1 %v2676_v6 }
 0x71f   :  { %v8042_v2 = vpop.eup %8041  ;;  %7604 = vmatpush3.msra.mxu0 %v8550_v43  ;;  %7605 = vmatprep.mubr.msk.f32.mxu0 %vm8165_vm2, %v8164_v5 }
 0x720   :  { %v2090_v33 = vmul.f32 %v8042_v2, %v8026_v39  ;;  %7613 = vmatprep.subr.mxu0 %v2675_v42 }
 0x721   :  { %v8044_v3 = vpop.eup %8043 }
 0x722   :  { %7611 = vmatmul.mubr.msk.f32.vlgmr.msra.gmra.mxu1 %vm1394_vm3, %v2090_v33  ;;  %v2089_v4 = vmul.f32 %v8044_v3, %v8028_v45 }
 0x723   :  { %7619 = vmatpush3.msra.mxu1 %v2676_v6  ;;  %v6982_v6 = vld [vmem:[%s8235_s30] ss:$0 sm:$0xff]  ;;  %s9123_s30 = sld [smem:[#allocation19_spill]] }
 0x724   :  { %7606 = vmatmul.mubr.msk.f32.vlgmr.msra.gmra.mxu0 %vm1394_vm3, %v2089_v4  ;;  %7628 = vmatprep.subr.mxu1 %v2678_v8 }
 0x725   :  { %7614 = vmatpush3.msra.mxu0 %v2675_v42 }
 0x726   :  { %7623 = vmatprep.subr.mxu0 %v2677_v7 }
 0x7c7   :  { %v2160_v43 = vpop.f32.mrf.mxu0 }
 0x7c8   :  { %7615 = vmatprep.mubr.msk.f32.mxu0 %vm1394_vm3, %v2160_v43 }
 0x7c9   :  { %v7577_v9 = vpop.f32.mrf.mxu0 }
 0x7cb   :  { %v2233_v10 = vpop.f32.mrf.mxu1 }
 0x7cc   :  { %7616 = vmatmul.mubr.msk.f32.vlgmr.msra.gmra.mxu0 %vm1394_vm3, %v2233_v10  ;;  %v6983_v10 = vld [vmem:[%s9111_s0] ss:$0 sm:$0xff] }
 0x7cd   :  { %v7582_v11 = vpop.f32.mrf.mxu1  ;;  %7624 = vmatpush3.msra.mxu0 %v2677_v7 }
 0x7ce   :  { %7633 = vmatprep.subr.mxu0 %v3067_v62 }
 0x7d8   :  { %v2379_v12 = vpop.f32.mrf.mxu1 }
 0x7da   :  { %v2306_v13 = vpop.f32.mrf.mxu0  ;;  %v7592_v14 = vpop.f32.mrf.mxu1 }
 0x7db   :  { %7620 = vmatprep.mubr.msk.f32.mxu1 %vm1394_vm3, %v2306_v13  ;;  %v3173_v14 = vld [vmem:[%s9112_s9 + $0x38] sm:$0xff] }
 0x7dc   :  { %v7587_v15 = vpop.f32.mrf.mxu0  ;;  %v2525_v16 = vpop.f32.mrf.mxu1  ;;  %7621 = vmatmul.mubr.msk.f32.vlgmr.msra.gmra.mxu1 %vm1394_vm3, %v2379_v12 }
 0x7dd   :  { %7629 = vmatpush3.msra.mxu1 %v2678_v8  ;;  %v3172_v15 = vld [vmem:[%s9112_s9 + $0x30] sm:$0xff] }
 0x7de   :  { %v2452_v17 = vpop.f32.mrf.mxu0  ;;  %v7602_v18 = vpop.f32.mrf.mxu1  ;;  %7644 = vmatprep.subr.mxu1 %v3173_v14 }
 0x7df   :  { %7625 = vmatprep.mubr.msk.f32.mxu0 %vm1394_vm3, %v2452_v17  ;;  %v3170_v17 = vld [vmem:[%s9112_s9 + $0x20] sm:$0xff]  ;;  %v3169_v18 = vld [vmem:[%s9112_s9 + $0x18] sm:$0xff] }
 0x7e0   :  { %v7597_v19 = vpop.f32.mrf.mxu0  ;;  %7626 = vmatmul.mubr.msk.f32.vlgmr.msra.gmra.mxu0 %vm1394_vm3, %v2525_v16  ;;  %v3171_v16 = vld [vmem:[%s9112_s9 + $0x28] sm:$0xff] }
 0x7e1   :  { %7634 = vmatpush3.msra.mxu0 %v3067_v62  ;;  %v3168_v19 = vld [vmem:[%s9112_s9 + $0x10] sm:$0xff] }
 0x7e2   :  { %v2671_v20 = vpop.f32.mrf.mxu1  ;;  %7635 = vmatprep.subr.mxu0 %v3066_v63 }
 0x7e3   :  { %7636 = vmatpush3.msra.mxu0 %v3066_v63  ;;  %v3313_v63 = vld [vmem:[%s9115_s21 + $0x18] sm:$0xff] }
 0x7e4   :  { %v2598_v21 = vpop.f32.mrf.mxu0  ;;  %v7612_v22 = vpop.f32.mrf.mxu1  ;;  %7637 = vmatprep.subr.mxu0 %v3065_v0 }
 0x7e5   :  { %7630 = vmatprep.mubr.msk.f32.mxu1 %vm1394_vm3, %v2598_v21  ;;  %7638 = vmatpush3.msra.mxu0 %v3065_v0  ;;  %v3166_v21 = vld [vmem:[%s9112_s9] sm:$0xff]  ;;  %v3321_v0 = vld [vmem:[%s9115_s21 + $0x58] sm:$0xff] }
 0x7e6   :  { %v7607_v23 = vpop.f32.mrf.mxu0  ;;  %7631 = vmatmul.mubr.msk.f32.vlgmr.msra.gmra.mxu1 %vm1394_vm3, %v2671_v20  ;;  %7639 = vmatprep.subr.mxu0 %v3064_v40  ;;  %v3167_v20 = vld [vmem:[%s9112_s9 + $0x8] sm:$0xff]  ;;  %v6984_v22 = vld [vmem:[%s9113_s13] ss:$0 sm:$0xff] }
 0x7e7   :  { %7640 = vmatpush3.msra.mxu0 %v3064_v40  ;;  %7645 = vmatpush3.msra.mxu1 %v3173_v14  ;;  %v3312_v40 = vld [vmem:[%s9115_s21 + $0x10] sm:$0xff] }
 0x7e8   :  { %7646 = vmatprep.subr.mxu1 %v3172_v15  ;;  %7663 = vmatprep.subr.mxu0 %v3313_v63 }
 0x7e9   :  { %7647 = vmatpush3.msra.mxu1 %v3172_v15 }
 0x7ea   :  { %7648 = vmatprep.subr.mxu1 %v3171_v16 }
 0x7eb   :  { %7649 = vmatpush3.msra.mxu1 %v3171_v16 }
 0x7ec   :  { %7650 = vmatprep.subr.mxu1 %v3170_v17 }
 0x7ed   :  { %7651 = vmatpush3.msra.mxu1 %v3170_v17  ;;  %v6991_v17 = vld [vmem:[%s9117_s29] ss:$0 sm:$0xff] }
 0x7ee   :  { %7652 = vmatprep.subr.mxu1 %v3169_v18 }
 0x7ef   :  { %7653 = vmatpush3.msra.mxu1 %v3169_v18 }
 0x7f0   :  { %7654 = vmatprep.subr.mxu1 %v3168_v19 }
 0x7f1   :  { %7655 = vmatpush3.msra.mxu1 %v3168_v19 }
 0x7f2   :  { %7656 = vmatprep.subr.mxu1 %v3167_v20 }
 0x7f3   :  { %7657 = vmatpush3.msra.mxu1 %v3167_v20 }
 0x7f4   :  { %7658 = vmatprep.subr.mxu1 %v3166_v21 }
 0x7f5   :  { %7659 = vmatpush3.msra.mxu1 %v3166_v21  ;;  %v3316_v21 = vld [vmem:[%s9115_s21 + $0x30] sm:$0xff] }
 0x7f6   :  { %7685 = vmatprep.subr.mxu1 %v3321_v0 }
 0x88c   :  { %v7617_v24 = vpop.f32.mrf.mxu0 }
 0x88d   :  { %v3011_v29 = vadd.f32 %v7617_v24, %v6981_v25 }
 0x88e   :  { %v2751_v26 = vpop.f32.mrf.mxu0 }
 0x88f   :  { %v3010_v31 = vadd.f32 %v6981_v25, %v2751_v26 }
 0x89c   :  { %v7622_v27 = vpop.f32.mrf.mxu1 }
 0x89d   :  { %v3013_v34 = vadd.f32 %v7622_v27, %v3011_v29 }
 0x89e   :  { %v2832_v30 = vpop.f32.mrf.mxu1 }
 0x89f   :  { %v3012_v36 = vadd.f32 %v3010_v31, %v2832_v30 }
 0x8a0   :  { %v7627_v28 = vpop.f32.mrf.mxu0 }
 0x8a1   :  { %v3015_v37 = vadd.f32 %v7627_v28, %v3013_v34 }
 0x8a2   :  { %v2913_v35 = vpop.f32.mrf.mxu0 }
 0x8a3   :  { %v3014_v39 = vadd.f32 %v3012_v36, %v2913_v35 }
 0x8a6   :  { %v7632_v38 = vpop.f32.mrf.mxu1 }
 0x8a7   :  { %v3017_v44 = vadd.f32 %v7632_v38, %v3015_v37 }
 0x8a8   :  { %v2994_v45 = vpop.f32.mrf.mxu1 }
 0x8a9   :  { %v8610_v46 = vadd.f32 %v3017_v44, %v8376_v52  ;;  %v3016_v47 = vadd.f32 %v3014_v39, %v2994_v45  ;;  %v6989_v44 = vld [vmem:[%s9114_s17] ss:$0 sm:$0xff] }
 0x8ab   :  { %v8613_v48 = vadd.f32 %v3016_v47, %v8378_v54  ;;  %v3025_v49 = vsel %vm161_vm0, %v8610_v46, 0.0 }
 0x8ac   :  { %3026 = vadd.xlane.f32.xlu1 %v3025_v49 }
 0x8ad   :  { %v3022_v50 = vsel %vm161_vm0, %v8613_v48, 0.0 }
 0x8ae   :  { %3023 = vadd.xlane.f32.xlu0 %v3022_v50 }
 0x935   :  { %v3027_v51 = vpop.xlane.xlu1 %3026 }
 0x936   :  { %v3029_v53 = vmul.f32 0.03125, %v3027_v51 }
 0x937   :  { %v3024_v55 = vpop.xlane.xlu0 %3023 }
 0x938   :  { %v3031_v56 = vsub.f32 %v8610_v46, %v3029_v53  ;;  %v3028_v57 = vmul.f32 0.03125, %v3024_v55 }
 0x93a   :  { %v3030_v58 = vsub.f32 %v8613_v48, %v3028_v57  ;;  %v3033_v41 = vmul.f32 %v3031_v56, %v3031_v56 }
 0x93c   :  { %v3037_v59 = vsel %vm161_vm0, %v3033_v41, 0.0  ;;  %v3032_v60 = vmul.f32 %v3030_v58, %v3030_v58 }
 0x93d   :  { %3038 = vadd.xlane.f32.xlu1 %v3037_v59 }
 0x93e   :  { %v3034_v61 = vsel %vm161_vm0, %v3032_v60, 0.0 }
 0x93f   :  { %3035 = vadd.xlane.f32.xlu0 %v3034_v61 }
 0x9c6   :  { %v3039_v1 = vpop.xlane.xlu1 %3038 }
 0x9c7   :  { %v3041_v32 = vmul.f32 0.03125, %v3039_v1  ;;  %v3320_v1 = vld [vmem:[%s9115_s21 + $0x50] sm:$0xff] }
 0x9c8   :  { %v3036_v2 = vpop.xlane.xlu0 %3035 }
 0x9c9   :  { %v3043_v33 = vadd.f32 1e-05, %v3041_v32  ;;  %v3040_v3 = vmul.f32 0.03125, %v3036_v2  ;;  %v3311_v32 = vld [vmem:[%s9115_s21 + $0x8] sm:$0xff] }
 0x9ca   :  { %v3319_v2 = vld [vmem:[%s9115_s21 + $0x48] sm:$0xff] }
 0x9cb   :  { %8045 = vrsqrt.f32 %v3043_v33  ;;  %v3042_v4 = vadd.f32 1e-05, %v3040_v3  ;;  %v3310_v33 = vld [vmem:[%s9115_s21] sm:$0xff] }
 0x9cc   :  { %v3318_v3 = vld [vmem:[%s9115_s21 + $0x40] sm:$0xff] }
 0x9cd   :  { %8047 = vrsqrt.f32 %v3042_v4  ;;  %v3317_v4 = vld [vmem:[%s9115_s21 + $0x38] sm:$0xff] }
 0x9d8   :  { %v8046_v42 = vpop.eup %8045 }
 0x9d9   :  { %v3047_v7 = vmul.f32 %v8046_v42, %v3031_v56  ;;  %v3329_v42 = vld [vmem:[%s9115_s21 + $0x98] sm:$0xff] }
 0x9da   :  { %v8048_v8 = vpop.eup %8047 }
 0x9db   :  { %v3046_v43 = vmul.f32 %v8048_v8, %v3030_v58  ;;  %v3055_v9 = vmul.f32 %v6982_v6, %v3047_v7 }
 0x9dd   :  { %v3054_v11 = vmul.f32 %v6982_v6, %v3046_v43  ;;  %v3063_v13 = vadd.f32 %v6983_v10, %v3055_v9 }
 0x9df   :  { %v3062_v12 = vadd.f32 %v6983_v10, %v3054_v11 }
 0x9e1   :  { %7641 = vmatprep.mubr.msk.f32.mxu0 %vm161_vm0, %v3062_v12  ;;  %v6990_v12 = vld [vmem:[%s9116_s25] ss:$0 sm:$0xff] }
 0x9e2   :  { %7642 = vmatmul.mubr.msk.f32.vlgmr.msra.gmra.mxu0 %vm161_vm0, %v3063_v13 }
 0x9e3   :  { %7664 = vmatpush3.msra.mxu0 %v3313_v63  ;;  %v3346_v63 = vld [vmem:[%s9115_s21 + $0x120] sm:$0xff] }
 0x9e4   :  { %7665 = vmatprep.subr.mxu0 %v3312_v40 }
 0x9e5   :  { %7666 = vmatpush3.msra.mxu0 %v3312_v40  ;;  %v3356_v40 = vld [vmem:[%s9115_s21 + $0x170] sm:$0xff] }
 0x9e6   :  { %7667 = vmatprep.subr.mxu0 %v3311_v32 }
 0x9e7   :  { %7668 = vmatpush3.msra.mxu0 %v3311_v32  ;;  %v3354_v32 = vld [vmem:[%s9115_s21 + $0x160] sm:$0xff] }
 0x9e8   :  { %7669 = vmatprep.subr.mxu0 %v3310_v33 }
 0x9e9   :  { %7670 = vmatpush3.msra.mxu0 %v3310_v33 }
 0x9ea   :  { %7674 = vmatprep.subr.mxu0 %v3317_v4 }
 0xaa2   :  { %v7643_v23 = vpop.f32.mrf.mxu0 }
 0xaa3   :  { %v3153_v24 = vadd.f32 %v7643_v23, %v6984_v22  ;;  %v3315_v23 = vld [vmem:[%s9115_s21 + $0x28] sm:$0xff] }
 0xaa4   :  { %v3147_v25 = vpop.f32.mrf.mxu0 }
 0xaa5   :  { %v3159_v26 = vmul.f32 0.70710677, %v3153_v24  ;;  %v3148_v27 = vadd.f32 %v6984_v22, %v3147_v25  ;;  %v3157_v36 = vmul.f32 0.5, %v3153_v24  ;;  %v3328_v22 = vld [vmem:[%s9115_s21 + $0x90] sm:$0xff]  ;;  %v3327_v24 = vld [vmem:[%s9115_s21 + $0x88] sm:$0xff]  ;;  %v3314_v25 = vld [vmem:[%s9115_s21 + $0x20] sm:$0xff] }
 0xaa7   :  { %8049 = verf.f32 %v3159_v26  ;;  %v3158_v28 = vmul.f32 0.70710677, %v3148_v27  ;;  %v3156_v34 = vmul.f32 0.5, %v3148_v27  ;;  %v3326_v26 = vld [vmem:[%s9115_s21 + $0x80] sm:$0xff]  ;;  %v3325_v27 = vld [vmem:[%s9115_s21 + $0x78] sm:$0xff] }
 0xaa9   :  { %8051 = verf.f32 %v3158_v28  ;;  %v3337_v28 = vld [vmem:[%s9115_s21 + $0xd8] sm:$0xff] }
 0xab4   :  { %v8050_v29 = vpop.eup %8049 }
 0xab5   :  { %v3163_v31 = vadd.f32 1.0, %v8050_v29  ;;  %v3324_v29 = vld [vmem:[%s9115_s21 + $0x70] sm:$0xff] }
 0xab6   :  { %v8052_v30 = vpop.eup %8051 }
 0xab7   :  { %v3162_v35 = vadd.f32 1.0, %v8052_v30  ;;  %v3165_v38 = vmul.f32 %v3163_v31, %v3157_v36  ;;  %v3336_v30 = vld [vmem:[%s9115_s21 + $0xd0] sm:$0xff]  ;;  %v3323_v31 = vld [vmem:[%s9115_s21 + $0x68] sm:$0xff]  ;;  %v3334_v36 = vld [vmem:[%s9115_s21 + $0xc0] sm:$0xff] }
 0xab9   :  { %v3164_v37 = vmul.f32 %v3162_v35, %v3156_v34  ;;  %v3335_v34 = vld [vmem:[%s9115_s21 + $0xc8] sm:$0xff]  ;;  %v3322_v35 = vld [vmem:[%s9115_s21 + $0x60] sm:$0xff] }
 0xabb   :  { %7660 = vmatprep.mubr.msk.f32.mxu1 %vm245_vm1, %v3164_v37  ;;  %v3333_v37 = vld [vmem:[%s9115_s21 + $0xb8] sm:$0xff] }
 0xabc   :  { %7661 = vmatmul.mubr.msk.f32.vlgmr.msra.gmra.mxu1 %vm245_vm1, %v3165_v38  ;;  %v3345_v38 = vld [vmem:[%s9115_s21 + $0x118] sm:$0xff] }
 0xabd   :  { %7686 = vmatpush3.msra.mxu1 %v3321_v0  ;;  %v3357_v0 = vld [vmem:[%s9115_s21 + $0x178] sm:$0xff] }
 0xabe   :  { %7687 = vmatprep.subr.mxu1 %v3320_v1 }
 0xabf   :  { %7688 = vmatpush3.msra.mxu1 %v3320_v1  ;;  %v3355_v1 = vld [vmem:[%s9115_s21 + $0x168] sm:$0xff] }
 0xac0   :  { %7689 = vmatprep.subr.mxu1 %v3319_v2 }
 0xac1   :  { %7690 = vmatpush3.msra.mxu1 %v3319_v2 }
 0xac2   :  { %7691 = vmatprep.subr.mxu1 %v3318_v3 }
 0xac3   :  { %7692 = vmatpush3.msra.mxu1 %v3318_v3 }
 0xac4   :  { %7707 = vmatprep.subr.mxu1 %v3329_v42 }
 0xb7c   :  { %v7662_v39 = vpop.f32.mrf.mxu1 }
 0xb7d   :  { %v3256_v45 = vadd.f32 %v7662_v39, %v8610_v46  ;;  %v3332_v39 = vld [vmem:[%s9115_s21 + $0xb0] sm:$0xff] }
 0xb7e   :  { %v3246_v47 = vpop.f32.mrf.mxu1 }
 0xb7f   :  { %v8644_v49 = vadd.f32 %v6989_v44, %v3256_v45  ;;  %v3255_v50 = vadd.f32 %v3246_v47, %v8613_v48  ;;  %v3331_v45 = vld [vmem:[%s9115_s21 + $0xa8] sm:$0xff] }
 0xb80   :  { %v3343_v47 = vld [vmem:[%s9115_s21 + $0x108] sm:$0xff] }
 0xb81   :  { %v8647_v51 = vadd.f32 %v6989_v44, %v3255_v50  ;;  %v3271_v53 = vsel %vm161_vm0, %v8644_v49, 0.0  ;;  %v3344_v44 = vld [vmem:[%s9115_s21 + $0x110] sm:$0xff]  ;;  %v3330_v50 = vld [vmem:[%s9115_s21 + $0xa0] sm:$0xff] }
 0xb82   :  { %3272 = vadd.xlane.f32.xlu1 %v3271_v53  ;;  %v3342_v53 = vld [vmem:[%s9115_s21 + $0x100] sm:$0xff] }
 0xb83   :  { %v3268_v55 = vsel %vm161_vm0, %v8647_v51, 0.0 }
 0xb84   :  { %3269 = vadd.xlane.f32.xlu0 %v3268_v55  ;;  %v3341_v55 = vld [vmem:[%s9115_s21 + $0xf8] sm:$0xff] }
 0xc0b   :  { %v3273_v56 = vpop.xlane.xlu1 %3272 }
 0xc0c   :  { %v3275_v57 = vmul.f32 0.03125, %v3273_v56  ;;  %v3353_v56 = vld [vmem:[%s9115_s21 + $0x158] sm:$0xff] }
 0xc0d   :  { %v3270_v46 = vpop.xlane.xlu0 %3269 }
 0xc0e   :  { %v3277_v58 = vsub.f32 %v8644_v49, %v3275_v57  ;;  %v3274_v48 = vmul.f32 0.03125, %v3270_v46  ;;  %v3340_v57 = vld [vmem:[%s9115_s21 + $0xf0] sm:$0xff] }
 0xc0f   :  { %v3352_v46 = vld [vmem:[%s9115_s21 + $0x150] sm:$0xff] }
 0xc10   :  { %v3276_v41 = vsub.f32 %v8647_v51, %v3274_v48  ;;  %v3279_v59 = vmul.f32 %v3277_v58, %v3277_v58  ;;  %v3351_v48 = vld [vmem:[%s9115_s21 + $0x148] sm:$0xff] }
 0xc12   :  { %v3283_v60 = vsel %vm161_vm0, %v3279_v59, 0.0  ;;  %v3278_v61 = vmul.f32 %v3276_v41, %v3276_v41  ;;  %v3350_v59 = vld [vmem:[%s9115_s21 + $0x140] sm:$0xff] }
 0xc13   :  { %3284 = vadd.xlane.f32.xlu1 %v3283_v60  ;;  %v3349_v60 = vld [vmem:[%s9115_s21 + $0x138] sm:$0xff] }
 0xc14   :  { %v3280_v62 = vsel %vm161_vm0, %v3278_v61, 0.0  ;;  %v3348_v61 = vld [vmem:[%s9115_s21 + $0x130] sm:$0xff] }
 0xc15   :  { %3281 = vadd.xlane.f32.xlu0 %v3280_v62  ;;  %v3347_v62 = vld [vmem:[%s9115_s21 + $0x128] sm:$0xff] }
 0xc9c   :  { %v3285_v6 = vpop.xlane.xlu1 %3284 }
 0xc9d   :  { %v3287_v7 = vmul.f32 0.03125, %v3285_v6 }
 0xc9e   :  { %v3282_v8 = vpop.xlane.xlu0 %3281 }
 0xc9f   :  { %v3289_v43 = vadd.f32 1e-05, %v3287_v7  ;;  %v3286_v9 = vmul.f32 0.03125, %v3282_v8 }
 0xca1   :  { %8053 = vrsqrt.f32 %v3289_v43  ;;  %v3288_v10 = vadd.f32 1e-05, %v3286_v9 }
 0xca3   :  { %8055 = vrsqrt.f32 %v3288_v10 }
 0xcae   :  { %v8054_v11 = vpop.eup %8053 }
 0xcaf   :  { %v3293_v13 = vmul.f32 %v8054_v11, %v3277_v58  ;;  %v3339_v58 = vld [vmem:[%s9115_s21 + $0xe8] sm:$0xff] }
 0xcb0   :  { %v8056_v14 = vpop.eup %8055 }
 0xcb1   :  { %v3292_v15 = vmul.f32 %v8056_v14, %v3276_v41  ;;  %v3301_v16 = vmul.f32 %v6990_v12, %v3293_v13  ;;  %v3338_v41 = vld [vmem:[%s9115_s21 + $0xe0] sm:$0xff] }
 0xcb3   :  { %v3300_v18 = vmul.f32 %v6990_v12, %v3292_v15  ;;  %v8671_v20 = vadd.f32 %v6991_v17, %v3301_v16 }
 0xcb5   :  { %v8669_v19 = vadd.f32 %v6991_v17, %v3300_v18 }
 0xcb7   :  { %7671 = vmatprep.mubr.msk.f32.mxu0 %vm161_vm0, %v8669_v19  ;;  %7693 = vmatprep.mubr.msk.f32.mxu1 %vm161_vm0, %v8669_v19 }
 0xcb8   :  { %7672 = vmatmul.mubr.msk.f32.vlgmr.msra.gmra.mxu0 %vm161_vm0, %v8671_v20  ;;  %7694 = vmatmul.mubr.msk.f32.vlgmr.msra.gmra.mxu1 %vm161_vm0, %v8671_v20 }
 0xcb9   :  { %7675 = vmatpush3.msra.mxu0 %v3317_v4  ;;  %7708 = vmatpush3.msra.mxu1 %v3329_v42 }
 0xcba   :  { %7676 = vmatprep.subr.mxu0 %v3316_v21  ;;  %7682 = vmatprep.mubr.msk.f32.mxu0 %vm161_vm0, %v8669_v19 }
 0xcbb   :  { %7709 = vmatprep.subr.mxu1 %v3328_v22  ;;  %7715 = vmatprep.mubr.msk.f32.mxu1 %vm161_vm0, %v8669_v19 }
 0xcbc   :  { %7677 = vmatpush3.msra.mxu0 %v3316_v21  ;;  %7710 = vmatpush3.msra.mxu1 %v3328_v22 }
 0xcbd   :  { %7678 = vmatprep.subr.mxu0 %v3315_v23  ;;  %7711 = vmatprep.subr.mxu1 %v3327_v24 }
 0xcbe   :  { %7679 = vmatpush3.msra.mxu0 %v3315_v23  ;;  %7712 = vmatpush3.msra.mxu1 %v3327_v24 }
 0xcbf   :  { %7680 = vmatprep.subr.mxu0 %v3314_v25  ;;  %7713 = vmatprep.subr.mxu1 %v3326_v26 }
 0xcc0   :  { %7681 = vmatpush3.msra.mxu0 %v3314_v25  ;;  %7714 = vmatpush3.msra.mxu1 %v3326_v26 }
 0xcc1   :  { %7683 = vmatmul.mubr.msk.f32.vlgmr.msra.gmra.mxu0 %vm161_vm0, %v8671_v20  ;;  %7696 = vmatprep.subr.mxu0 %v3325_v27 }
 0xcc2   :  { %7716 = vmatmul.mubr.msk.f32.vlgmr.msra.gmra.mxu1 %vm161_vm0, %v8671_v20  ;;  %7729 = vmatprep.subr.mxu1 %v3337_v28 }
 0xcc3   :  { %7697 = vmatpush3.msra.mxu0 %v3325_v27  ;;  %7704 = vmatprep.mubr.msk.f32.mxu0 %vm161_vm0, %v8669_v19 }
 0xcc4   :  { %7730 = vmatpush3.msra.mxu1 %v3337_v28  ;;  %7737 = vmatprep.mubr.msk.f32.mxu1 %vm161_vm0, %v8669_v19 }
 0xcc5   :  { %7698 = vmatprep.subr.mxu0 %v3324_v29  ;;  %7731 = vmatprep.subr.mxu1 %v3336_v30 }
 0xcc6   :  { %7699 = vmatpush3.msra.mxu0 %v3324_v29  ;;  %7732 = vmatpush3.msra.mxu1 %v3336_v30 }
 0xcc7   :  { %7700 = vmatprep.subr.mxu0 %v3323_v31  ;;  %7733 = vmatprep.subr.mxu1 %v3335_v34 }
 0xcc8   :  { %7701 = vmatpush3.msra.mxu0 %v3323_v31  ;;  %7734 = vmatpush3.msra.mxu1 %v3335_v34 }
 0xcc9   :  { %7702 = vmatprep.subr.mxu0 %v3322_v35  ;;  %7735 = vmatprep.subr.mxu1 %v3334_v36 }
 0xcca   :  { %7703 = vmatpush3.msra.mxu0 %v3322_v35  ;;  %7736 = vmatpush3.msra.mxu1 %v3334_v36 }
 0xccb   :  { %7705 = vmatmul.mubr.msk.f32.vlgmr.msra.gmra.mxu0 %vm161_vm0, %v8671_v20  ;;  %7718 = vmatprep.subr.mxu0 %v3333_v37 }
 0xccc   :  { %7738 = vmatmul.mubr.msk.f32.vlgmr.msra.gmra.mxu1 %vm161_vm0, %v8671_v20  ;;  %7751 = vmatprep.subr.mxu1 %v3345_v38 }
 0xccd   :  { %7719 = vmatpush3.msra.mxu0 %v3333_v37  ;;  %7726 = vmatprep.mubr.msk.f32.mxu0 %vm161_vm0, %v8669_v19 }
 0xcce   :  { %7752 = vmatpush3.msra.mxu1 %v3345_v38  ;;  %7759 = vmatprep.mubr.msk.f32.mxu1 %vm161_vm0, %v8669_v19 }
 0xccf   :  { %7720 = vmatprep.subr.mxu0 %v3332_v39  ;;  %7753 = vmatprep.subr.mxu1 %v3344_v44 }
 0xcd0   :  { %7721 = vmatpush3.msra.mxu0 %v3332_v39  ;;  %7754 = vmatpush3.msra.mxu1 %v3344_v44 }
 0xcd1   :  { %7722 = vmatprep.subr.mxu0 %v3331_v45  ;;  %7755 = vmatprep.subr.mxu1 %v3343_v47 }
 0xcd2   :  { %7723 = vmatpush3.msra.mxu0 %v3331_v45  ;;  %7756 = vmatpush3.msra.mxu1 %v3343_v47 }
 0xcd3   :  { %7724 = vmatprep.subr.mxu0 %v3330_v50  ;;  %7757 = vmatprep.subr.mxu1 %v3342_v53 }
 0xcd4   :  { %7725 = vmatpush3.msra.mxu0 %v3330_v50  ;;  %7758 = vmatpush3.msra.mxu1 %v3342_v53 }
 0xcd5   :  { %7727 = vmatmul.mubr.msk.f32.vlgmr.msra.gmra.mxu0 %vm161_vm0, %v8671_v20  ;;  %7740 = vmatprep.subr.mxu0 %v3341_v55 }
 0xcd6   :  { %7760 = vmatmul.mubr.msk.f32.vlgmr.msra.gmra.mxu1 %vm161_vm0, %v8671_v20  ;;  %7773 = vmatprep.subr.mxu1 %v3353_v56 }
 0xcd7   :  { %7741 = vmatpush3.msra.mxu0 %v3341_v55  ;;  %7748 = vmatprep.mubr.msk.f32.mxu0 %vm161_vm0, %v8669_v19 }
 0xcd8   :  { %7774 = vmatpush3.msra.mxu1 %v3353_v56  ;;  %7781 = vmatprep.mubr.msk.f32.mxu1 %vm161_vm0, %v8669_v19 }
 0xcd9   :  { %7742 = vmatprep.subr.mxu0 %v3340_v57  ;;  %7775 = vmatprep.subr.mxu1 %v3352_v46 }
 0xcda   :  { %7743 = vmatpush3.msra.mxu0 %v3340_v57  ;;  %7776 = vmatpush3.msra.mxu1 %v3352_v46 }
 0xcdb   :  { %7744 = vmatprep.subr.mxu0 %v3339_v58  ;;  %7777 = vmatprep.subr.mxu1 %v3351_v48 }
 0xcdc   :  { %7745 = vmatpush3.msra.mxu0 %v3339_v58  ;;  %7778 = vmatpush3.msra.mxu1 %v3351_v48 }
 0xcdd   :  { %7746 = vmatprep.subr.mxu0 %v3338_v41  ;;  %7779 = vmatprep.subr.mxu1 %v3350_v59 }
 0xcde   :  { %7747 = vmatpush3.msra.mxu0 %v3338_v41  ;;  %7780 = vmatpush3.msra.mxu1 %v3350_v59 }
 0xcdf   :  { %7749 = vmatmul.mubr.msk.f32.vlgmr.msra.gmra.mxu0 %vm161_vm0, %v8671_v20  ;;  %7762 = vmatprep.subr.mxu0 %v3349_v60 }
 0xce0   :  { %7782 = vmatmul.mubr.msk.f32.vlgmr.msra.gmra.mxu1 %vm161_vm0, %v8671_v20  ;;  %7763 = vmatpush3.msra.mxu0 %v3349_v60 }
 0xce1   :  { %7770 = vmatprep.mubr.msk.f32.mxu0 %vm161_vm0, %v8669_v19  ;;  %7764 = vmatprep.subr.mxu0 %v3348_v61 }
 0xce2   :  { %7765 = vmatpush3.msra.mxu0 %v3348_v61  ;;  %7795 = vmatprep.subr.mxu1 %v8164_v5 }
 0xce3   :  { %7766 = vmatprep.subr.mxu0 %v3347_v62  ;;  %7797 = vmatprep.mubr.msk.f32.mxu1 %vm8165_vm2, %v8164_v5 }
 0xce4   :  { %7767 = vmatpush3.msra.mxu0 %v3347_v62 }
 0xce5   :  { %7768 = vmatprep.subr.mxu0 %v3346_v63 }
 0xce6   :  { %7769 = vmatpush3.msra.mxu0 %v3346_v63 }
 0xce7   :  { %7771 = vmatmul.mubr.msk.f32.vlgmr.msra.gmra.mxu0 %vm161_vm0, %v8671_v20  ;;  %7784 = vmatprep.subr.mxu0 %v3357_v0 }
 0xce8   :  { %7785 = vmatpush3.msra.mxu0 %v3357_v0  ;;  %7792 = vmatprep.mubr.msk.f32.mxu0 %vm161_vm0, %v8669_v19 }
 0xce9   :  { %7786 = vmatprep.subr.mxu0 %v3356_v40 }
 0xcea   :  { %7787 = vmatpush3.msra.mxu0 %v3356_v40 }
 0xceb   :  { %7788 = vmatprep.subr.mxu0 %v3355_v1 }
 0xcec   :  { %7789 = vmatpush3.msra.mxu0 %v3355_v1 }
 0xced   :  { %7790 = vmatprep.subr.mxu0 %v3354_v32 }
 0xcee   :  { %7791 = vmatpush3.msra.mxu0 %v3354_v32 }
 0xcef   :  { %7793 = vmatmul.mubr.msk.f32.vlgmr.msra.gmra.mxu0 %vm161_vm0, %v8671_v20  ;;  %7805 = vmatprep.subr.mxu0 %v8164_v5 }
 0xcf0   :  { %7807 = vmatprep.mubr.msk.f32.mxu0 %vm8165_vm2, %v8164_v5 }
 0xd78   :  { %v7695_v2 = vpop.f32.mrf.mxu1  ;;  %v7673_v33 = vpop.f32.mrf.mxu0 }
 0xd79   :  { %v4265_v43 = vmul.f32 0.17677669, %v7673_v33  ;;  %v4269_v17 = vmul.f32 0.17677669, %v7695_v2 }
 0xd7a   :  { %v3580_v3 = vpop.f32.mrf.mxu1  ;;  %v3430_v42 = vpop.f32.mrf.mxu0 }
 0xd7b   :  { %v4264_v7 = vmul.f32 0.17677669, %v3430_v42  ;;  %v4268_v19 = vmul.f32 0.17677669, %v3580_v3 }
 0xd81   :  { %v7684_v8 = vpop.f32.mrf.mxu0 }
 0xd82   :  { %v7717_v4 = vpop.f32.mrf.mxu1  ;;  %v4267_v13 = vmul.f32 0.17677669, %v7684_v8 }
 0xd83   :  { %v3505_v9 = vpop.f32.mrf.mxu0 }
 0xd84   :  { %v3730_v6 = vpop.f32.mrf.mxu1  ;;  %v4266_v16 = vmul.f32 0.17677669, %v3505_v9 }
 0xd85   :  { %7796 = vmatpush3.xpose.msk.msra.mxu1 %vm1394_vm3, %v3730_v6 }
 0xd86   :  { %7800 = vmatprep.subr.mxu1 %v8164_v5 }
 0xd88   :  { %7798 = vmatmul.mubr.msk.f32.vlgmr.msra.gmra.mxu1 %vm1394_vm3, %v4264_v7 }
 0xd89   :  { %7801 = vmatpush3.xpose.msk.msra.mxu1 %vm1394_vm3, %v7717_v4  ;;  %7802 = vmatprep.mubr.msk.f32.mxu1 %vm8165_vm2, %v8164_v5 }
 0xd8a   :  { %7810 = vmatprep.subr.mxu1 %v8164_v5 }
 0xd8b   :  { %v7706_v10 = vpop.f32.mrf.mxu0 }
 0xd8c   :  { %7803 = vmatmul.mubr.msk.f32.vlgmr.msra.gmra.mxu1 %vm1394_vm3, %v4265_v43  ;;  %v7739_v14 = vpop.f32.mrf.mxu1  ;;  %v4271_v21 = vmul.f32 0.17677669, %v7706_v10 }
 0xd8d   :  { %7812 = vmatprep.mubr.msk.f32.mxu1 %vm8165_vm2, %v8164_v5  ;;  %v3655_v11 = vpop.f32.mrf.mxu0 }
 0xd8e   :  { %v3880_v18 = vpop.f32.mrf.mxu1  ;;  %v4270_v24 = vmul.f32 0.17677669, %v3655_v11 }
 0xd95   :  { %v7728_v12 = vpop.f32.mrf.mxu0 }
 0xd96   :  { %7811 = vmatpush3.xpose.msk.msra.mxu1 %vm1394_vm3, %v7728_v12  ;;  %v7761_v22 = vpop.f32.mrf.mxu1 }
 0xd97   :  { %v3805_v15 = vpop.f32.mrf.mxu0  ;;  %7820 = vmatprep.subr.mxu1 %v8164_v5 }
 0xd98   :  { %7806 = vmatpush3.xpose.msk.msra.mxu0 %vm1394_vm3, %v3805_v15  ;;  %v4030_v25 = vpop.f32.mrf.mxu1 }
 0xd99   :  { %7813 = vmatmul.mubr.msk.f32.vlgmr.msra.gmra.mxu1 %vm1394_vm3, %v4267_v13  ;;  %7815 = vmatprep.subr.mxu0 %v8164_v5 }
 0xd9a   :  { %7821 = vmatpush3.xpose.msk.msra.mxu1 %vm1394_vm3, %v7739_v14  ;;  %7822 = vmatprep.mubr.msk.f32.mxu1 %vm8165_vm2, %v8164_v5 }
 0xd9b   :  { %7808 = vmatmul.mubr.msk.f32.vlgmr.msra.gmra.mxu0 %vm1394_vm3, %v4266_v16  ;;  %7830 = vmatprep.subr.mxu1 %v8164_v5 }
 0xd9c   :  { %7816 = vmatpush3.xpose.msk.msra.mxu0 %vm1394_vm3, %v3880_v18  ;;  %7817 = vmatprep.mubr.msk.f32.mxu0 %vm8165_vm2, %v8164_v5 }
 0xd9d   :  { %7823 = vmatmul.mubr.msk.f32.vlgmr.msra.gmra.mxu1 %vm1394_vm3, %v4269_v17  ;;  %7825 = vmatprep.subr.mxu0 %v8164_v5 }
 0xd9e   :  { %7832 = vmatprep.mubr.msk.f32.mxu1 %vm8165_vm2, %v8164_v5 }
 0xd9f   :  { %v7750_v20 = vpop.f32.mrf.mxu0  ;;  %7818 = vmatmul.mubr.msk.f32.vlgmr.msra.gmra.mxu0 %vm1394_vm3, %v4268_v19 }
 0xda0   :  { %7831 = vmatpush3.xpose.msk.msra.mxu1 %vm1394_vm3, %v7750_v20  ;;  %7827 = vmatprep.mubr.msk.f32.mxu0 %vm8165_vm2, %v8164_v5  ;;  %v8807_v26 = vpop.f32.mrf.mxu1 }
 0xda1   :  { %v3955_v23 = vpop.f32.mrf.mxu0  ;;  %7840 = vmatprep.subr.mxu1 %v8164_v5 }
 0xda2   :  { %7826 = vmatpush3.xpose.msk.msra.mxu0 %vm1394_vm3, %v3955_v23  ;;  %v8809_v27 = vpop.f32.mrf.mxu1 }
 0xda3   :  { %7833 = vmatmul.mubr.msk.f32.vlgmr.msra.gmra.mxu1 %vm1394_vm3, %v4271_v21  ;;  %7835 = vmatprep.subr.mxu0 %v8164_v5 }
 0xda4   :  { %7841 = vmatpush3.msra.mxu1 %v7761_v22  ;;  %7842 = vmatprep.mubr.msk.f32.mxu1 %vm8165_vm2, %v8164_v5 }
 0xda5   :  { %7828 = vmatmul.mubr.msk.f32.vlgmr.msra.gmra.mxu0 %vm1394_vm3, %v4270_v24  ;;  %7850 = vmatprep.subr.mxu1 %v8164_v5 }
 0xda6   :  { %7836 = vmatpush3.msra.mxu0 %v4030_v25  ;;  %7837 = vmatprep.mubr.msk.f32.mxu0 %vm8165_vm2, %v8164_v5 }
 0xda7   :  { %7845 = vmatprep.subr.mxu0 %v8164_v5  ;;  %v8813_v36 = vpop.f32.mrf.mxu0 }
 0xda9   :  { %v8815_v37 = vpop.f32.mrf.mxu0 }
 0xdaf   :  { %v8817_v38 = vpop.f32.mrf.mxu0 }
 0xdb1   :  { %v8819_v39 = vpop.f32.mrf.mxu0 }
 0xe48   :  { %v4344_v28 = vpop.f32.mrf.mxu1 }
 0xe49   :  { %v4880_v29 = vsel %vm1394_vm3, %v4344_v28, -inf }
 0xe4a   :  { %4881 = vmax.xlane.f32.xlu0 %v4880_v29  ;;  %v7799_v30 = vpop.f32.mrf.mxu1 }
 0xe4c   :  { %v4420_v31 = vpop.f32.mrf.mxu1 }
 0xe4d   :  { %v4883_v34 = vsel %vm1394_vm3, %v4420_v31, -inf }
 0xe4e   :  { %4884 = vmax.xlane.f32.xlu1 %v4883_v34  ;;  %v7804_v35 = vpop.f32.mrf.mxu1 }
 0xe59   :  { %v4572_v44 = vpop.f32.mrf.mxu1 }
 0xe5a   :  { %v4889_v45 = vsel %vm1394_vm3, %v4572_v44, -inf }
 0xe5b   :  { %4890 = vmax.xlane.f32.xlu1 %v4889_v45  ;;  %v4496_v47 = vpop.f32.mrf.mxu0  ;;  %v7814_v50 = vpop.f32.mrf.mxu1 }
 0xe5c   :  { %v4886_v53 = vsel %vm1394_vm3, %v4496_v47, -inf }
 0xe5d   :  { %v4724_v55 = vpop.f32.mrf.mxu1  ;;  %4887 = vmax.xlane.f32.xlu0 %v4886_v53  ;;  %v7809_v56 = vpop.f32.mrf.mxu0 }
 0xe5e   :  { %v4895_v57 = vsel %vm1394_vm3, %v4724_v55, -inf }
 0xe5f   :  { %4896 = vmax.xlane.f32.xlu1 %v4895_v57  ;;  %v4648_v46 = vpop.f32.mrf.mxu0  ;;  %v7824_v58 = vpop.f32.mrf.mxu1 }
 0xe60   :  { %v4892_v48 = vsel %vm1394_vm3, %v4648_v46, -inf }
 0xe61   :  { %4893 = vmax.xlane.f32.xlu0 %v4892_v48  ;;  %v7819_v41 = vpop.f32.mrf.mxu0 }
 0xe63   :  { %v4876_v59 = vpop.f32.mrf.mxu1 }
 0xe64   :  { %v4901_v60 = vsel %vm1394_vm3, %v4876_v59, -inf }
 0xe65   :  { %4902 = vmax.xlane.f32.xlu1 %v4901_v60  ;;  %v4800_v61 = vpop.f32.mrf.mxu0  ;;  %v7834_v62 = vpop.f32.mrf.mxu1 }
 0xe66   :  { %v4898_v63 = vsel %vm1394_vm3, %v4800_v61, -inf }
 0xe67   :  { %4899 = vmax.xlane.f32.xlu0 %v4898_v63  ;;  %v7829_v0 = vpop.f32.mrf.mxu0 }
 0xed3   :  { %v4882_v40 = vpop.xlane.xlu0 %4881 }
 0xed4   :  { %v4904_v1 = vsub.f32 %v4344_v28, %v4882_v40 }
 0xed6   :  { %v4912_v32 = vmul.f32 1.442695, %v4904_v1 }
 0xed7   :  { %v4885_v2 = vpop.xlane.xlu1 %4884 }
 0xed8   :  { %8057 = vpow2.f32 %v4912_v32  ;;  %v4905_v33 = vsub.f32 %v4420_v31, %v4885_v2 }
 0xeda   :  { %v4914_v3 = vmul.f32 1.442695, %v4905_v33 }
 0xedc   :  { %8059 = vpow2.f32 %v4914_v3 }
 0xee4   :  { %v4891_v4 = vpop.xlane.xlu1 %4890 }
 0xee5   :  { %v8058_v42 = vpop.eup %8057  ;;  %v4907_v6 = vsub.f32 %v4572_v44, %v4891_v4 }
 0xee6   :  { %v4888_v7 = vpop.xlane.xlu0 %4887  ;;  %v4928_v8 = vsel %vm1394_vm3, %v8058_v42, 0.0 }
 0xee7   :  { %v4918_v43 = vmul.f32 1.442695, %v4907_v6  ;;  %v4906_v9 = vsub.f32 %v4496_v47, %v4888_v7  ;;  %4929 = vadd.xlane.f32.xlu0 %v4928_v8  ;;  %v5554_v6 = vld [vmem:[%s9118_s3 + $0x10] sm:$0xff]  ;;  %v5555_v7 = vld [vmem:[%s9118_s3 + $0x18] sm:$0xff] }
 0xee8   :  { %v4897_v10 = vpop.xlane.xlu1 %4896 }
 0xee9   :  { %v8060_v11 = vpop.eup %8059  ;;  %8061 = vpow2.f32 %v4918_v43  ;;  %v4916_v12 = vmul.f32 1.442695, %v4906_v9  ;;  %v4909_v13 = vsub.f32 %v4724_v55, %v4897_v10 }
 0xeea   :  { %v4894_v14 = vpop.xlane.xlu0 %4893  ;;  %v4931_v15 = vsel %vm1394_vm3, %v8060_v11, 0.0 }
 0xeeb   :  { %8063 = vpow2.f32 %v4916_v12  ;;  %v4922_v16 = vmul.f32 1.442695, %v4909_v13  ;;  %v4908_v17 = vsub.f32 %v4648_v46, %v4894_v14  ;;  %4932 = vadd.xlane.f32.xlu1 %v4931_v15 }
 0xeed   :  { %8065 = vpow2.f32 %v4922_v16  ;;  %v4920_v18 = vmul.f32 1.442695, %v4908_v17 }
 0xeee   :  { %v4903_v19 = vpop.xlane.xlu1 %4902 }
 0xeef   :  { %8067 = vpow2.f32 %v4920_v18  ;;  %v4911_v20 = vsub.f32 %v4876_v59, %v4903_v19 }
 0xef0   :  { %v4900_v21 = vpop.xlane.xlu0 %4899 }
 0xef1   :  { %v4926_v22 = vmul.f32 1.442695, %v4911_v20  ;;  %v4910_v23 = vsub.f32 %v4800_v61, %v4900_v21 }
 0xef3   :  { %8069 = vpow2.f32 %v4926_v22  ;;  %v4924_v24 = vmul.f32 1.442695, %v4910_v23  ;;  %v7048_v22 = vld [vmem:[%s9119_s8] ss:$0 sm:$0xff] }
 0xef5   :  { %8071 = vpow2.f32 %v4924_v24 }
 0xef6   :  { %v8062_v25 = vpop.eup %8061 }
 0xef7   :  { %v4937_v28 = vsel %vm1394_vm3, %v8062_v25, 0.0 }
 0xef8   :  { %v8064_v29 = vpop.eup %8063  ;;  %4938 = vadd.xlane.f32.xlu1 %v4937_v28 }
 0xef9   :  { %v4934_v30 = vsel %vm1394_vm3, %v8064_v29, 0.0 }
 0xefa   :  { %v8066_v31 = vpop.eup %8065  ;;  %4935 = vadd.xlane.f32.xlu0 %v4934_v30 }
 0xefb   :  { %v4943_v34 = vsel %vm1394_vm3, %v8066_v31, 0.0 }
 0xefc   :  { %v8068_v35 = vpop.eup %8067  ;;  %4944 = vadd.xlane.f32.xlu1 %v4943_v34 }
 0xefd   :  { %v4940_v44 = vsel %vm1394_vm3, %v8068_v35, 0.0 }
 0xefe   :  { %4941 = vadd.xlane.f32.xlu0 %v4940_v44 }
 0xf00   :  { %v8070_v45 = vpop.eup %8069 }
 0xf01   :  { %v4949_v47 = vsel %vm1394_vm3, %v8070_v45, 0.0 }
 0xf02   :  { %v8072_v50 = vpop.eup %8071  ;;  %4950 = vadd.xlane.f32.xlu1 %v4949_v47 }
 0xf03   :  { %v4946_v53 = vsel %vm1394_vm3, %v8072_v50, 0.0 }
 0xf04   :  { %4947 = vadd.xlane.f32.xlu0 %v4946_v53 }
 0xf70   :  { %v4930_v55 = vpop.xlane.xlu0 %4929 }
 0xf71   :  { %8073 = vrcp.f32 %v4930_v55 }
 0xf74   :  { %v4933_v56 = vpop.xlane.xlu1 %4932 }
 0xf75   :  { %8075 = vrcp.f32 %v4933_v56 }
 0xf7e   :  { %v8074_v57 = vpop.eup %8073 }
 0xf7f   :  { %v4960_v46 = vmul.f32 %v8074_v57, %v8058_v42  ;;  %v5553_v42 = vld [vmem:[%s9118_s3 + $0x8] sm:$0xff] }
 0xf81   :  { %v4939_v58 = vpop.xlane.xlu1 %4938  ;;  %7838 = vmatmul.mubr.msk.f32.vlgmr.msra.gmra.mxu0 %vm1394_vm3, %v4960_v46 }
 0xf82   :  { %v8076_v48 = vpop.eup %8075  ;;  %8077 = vrcp.f32 %v4939_v58  ;;  %7846 = vmatpush3.msra.mxu0 %v8815_v37  ;;  %7847 = vmatprep.mubr.msk.f32.mxu0 %vm8165_vm2, %v8164_v5 }
 0xf83   :  { %v4936_v41 = vpop.xlane.xlu0 %4935  ;;  %v4961_v59 = vmul.f32 %v8076_v48, %v8060_v11  ;;  %7855 = vmatprep.subr.mxu0 %v8164_v5 }
 0xf84   :  { %8079 = vrcp.f32 %v4936_v41 }
 0xf85   :  { %v4945_v60 = vpop.xlane.xlu1 %4944  ;;  %7843 = vmatmul.mubr.msk.f32.vlgmr.msra.gmra.mxu1 %vm1394_vm3, %v4961_v59 }
 0xf86   :  { %8081 = vrcp.f32 %v4945_v60  ;;  %7851 = vmatpush3.msra.mxu1 %v8813_v36  ;;  %7852 = vmatprep.mubr.msk.f32.mxu1 %vm8165_vm2, %v8164_v5 }
 0xf87   :  { %v4942_v61 = vpop.xlane.xlu0 %4941  ;;  %7860 = vmatprep.subr.mxu1 %v8164_v5 }
 0xf88   :  { %8083 = vrcp.f32 %v4942_v61 }
 0xf8b   :  { %v4951_v37 = vpop.xlane.xlu1 %4950 }
 0xf8c   :  { %8085 = vrcp.f32 %v4951_v37 }
 0xf8d   :  { %v4948_v62 = vpop.xlane.xlu0 %4947 }
 0xf8e   :  { %8087 = vrcp.f32 %v4948_v62 }
 0xf8f   :  { %v8078_v63 = vpop.eup %8077 }
 0xf90   :  { %v4963_v0 = vmul.f32 %v8078_v63, %v8062_v25 }
 0xf91   :  { %v8080_v40 = vpop.eup %8079 }
 0xf92   :  { %7853 = vmatmul.mubr.msk.f32.vlgmr.msra.gmra.mxu1 %vm1394_vm3, %v4963_v0  ;;  %v4962_v1 = vmul.f32 %v8080_v40, %v8064_v29  ;;  %v5944_v0 = vld [vmem:[%s9120_s14 + $0x18] sm:$0xff]  ;;  %v5943_v40 = vld [vmem:[%s9120_s14 + $0x10] sm:$0xff] }
 0xf93   :  { %v8082_v32 = vpop.eup %8081  ;;  %7861 = vmatpush3.msra.mxu1 %v8807_v26  ;;  %7862 = vmatprep.mubr.msk.f32.mxu1 %vm8165_vm2, %v8164_v5 }
 0xf94   :  { %7848 = vmatmul.mubr.msk.f32.vlgmr.msra.gmra.mxu0 %vm1394_vm3, %v4962_v1  ;;  %7870 = vmatprep.subr.mxu1 %v8164_v5  ;;  %v4965_v36 = vmul.f32 %v8082_v32, %v8066_v31  ;;  %v5942_v1 = vld [vmem:[%s9120_s14 + $0x8] sm:$0xff]  ;;  %v5941_v32 = vld [vmem:[%s9120_s14] sm:$0xff] }
 0xf95   :  { %v8084_v2 = vpop.eup %8083  ;;  %7856 = vmatpush3.msra.mxu0 %v8809_v27  ;;  %7857 = vmatprep.mubr.msk.f32.mxu0 %vm8165_vm2, %v8164_v5 }
 0xf96   :  { %7863 = vmatmul.mubr.msk.f32.vlgmr.msra.gmra.mxu1 %vm1394_vm3, %v4965_v36  ;;  %7865 = vmatprep.subr.mxu0 %v8164_v5  ;;  %v4964_v26 = vmul.f32 %v8084_v2, %v8068_v35 }
 0xf97   :  { %7871 = vmatpush3.msra.mxu1 %v8817_v38  ;;  %7872 = vmatprep.mubr.msk.f32.mxu1 %vm8165_vm2, %v8164_v5  ;;  %v5552_v38 = vld [vmem:[%s9118_s3] sm:$0xff] }
 0xf98   :  { %7858 = vmatmul.mubr.msk.f32.vlgmr.msra.gmra.mxu0 %vm1394_vm3, %v4964_v26  ;;  %7880 = vmatprep.subr.mxu1 %v5553_v42 }
 0xf99   :  { %v8086_v33 = vpop.eup %8085  ;;  %7866 = vmatpush3.msra.mxu0 %v8819_v39  ;;  %7867 = vmatprep.mubr.msk.f32.mxu0 %vm8165_vm2, %v8164_v5 }
 0xf9a   :  { %v4967_v27 = vmul.f32 %v8086_v33, %v8070_v45  ;;  %7875 = vmatprep.subr.mxu0 %v5552_v38 }
 0xf9b   :  { %v8088_v3 = vpop.eup %8087 }
 0xf9c   :  { %7873 = vmatmul.mubr.msk.f32.vlgmr.msra.gmra.mxu1 %vm1394_vm3, %v4967_v27  ;;  %v4966_v4 = vmul.f32 %v8088_v3, %v8072_v50 }
 0xf9d   :  { %7881 = vmatpush3.msra.mxu1 %v5553_v42 }
 0xf9e   :  { %7868 = vmatmul.mubr.msk.f32.vlgmr.msra.gmra.mxu0 %vm1394_vm3, %v4966_v4  ;;  %7890 = vmatprep.subr.mxu1 %v5555_v7 }
 0xf9f   :  { %7876 = vmatpush3.msra.mxu0 %v5552_v38  ;;  %v7049_v38 = vld [vmem:[%s9121_s19] ss:$0 sm:$0xff] }
 0xfa0   :  { %7885 = vmatprep.subr.mxu0 %v5554_v6 }
0x1041   :  { %v5037_v39 = vpop.f32.mrf.mxu0 }
0x1042   :  { %7877 = vmatprep.mubr.msk.f32.mxu0 %vm1394_vm3, %v5037_v39 }
0x1043   :  { %v7839_v5 = vpop.f32.mrf.mxu0 }
0x1044   :  { %v7050_v5 = vld [vmem:[%s9122_s24] ss:$0 sm:$0xff] }
0x1045   :  { %v5110_v8 = vpop.f32.mrf.mxu1 }
0x1046   :  { %7878 = vmatmul.mubr.msk.f32.vlgmr.msra.gmra.mxu0 %vm1394_vm3, %v5110_v8 }
0x1047   :  { %v7844_v43 = vpop.f32.mrf.mxu1  ;;  %7886 = vmatpush3.msra.mxu0 %v5554_v6 }
0x1048   :  { %7895 = vmatprep.subr.mxu0 %v5944_v0 }
0x1052   :  { %v5256_v9 = vpop.f32.mrf.mxu1 }
0x1054   :  { %v5183_v10 = vpop.f32.mrf.mxu0  ;;  %v7854_v11 = vpop.f32.mrf.mxu1 }
0x1055   :  { %7882 = vmatprep.mubr.msk.f32.mxu1 %vm1394_vm3, %v5183_v10  ;;  %v6050_v10 = vld [vmem:[%s9123_s30 + $0x38] sm:$0xff]  ;;  %v6049_v11 = vld [vmem:[%s9123_s30 + $0x30] sm:$0xff] }
0x1056   :  { %v7849_v12 = vpop.f32.mrf.mxu0  ;;  %v5402_v13 = vpop.f32.mrf.mxu1  ;;  %7883 = vmatmul.mubr.msk.f32.vlgmr.msra.gmra.mxu1 %vm1394_vm3, %v5256_v9 }
0x1057   :  { %7891 = vmatpush3.msra.mxu1 %v5555_v7  ;;  %v6048_v12 = vld [vmem:[%s9123_s30 + $0x28] sm:$0xff] }
0x1058   :  { %v5329_v14 = vpop.f32.mrf.mxu0  ;;  %v7864_v15 = vpop.f32.mrf.mxu1  ;;  %7906 = vmatprep.subr.mxu1 %v6050_v10 }
0x1059   :  { %7887 = vmatprep.mubr.msk.f32.mxu0 %vm1394_vm3, %v5329_v14  ;;  %v6046_v14 = vld [vmem:[%s9123_s30 + $0x18] sm:$0xff]  ;;  %v6045_v15 = vld [vmem:[%s9123_s30 + $0x10] sm:$0xff] }
0x105a   :  { %v7859_v16 = vpop.f32.mrf.mxu0  ;;  %7888 = vmatmul.mubr.msk.f32.vlgmr.msra.gmra.mxu0 %vm1394_vm3, %v5402_v13  ;;  %v6047_v13 = vld [vmem:[%s9123_s30 + $0x20] sm:$0xff] }
0x105b   :  { %7896 = vmatpush3.msra.mxu0 %v5944_v0  ;;  %v6044_v16 = vld [vmem:[%s9123_s30 + $0x8] sm:$0xff] }
0x105c   :  { %v5548_v17 = vpop.f32.mrf.mxu1  ;;  %7897 = vmatprep.subr.mxu0 %v5943_v40  ;;  %v6238_v0 = vld [vmem:[%s9127_s23 + $0x8] sm:$0xff] }
0x105d   :  { %7898 = vmatpush3.msra.mxu0 %v5943_v40  ;;  %v6237_v40 = vld [vmem:[%s9127_s23] sm:$0xff] }
0x105e   :  { %v5475_v18 = vpop.f32.mrf.mxu0  ;;  %v7874_v19 = vpop.f32.mrf.mxu1  ;;  %7899 = vmatprep.subr.mxu0 %v5942_v1 }
0x105f   :  { %7892 = vmatprep.mubr.msk.f32.mxu1 %vm1394_vm3, %v5475_v18  ;;  %7900 = vmatpush3.msra.mxu0 %v5942_v1  ;;  %v7051_v18 = vld [vmem:[%s9124_s12] ss:$0 sm:$0xff] }
0x1060   :  { %v7869_v20 = vpop.f32.mrf.mxu0  ;;  %7893 = vmatmul.mubr.msk.f32.vlgmr.msra.gmra.mxu1 %vm1394_vm3, %v5548_v17  ;;  %7901 = vmatprep.subr.mxu0 %v5941_v32  ;;  %v6043_v17 = vld [vmem:[%s9123_s30] sm:$0xff] }
0x1061   :  { %7902 = vmatpush3.msra.mxu0 %v5941_v32  ;;  %7907 = vmatpush3.msra.mxu1 %v6050_v10  ;;  %v7057_v1 = vld [vmem:[%s9128_s26] ss:$0 sm:$0xff] }
0x1062   :  { %7908 = vmatprep.subr.mxu1 %v6049_v11 }
0x1063   :  { %7909 = vmatpush3.msra.mxu1 %v6049_v11 }
0x1064   :  { %7910 = vmatprep.subr.mxu1 %v6048_v12 }
0x1065   :  { %7911 = vmatpush3.msra.mxu1 %v6048_v12 }
0x1066   :  { %7912 = vmatprep.subr.mxu1 %v6047_v13 }
0x1067   :  { %7913 = vmatpush3.msra.mxu1 %v6047_v13 }
0x1068   :  { %7914 = vmatprep.subr.mxu1 %v6046_v14 }
0x1069   :  { %7915 = vmatpush3.msra.mxu1 %v6046_v14 }
0x106a   :  { %7916 = vmatprep.subr.mxu1 %v6045_v15 }
0x106b   :  { %7917 = vmatpush3.msra.mxu1 %v6045_v15 }
0x106c   :  { %7918 = vmatprep.subr.mxu1 %v6044_v16 }
0x106d   :  { %7919 = vmatpush3.msra.mxu1 %v6044_v16 }
0x106e   :  { %7920 = vmatprep.subr.mxu1 %v6043_v17 }
0x106f   :  { %7921 = vmatpush3.msra.mxu1 %v6043_v17 }
0x1106   :  { %v7879_v21 = vpop.f32.mrf.mxu0 }
0x1107   :  { %v5888_v28 = vadd.f32 %v7879_v21, %v7048_v22 }
0x1108   :  { %v5628_v23 = vpop.f32.mrf.mxu0 }
0x1109   :  { %v5887_v30 = vadd.f32 %v7048_v22, %v5628_v23 }
0x1116   :  { %v7884_v24 = vpop.f32.mrf.mxu1 }
0x1117   :  { %v5890_v31 = vadd.f32 %v7884_v24, %v5888_v28 }
0x1118   :  { %v5709_v29 = vpop.f32.mrf.mxu1 }
0x1119   :  { %v5889_v35 = vadd.f32 %v5887_v30, %v5709_v29 }
0x111a   :  { %v7889_v25 = vpop.f32.mrf.mxu0 }
0x111b   :  { %v5892_v44 = vadd.f32 %v7889_v25, %v5890_v31 }
0x111c   :  { %v5790_v34 = vpop.f32.mrf.mxu0 }
0x111d   :  { %v5891_v47 = vadd.f32 %v5889_v35, %v5790_v34 }
0x1120   :  { %v7894_v45 = vpop.f32.mrf.mxu1 }
0x1121   :  { %v5894_v50 = vadd.f32 %v7894_v45, %v5892_v44  ;;  %v8105_v45 = vld [vmem:[%s8175_s5] sm:$0xff] }
0x1122   :  { %v5871_v53 = vpop.f32.mrf.mxu1 }
0x1123   :  { %v8879_v55 = vadd.f32 %v5894_v50, %v8644_v49  ;;  %v5893_v56 = vadd.f32 %v5891_v47, %v5871_v53  ;;  %v6146_v47 = vld [vmem:[%s9125_s27 + $0x18] sm:$0xff]  ;;  %v6145_v50 = vld [vmem:[%s9125_s27 + $0x10] sm:$0xff]  ;;  %v6144_v53 = vld [vmem:[%s9125_s27 + $0x8] sm:$0xff] }
0x1124   :  { %7925 = vmatprep.subr.mxu0 %v6146_v47 }
0x1125   :  { %v8882_v57 = vadd.f32 %v5893_v56, %v8647_v51  ;;  %v5902_v46 = vsel %vm161_vm0, %v8879_v55, 0.0  ;;  %v6143_v56 = vld [vmem:[%s9125_s27] sm:$0xff] }
0x1126   :  { %5903 = vadd.xlane.f32.xlu1 %v5902_v46  ;;  %v6346_v46 = vld [vmem:[%s8338_s4 + $0x18] sm:$0xff] }
0x1127   :  { %v5899_v58 = vsel %vm161_vm0, %v8882_v57, 0.0  ;;  %7943 = vmatprep.subr.mxu1 %v6346_v46 }
0x1128   :  { %5900 = vadd.xlane.f32.xlu0 %v5899_v58  ;;  %v6345_v58 = vld [vmem:[%s8338_s4 + $0x10] sm:$0xff] }
0x11af   :  { %v5904_v48 = vpop.xlane.xlu1 %5903 }
0x11b0   :  { %v5906_v41 = vmul.f32 0.03125, %v5904_v48  ;;  %v6344_v48 = vld [vmem:[%s8338_s4 + $0x8] sm:$0xff] }
0x11b1   :  { %v5901_v59 = vpop.xlane.xlu0 %5900 }
0x11b2   :  { %v5908_v49 = vsub.f32 %v8879_v55, %v5906_v41  ;;  %v5905_v60 = vmul.f32 0.03125, %v5901_v59  ;;  %v6343_v41 = vld [vmem:[%s8338_s4] sm:$0xff]  ;;  %v8106_v59 = vld [vmem:[%s8175_s5 + $0x8] sm:$0xff]  ;;  %s8166_s5 = smov [#allocation3]  }
0x11b4   :  { %v5907_v51 = vsub.f32 %v8882_v57, %v5905_v60  ;;  %v5910_v61 = vmul.f32 %v5908_v49, %v5908_v49 }
0x11b6   :  { %v5914_v37 = vsel %vm161_vm0, %v5910_v61, 0.0  ;;  %v5909_v62 = vmul.f32 %v5907_v51, %v5907_v51  ;;  %v7056_v61 = vld [vmem:[%s9126_s22] ss:$0 sm:$0xff] }
0x11b7   :  { %5915 = vadd.xlane.f32.xlu1 %v5914_v37 }
0x11b8   :  { %v5911_v63 = vsel %vm161_vm0, %v5909_v62, 0.0 }
0x11b9   :  { %5912 = vadd.xlane.f32.xlu0 %v5911_v63 }
0x1240   :  { %v5916_v36 = vpop.xlane.xlu1 %5915 }
0x1241   :  { %v5918_v2 = vmul.f32 0.03125, %v5916_v36 }
0x1242   :  { %v5913_v26 = vpop.xlane.xlu0 %5912 }
0x1243   :  { %v5920_v33 = vadd.f32 1e-05, %v5918_v2  ;;  %v5917_v27 = vmul.f32 0.03125, %v5913_v26 }
0x1245   :  { %8089 = vrsqrt.f32 %v5920_v33  ;;  %v5919_v3 = vadd.f32 1e-05, %v5917_v27 }
0x1247   :  { %8091 = vrsqrt.f32 %v5919_v3 }
0x1252   :  { %v8090_v4 = vpop.eup %8089 }
0x1253   :  { %v5924_v42 = vmul.f32 %v8090_v4, %v5908_v49 }
0x1254   :  { %v8092_v6 = vpop.eup %8091 }
0x1255   :  { %v5923_v7 = vmul.f32 %v8092_v6, %v5907_v51  ;;  %v5932_v39 = vmul.f32 %v7049_v38, %v5924_v42 }
0x1257   :  { %v5931_v8 = vmul.f32 %v7049_v38, %v5923_v7  ;;  %v5940_v9 = vadd.f32 %v7050_v5, %v5932_v39 }
0x1259   :  { %v5939_v43 = vadd.f32 %v7050_v5, %v5931_v8 }
0x125b   :  { %7903 = vmatprep.mubr.msk.f32.mxu0 %vm161_vm0, %v5939_v43 }
0x125c   :  { %7904 = vmatmul.mubr.msk.f32.vlgmr.msra.gmra.mxu0 %vm161_vm0, %v5940_v9 }
0x125d   :  { %7926 = vmatpush3.msra.mxu0 %v6146_v47 }
0x125e   :  { %7927 = vmatprep.subr.mxu0 %v6145_v50 }
0x125f   :  { %7928 = vmatpush3.msra.mxu0 %v6145_v50 }
0x1260   :  { %7929 = vmatprep.subr.mxu0 %v6144_v53 }
0x1261   :  { %7930 = vmatpush3.msra.mxu0 %v6144_v53 }
0x1262   :  { %7931 = vmatprep.subr.mxu0 %v6143_v56 }
0x1263   :  { %7932 = vmatpush3.msra.mxu0 %v6143_v56 }
0x1264   :  { %7936 = vmatprep.subr.mxu0 %v6238_v0 }
0x131c   :  { %v7905_v19 = vpop.f32.mrf.mxu0 }
0x131d   :  { %v6030_v20 = vadd.f32 %v7905_v19, %v7051_v18 }
0x131e   :  { %v6024_v21 = vpop.f32.mrf.mxu0 }
0x131f   :  { %v6036_v22 = vmul.f32 0.70710677, %v6030_v20  ;;  %v6025_v23 = vadd.f32 %v7051_v18, %v6024_v21  ;;  %v6034_v34 = vmul.f32 0.5, %v6030_v20 }
0x1321   :  { %8093 = verf.f32 %v6036_v22  ;;  %v6035_v24 = vmul.f32 0.70710677, %v6025_v23  ;;  %v6033_v30 = vmul.f32 0.5, %v6025_v23 }
0x1323   :  { %8095 = verf.f32 %v6035_v24  ;;  %v7060_v24 = vld [vmem:[#allocation2] ss:$0 sm:$0xff] }
0x132e   :  { %v8094_v25 = vpop.eup %8093 }
0x132f   :  { %v6040_v29 = vadd.f32 1.0, %v8094_v25 }
0x1330   :  { %v8096_v28 = vpop.eup %8095 }
0x1331   :  { %v6039_v31 = vadd.f32 1.0, %v8096_v28  ;;  %v6042_v44 = vmul.f32 %v6040_v29, %v6034_v34 }
0x1333   :  { %v6041_v35 = vmul.f32 %v6039_v31, %v6033_v30 }
0x1335   :  { %7922 = vmatprep.mubr.msk.f32.mxu1 %vm245_vm1, %v6041_v35 }
0x1336   :  { %7923 = vmatmul.mubr.msk.f32.vlgmr.msra.gmra.mxu1 %vm245_vm1, %v6042_v44 }
0x1337   :  { %7951 = vmatprep.mubr.msk.f32.mxu1 %vm161_vm0, %v8105_v45  ;;  %7944 = vmatpush3.msra.mxu1 %v6346_v46 }
0x1338   :  { %7945 = vmatprep.subr.mxu1 %v6345_v58 }
0x1339   :  { %7946 = vmatpush3.msra.mxu1 %v6345_v58 }
0x133a   :  { %7947 = vmatprep.subr.mxu1 %v6344_v48 }
0x133b   :  { %7948 = vmatpush3.msra.mxu1 %v6344_v48 }
0x133c   :  { %7949 = vmatprep.subr.mxu1 %v6343_v41 }
0x133d   :  { %7950 = vmatpush3.msra.mxu1 %v6343_v41 }
0x133e   :  { %7952 = vmatmul.mubr.msk.f32.vlgmr.msra.gmra.mxu1 %vm161_vm0, %v8106_v59 }
0x13f6   :  { %v7924_v49 = vpop.f32.mrf.mxu1 }
0x13f7   :  { %v6133_v60 = vadd.f32 %v7924_v49, %v8879_v55 }
0x13f8   :  { %v6123_v51 = vpop.f32.mrf.mxu1 }
0x13f9   :  { %v6132_v37 = vadd.f32 %v6123_v51, %v8882_v57  ;;  %v6142_v63 = vadd.f32 %v7056_v61, %v6133_v60 }
0x13fb   :  { %v6141_v62 = vadd.f32 %v7056_v61, %v6132_v37 }
0x13fd   :  { %7933 = vmatprep.mubr.msk.f32.mxu0 %vm161_vm0, %v6141_v62 }
0x13fe   :  { %7934 = vmatmul.mubr.msk.f32.vlgmr.msra.gmra.mxu0 %vm161_vm0, %v6142_v63  ;;  %v7953_v33 = vpop.f32.mrf.mxu1 }
0x13ff   :  { %7937 = vmatpush3.msra.mxu0 %v6238_v0  ;;  %v6676_v4 = vrot.slane %v7953_v33, 1 }
0x1400   :  { %7938 = vmatprep.subr.mxu0 %v6237_v40  ;;  %v6413_v27 = vpop.f32.mrf.mxu1 }
0x1401   :  { %7939 = vmatpush3.msra.mxu0 %v6237_v40  ;;  %v6504_v3 = vrot.slane %v6413_v27, 1  ;;  %v6678_v42 = vmin.f32 %v7953_v33, %v6676_v4  ;;  %v6679_v39 = vmax.f32 %v7953_v33, %v6676_v4 }
0x1402   :  { %7954 = vmatprep.subr.mxu0 %v6346_v46 }
0x1403   :  { %v6506_v38 = vmin.f32 %v6413_v27, %v6504_v3  ;;  %v6507_v6 = vmax.f32 %v6413_v27, %v6504_v3  ;;  %v6681_v5 = vrot.slane %v6678_v42, 2  ;;  %v6693_v22 = vrot.slane %v6679_v39, 2 }
0x1405   :  { %v6509_v7 = vrot.slane %v6506_v38, 2  ;;  %v6521_v43 = vrot.slane %v6507_v6, 2  ;;  %v6683_v9 = vmin.f32 %v6679_v39, %v6681_v5  ;;  %v6684_v13 = vmax.f32 %v6679_v39, %v6681_v5 }
0x1407   :  { %v6512_v8 = vmax.f32 %v6507_v6, %v6509_v7  ;;  %v6688_v12 = vrot.slane %v6683_v9, 2  ;;  %v6686_v21 = vmax.f32 %v6678_v42, %v6683_v9  ;;  %v6685_v45 = vmin.f32 %v6678_v42, %v6683_v9 }
0x1408   :  { %v8940_v56 = vmin.f32 %v6684_v13, %v6693_v22  ;;  %v8947_v0 = vmax.f32 %v6684_v13, %v6693_v22 }
0x1409   :  { %v6523_v11 = vmin.f32 %v6512_v8, %v6521_v43  ;;  %v8935_v16 = vmin.f32 %v6684_v13, %v6688_v12  ;;  %v6524_v17 = vmax.f32 %v6512_v8, %v6521_v43  ;;  %v8938_v25 = vmax.f32 %v6684_v13, %v6688_v12 }
0x140a   :  { %v6705_v40 = vrot.slane %v8940_v56, 2 }
0x140b   :  { %v6533_v15 = vrot.slane %v6523_v11, 2  ;;  %v6700_v23 = vrot.slane %v8935_v16, 2  ;;  %v6547_v29 = vrot.slane %v6524_v17, 2 }
0x14be   :  { %v7935_v32 = vpop.f32.mrf.mxu0 }
0x14bf   :  { %v6232_v55 = vadd.f32 %v7935_v32, %v7057_v1 }
0x14c0   :  { %v6226_v36 = vpop.f32.mrf.mxu0 }
0x14c1   :  { %v6227_v2 = vadd.f32 %v7057_v1, %v6226_v36  ;;  %v6236_v26 = vmax.f32 %v6232_v55, 0.0 }
0x14c3   :  { %v6235_v57 = vmax.f32 %v6227_v2, 0.0 }
0x14c5   :  { %7940 = vmatprep.mubr.msk.f32.mxu0 %vm6246_vm4, %v6235_v57 }
0x14c6   :  { %7941 = vmatmul.mubr.msk.f32.vlgmr.msra.gmra.mxu0 %vm6246_vm4, %v6236_v26 }
0x14c7   :  { %7955 = vmatpush3.msra.mxu0 %v6346_v46  ;;  %7962 = vmatprep.mubr.msk.f32.mxu0 %vm161_vm0, %v8378_v54  ;;  %v6511_v54 = vmin.f32 %v6507_v6, %v6509_v7  ;;  %v6697_v46 = vmin.f32 %v6686_v21, %v8935_v16  ;;  %v6719_v6 = vrot.slane %v8947_v0, 2 }
0x14c8   :  { %7956 = vmatprep.subr.mxu0 %v6345_v58 }
0x14c9   :  { %7957 = vmatpush3.msra.mxu0 %v6345_v58  ;;  %v6516_v10 = vrot.slane %v6511_v54, 2  ;;  %v6514_v18 = vmax.f32 %v6506_v38, %v6511_v54  ;;  %v6513_v30 = vmin.f32 %v6506_v38, %v6511_v54  ;;  %v6698_v58 = vmax.f32 %v6686_v21, %v8935_v16 }
0x14ca   :  { %7958 = vmatprep.subr.mxu0 %v6344_v48  ;;  %v6710_v1 = vmax.f32 %v6685_v45, %v6697_v46  ;;  %v8957_v38 = vmin.f32 %v8938_v25, %v6705_v40  ;;  %v8959_v42 = vmin.f32 %v6685_v45, %v6697_v46 }
0x14cb   :  { %7959 = vmatpush3.msra.mxu0 %v6344_v48  ;;  %v6518_v14 = vmin.f32 %v6512_v8, %v6516_v10  ;;  %v6702_v48 = vmin.f32 %v8938_v25, %v6700_v23 }
0x14cc   :  { %7960 = vmatprep.subr.mxu0 %v6343_v41 }
0x14cd   :  { %7961 = vmatpush3.msra.mxu0 %v6343_v41  ;;  %v6528_v19 = vrot.slane %v6518_v14, 2  ;;  %v6525_v31 = vmin.f32 %v6514_v18, %v6518_v14  ;;  %v6526_v34 = vmax.f32 %v6514_v18, %v6518_v14  ;;  %v6711_v32 = vmin.f32 %v6698_v58, %v6702_v48 }
0x14ce   :  { %7963 = vmatmul.mubr.msk.f32.vlgmr.msra.gmra.mxu0 %vm161_vm0, %v8376_v52  ;;  %v6519_v52 = vmax.f32 %v6512_v8, %v6516_v10  ;;  %v8964_v9 = vmax.f32 %v6698_v58, %v6702_v48  ;;  %v6714_v48 = vrot.slane %v8957_v38, 2 }
0x14cf   :  { %v6538_v51 = vmax.f32 %v6513_v30, %v6525_v31  ;;  %v8950_v2 = vmin.f32 %v6513_v30, %v6525_v31  ;;  %v8962_v7 = vmin.f32 %v6710_v1, %v6711_v32  ;;  %v8972_v17 = vmax.f32 %v6710_v1, %v6711_v32 }
0x14d0   :  { %v6535_v20 = vmin.f32 %v6519_v52, %v6533_v15  ;;  %v6536_v28 = vmax.f32 %v6519_v52, %v6533_v15  ;;  %v6530_v35 = vmin.f32 %v6519_v52, %v6528_v19  ;;  %v6531_v47 = vmax.f32 %v6519_v52, %v6528_v19 }
0x14d1   :  { %v8978_v19 = vmax.f32 %v8959_v42, %v8962_v7  ;;  %v9013_v1 = vmax.f32 %v8938_v25, %v6705_v40 }
0x14d2   :  { %v6542_v50 = vrot.slane %v6535_v20, 2  ;;  %v6549_v59 = vmin.f32 %v6536_v28, %v6547_v29  ;;  %v6539_v61 = vmin.f32 %v6526_v34, %v6530_v35  ;;  %v6540_v37 = vmax.f32 %v6526_v34, %v6530_v35 }
0x14d3   :  { %v6550_v57 = vmax.f32 %v6536_v28, %v6547_v29 }
0x14d4   :  { %v6544_v62 = vmin.f32 %v6531_v47, %v6542_v50  ;;  %v6545_v55 = vmax.f32 %v6531_v47, %v6542_v50  ;;  %v6556_v36 = vrot.slane %v6549_v59, 2  ;;  %v8952_v26 = vmin.f32 %v6538_v51, %v6539_v61 }
0x14d5   :  { %v6552_v27 = vmax.f32 %v6538_v51, %v6539_v61  ;;  %v6567_v12 = vrot.slane %v6550_v57, 2  ;;  %v8999_v47 = vmax.f32 %v8938_v25, %v6700_v23 }
0x14d6   :  { %v6553_v3 = vmin.f32 %v6540_v37, %v6544_v62  ;;  %v6554_v5 = vmax.f32 %v6540_v37, %v6544_v62  ;;  %v6558_v54 = vmin.f32 %v6545_v55, %v6556_v36  ;;  %v6559_v10 = vmax.f32 %v6545_v55, %v6556_v36 }
0x14d7   :  { %v8968_v11 = vmax.f32 %v8950_v2, %v8952_v26  ;;  %v6560_v20 = vmin.f32 %v8950_v2, %v8952_v26  ;;  %v9020_v57 = vmin.f32 %v8999_v47, %v6714_v48 }
0x14d8   :  { %v8970_v13 = vmin.f32 %v6552_v27, %v6553_v3  ;;  %v8982_v21 = vmax.f32 %v6552_v27, %v6553_v3  ;;  %v8984_v22 = vmin.f32 %v6554_v5, %v6558_v54  ;;  %v8986_v29 = vmax.f32 %v6554_v5, %v6558_v54 }
0x14d9   :  { %v8988_v30 = vmin.f32 %v6559_v10, %v6567_v12  ;;  %v8990_v35 = vmax.f32 %v6559_v10, %v6567_v12  ;;  %v6725_v2 = vmin.f32 %v8964_v9, %v9020_v57 }
0x14da   :  { %v6572_v45 = vmax.f32 %v8968_v11, %v8970_v13  ;;  %v6574_v59 = vmax.f32 %v8982_v21, %v8984_v22 }
0x14db   :  { %v6575_v16 = vmin.f32 %v8986_v29, %v8988_v30 }
0x1586   :  { %v7942_v44 = vpop.f32.mrf.mxu0 }
0x1587   :  { %v6325_v53 = vadd.f32 %v7942_v44, %v7060_v24  ;;  %v6571_v44 = vmin.f32 %v8968_v11, %v8970_v13  ;;  %v6726_v11 = vmax.f32 %v8964_v9, %v9020_v57 }
0x1588   :  { %v6319_v41 = vpop.f32.mrf.mxu0 }
0x1589   :  { %v7064_v49 = vmul.f32 -1.442695, %v6325_v53  ;;  %v6320_v60 = vadd.f32 %v7060_v24, %v6319_v41  ;;  %v6573_v41 = vmin.f32 %v8982_v21, %v8984_v22  ;;  %v9129_v21 = vmax.f32 %v8986_v29, %v8988_v30 }
0x158b   :  { %8097 = vpow2.f32 %v7064_v49  ;;  %v7063_v63 = vmul.f32 -1.442695, %v6320_v60 }
0x158d   :  { %8099 = vpow2.f32 %v7063_v63 }
0x158e   :  { %v7964_v33 = vpop.f32.mrf.mxu0 }
0x158f   :  { %v6750_v4 = vrot.slane %v7964_v33, 1 }
0x1590   :  { %v6494_v39 = vpop.f32.mrf.mxu0 }
0x1591   :  { %v6752_v8 = vmin.f32 %v7964_v33, %v6750_v4  ;;  %v6578_v43 = vrot.slane %v6494_v39, 1  ;;  %v6753_v14 = vmax.f32 %v7964_v33, %v6750_v4 }
0x1593   :  { %v6755_v52 = vrot.slane %v6752_v8, 2  ;;  %v6580_v15 = vmin.f32 %v6494_v39, %v6578_v43  ;;  %v6581_v34 = vmax.f32 %v6494_v39, %v6578_v43  ;;  %v6767_v46 = vrot.slane %v6753_v14, 2 }
0x1595   :  { %v6757_v24 = vmin.f32 %v6753_v14, %v6755_v52  ;;  %v6583_v28 = vrot.slane %v6580_v15, 2  ;;  %v6758_v31 = vmax.f32 %v6753_v14, %v6755_v52  ;;  %v6595_v63 = vrot.slane %v6581_v34, 2 }
0x1597   :  { %v6762_v53 = vrot.slane %v6757_v24, 2  ;;  %v6585_v58 = vmin.f32 %v6581_v34, %v6583_v28  ;;  %v6586_v60 = vmax.f32 %v6581_v34, %v6583_v28  ;;  %v6769_v61 = vmin.f32 %v6758_v31, %v6767_v46 }
0x1598   :  { %v8098_v50 = vpop.eup %8097  ;;  %v9015_v55 = vmax.f32 %v6758_v31, %v6767_v46  ;;  %v9022_v4 = vmin.f32 %v6752_v8, %v6757_v24  ;;  %v6760_v40 = vmax.f32 %v6752_v8, %v6757_v24 }
0x1599   :  { %v6335_v49 = vadd.f32 1.0, %v8098_v50  ;;  %v6590_v37 = vrot.slane %v6585_v58, 2  ;;  %v6764_v32 = vmin.f32 %v6758_v31, %v6762_v53  ;;  %v6588_v33 = vmax.f32 %v6580_v15, %v6585_v58 }
0x159a   :  { %v8100_v51 = vpop.eup %8099  ;;  %v6597_v3 = vmin.f32 %v6586_v60, %v6595_v63  ;;  %v6765_v56 = vmax.f32 %v6758_v31, %v6762_v53  ;;  %v6779_v39 = vrot.slane %v6769_v61, 2  ;;  %v6598_v25 = vmax.f32 %v6586_v60, %v6595_v63 }
0x159b   :  { %8101 = vrcp.f32 %v6335_v49  ;;  %v6334_v62 = vadd.f32 1.0, %v8100_v51  ;;  %v6592_v36 = vmin.f32 %v6586_v60, %v6590_v37  ;;  %v6593_v27 = vmax.f32 %v6586_v60, %v6590_v37 }
0x159c   :  { %v6607_v43 = vrot.slane %v6597_v3, 2  ;;  %v6774_v10 = vrot.slane %v6764_v32, 2  ;;  %v6793_v12 = vrot.slane %v9015_v55, 2  ;;  %v6587_v14 = vmin.f32 %v6580_v15, %v6585_v58 }
0x159d   :  { %8103 = vrcp.f32 %v6334_v62  ;;  %v6599_v5 = vmin.f32 %v6588_v33, %v6592_v36  ;;  %v6602_v54 = vrot.slane %v6592_v36, 2  ;;  %v6600_v52 = vmax.f32 %v6588_v33, %v6592_v36 }
0x159e   :  { %v6609_v50 = vmin.f32 %v6593_v27, %v6607_v43  ;;  %v6610_v46 = vmax.f32 %v6593_v27, %v6607_v43  ;;  %v6771_v49 = vmin.f32 %v6760_v40, %v6764_v32  ;;  %v6772_v51 = vmax.f32 %v6760_v40, %v6764_v32 }
0x159f   :  { %v6604_v28 = vmin.f32 %v6593_v27, %v6602_v54  ;;  %v6605_v34 = vmax.f32 %v6593_v27, %v6602_v54  ;;  %v6781_v37 = vmin.f32 %v6765_v56, %v6779_v39  ;;  %v6621_v62 = vrot.slane %v6598_v25, 2 }
0x15a0   :  { %v6612_v31 = vmax.f32 %v6587_v14, %v6599_v5  ;;  %v6616_v8 = vrot.slane %v6609_v50, 2  ;;  %v6776_v24 = vmin.f32 %v6765_v56, %v6774_v10  ;;  %v6611_v61 = vmin.f32 %v6587_v14, %v6599_v5 }
0x15a1   :  { %v6613_v53 = vmin.f32 %v6600_v52, %v6604_v28  ;;  %v6614_v60 = vmax.f32 %v6600_v52, %v6604_v28  ;;  %v6623_v63 = vmin.f32 %v6610_v46, %v6621_v62  ;;  %v6624_v3 = vmax.f32 %v6610_v46, %v6621_v62 }
0x15a2   :  { %v6618_v18 = vmin.f32 %v6605_v34, %v6616_v8  ;;  %v6619_v23 = vmax.f32 %v6605_v34, %v6616_v8  ;;  %v6777_v33 = vmax.f32 %v6765_v56, %v6774_v10  ;;  %v9025_v27 = vmax.f32 %v6765_v56, %v6779_v39 }
0x15a3   :  { %v6625_v15 = vmin.f32 %v6612_v31, %v6613_v53  ;;  %v6626_v58 = vmax.f32 %v6612_v31, %v6613_v53  ;;  %v6630_v36 = vrot.slane %v6623_v63, 2  ;;  %v6788_v32 = vrot.slane %v6781_v37, 2 }
0x15a4   :  { %v6627_v40 = vmin.f32 %v6614_v60, %v6618_v18  ;;  %v6628_v25 = vmax.f32 %v6614_v60, %v6618_v18  ;;  %v6784_v5 = vmax.f32 %v9022_v4, %v6771_v49  ;;  %v6641_v50 = vrot.slane %v6624_v3, 2 }
0x15a5   :  { %v6634_v54 = vmin.f32 %v6611_v61, %v6625_v15  ;;  %v6635_v43 = vmax.f32 %v6611_v61, %v6625_v15  ;;  %v6632_v14 = vmin.f32 %v6619_v23, %v6630_v36  ;;  %v6633_v28 = vmax.f32 %v6619_v23, %v6630_v36 }
0x15a6   :  { %v6785_v34 = vmin.f32 %v6772_v51, %v6776_v24  ;;  %v6786_v46 = vmax.f32 %v6772_v51, %v6776_v24  ;;  %v6636_v62 = vmin.f32 %v6626_v58, %v6627_v40  ;;  %v6637_v10 = vmax.f32 %v6626_v58, %v6627_v40 }
0x15a7   :  { %v6638_v39 = vmin.f32 %v6628_v25, %v6632_v14  ;;  %v6639_v37 = vmax.f32 %v6628_v25, %v6632_v14  ;;  %v6643_v31 = vmin.f32 %v6633_v28, %v6641_v50  ;;  %v6651_v18 = vsub.f32 %v6560_v20, %v6634_v54 }
0x15a8   :  { %v8102_v52 = vpop.eup %8101  ;;  %v6645_v53 = vmin.f32 %v6635_v43, %v6636_v62  ;;  %v6646_v60 = vmax.f32 %v6635_v43, %v6636_v62  ;;  %v6790_v23 = vmin.f32 %v6777_v33, %v6788_v32  ;;  %v6795_v8 = vmin.f32 %v9025_v27, %v6793_v12 }
0x15a9   :  { %6342 = vst.msk [vmem:[%s8343_s6 + $0x8] sm:$0xff] %vm6340_vm5, %v8102_v52  ;;  %v6647_v51 = vmin.f32 %v6637_v10, %v6638_v39  ;;  %v6717_v24 = vmax.f32 %v8999_v47, %v6714_v48  ;;  %v6721_v61 = vmin.f32 %v9013_v1, %v6719_v6  ;;  %v6797_v26 = vmin.f32 %v6784_v5, %v6785_v34 }
0x15aa   :  { %v8104_v56 = vpop.eup %8103  ;;  %v6648_v20 = vmax.f32 %v6637_v10, %v6638_v39  ;;  %v6654_v63 = vsub.f32 %v6571_v44, %v6645_v53  ;;  %v6657_v3 = vsub.f32 %v6572_v45, %v6646_v60  ;;  %v6798_v38 = vmax.f32 %v6784_v5, %v6785_v34 }
0x15ab   :  { %6341 = vst.msk [vmem:[%s8343_s6] sm:$0xff] %vm6340_vm5, %v8104_v56  ;;  %v6649_v15 = vmin.f32 %v6639_v37, %v6643_v31  ;;  %v6652_v47 = vmul.f32 %v6651_v18, %v6651_v18  ;;  %v6791_v48 = vmax.f32 %v6777_v33, %v6788_v32  ;;  %v6660_v36 = vsub.f32 %v6573_v41, %v6647_v51  ;;  %s6870_s6 = sshll.u32 %s8166_s5, 4  ;;  %s6871_s6 = int_to_ptr.vmem [resolvable:$true] %s6870_s6 }
0x15ac   :  { %v6655_v58 = vmul.f32 %v6654_v63, %v6654_v63  ;;  %v6799_v40 = vmin.f32 %v6786_v46, %v6790_v23  ;;  %v6802_v25 = vrot.slane %v6795_v8, 2  ;;  %v6783_v54 = vmin.f32 %v9022_v4, %v6771_v49  ;;  %s8107_s28 = scalar_lea.vmem %s6871_s6, 16  ;;  %s8111_s2 = scalar_lea.vmem %s6871_s6, 32 }
0x15ad   :  { %v9059_v44 = vmax.f32 %v9013_v1, %v6719_v6  ;;  %v6728_v13 = vrot.slane %v6721_v61, 2  ;;  %v6650_v45 = vmax.f32 %v6639_v37, %v6643_v31  ;;  %v6658_v32 = vmul.f32 %v6657_v3, %v6657_v3  ;;  %p8108_p0 = scmp.ne.s32.totalorder %s6871_s6, %s8107_s28  ;;  %p8112_p1 = scmp.lt.s32.totalorder %s6871_s6, %s6871_s6 }
0x15ae   :  { %v6656_v33 = vadd.f32 %v6655_v58, %v6652_v47  ;;  %v6663_v41 = vsub.f32 %v6574_v59, %v6648_v20  ;;  %v6807_v43 = vmax.f32 %v6783_v54, %v6797_v26  ;;  %v6644_v52 = vmax.f32 %v6633_v28, %v6641_v50  ;;  %p8113_p2 = scmp.lt.s32.totalorder %s8111_s2, %s8107_s28 }
0x15af   :  { %v6666_v0 = vsub.f32 %v6575_v16, %v6649_v15  ;;  %v6800_v4 = vmax.f32 %v6786_v46, %v6790_v23  ;;  %v6661_v1 = vmul.f32 %v6660_v36, %v6660_v36  ;;  %v6804_v49 = vmin.f32 %v6791_v48, %v6802_v25 }
0x15b0   :  { %v6659_v6 = vadd.f32 %v6658_v32, %v6656_v33  ;;  %v6808_v5 = vmin.f32 %v6798_v38, %v6799_v40  ;;  %v6806_v9 = vmin.f32 %v6783_v54, %v6797_v26  ;;  %v6730_v57 = vmin.f32 %v6717_v24, %v6728_v13  ;;  %p8114_p3 = por %p8113_p2, %p8112_p1 }
0x15b1   :  { %v6731_v14 = vmax.f32 %v6717_v24, %v6728_v13  ;;  %v6734_v34 = vmin.f32 %v8972_v17, %v6725_v2  ;;  %v6664_v10 = vmul.f32 %v6663_v41, %v6663_v41  ;;  %v6669_v22 = vsub.f32 %v9129_v21, %v6650_v45 }
0x15b2   :  { %v6662_v62 = vadd.f32 %v6661_v1, %v6659_v6  ;;  %v6796_v59 = vmax.f32 %v9025_v27, %v6793_v12  ;;  %v6667_v16 = vmul.f32 %v6666_v0, %v6666_v0  ;;  %v6672_v28 = vsub.f32 %v8990_v35, %v6644_v52  ;;  %p8115_p4 = pnand %p8114_p3, %p8108_p0 }
0x15b3   :  { %v6735_v50 = vmax.f32 %v8972_v17, %v6725_v2  ;;  %v6805_v46 = vmax.f32 %v6791_v48, %v6802_v25  ;;  %v6809_v39 = vmax.f32 %v6798_v38, %v6799_v40  ;;  %v6810_v37 = vmin.f32 %v6800_v4, %v6804_v49 }
0x15b4   :  { %v6665_v56 = vadd.f32 %v6664_v10, %v6662_v62  ;;  %v6817_v31 = vmin.f32 %v6807_v43, %v6808_v5  ;;  %v9130_v18 = vmin.f32 %v8959_v42, %v8962_v7  ;;  %v6736_v29 = vmin.f32 %v6726_v11, %v6730_v57 }
0x15b5   :  { %v6739_v30 = vrot.slane %v9059_v44, 2  ;;  %v6743_v55 = vmin.f32 %v8978_v19, %v6734_v34  ;;  %v6670_v27 = vmul.f32 %v6669_v22, %v6669_v22  ;;  %v6813_v60 = vrot.slane %v6796_v59, 2 }
0x15b6   :  { %v6823_v53 = vsub.f32 %v9130_v18, %v6806_v9  ;;  %v6668_v12 = vadd.f32 %v6667_v16, %v6665_v56  ;;  %v6818_v35 = vmax.f32 %v6807_v43, %v6808_v5  ;;  %v6673_v23 = vmul.f32 %v6672_v28, %v6672_v28 }
0x15b7   :  { %v6744_v17 = vmax.f32 %v8978_v19, %v6734_v34  ;;  %v6811_v8 = vmax.f32 %v6800_v4, %v6804_v49  ;;  %v6815_v24 = vmin.f32 %v6805_v46, %v6813_v60  ;;  %v6819_v61 = vmin.f32 %v6809_v39, %v6810_v37 }
0x15b8   :  { %v6671_v51 = vadd.f32 %v6670_v27, %v6668_v12  ;;  %v6826_v2 = vsub.f32 %v6743_v55, %v6817_v31  ;;  %v6737_v26 = vmax.f32 %v6726_v11, %v6730_v57  ;;  %v6741_v42 = vmin.f32 %v6731_v14, %v6739_v30 }
0x15b9   :  { %v6745_v7 = vmin.f32 %v6735_v50, %v6736_v29  ;;  %v6824_v20 = vmul.f32 %v6823_v53, %v6823_v53  ;;  %v6820_v3 = vmax.f32 %v6809_v39, %v6810_v37  ;;  %v6829_v38 = vsub.f32 %v6744_v17, %v6818_v35 }
0x15ba   :  { %v6674_v63 = vadd.f32 %v6673_v23, %v6671_v51  ;;  %v6746_v15 = vmax.f32 %v6735_v50, %v6736_v29  ;;  %v6821_v47 = vmin.f32 %v6811_v8, %v6815_v24  ;;  %v6827_v58 = vmul.f32 %v6826_v2, %v6826_v2 }
0x15bb   :  { %v6832_v36 = vsub.f32 %v6745_v7, %v6819_v61  ;;  %v6747_v40 = vmin.f32 %v6737_v26, %v6741_v42  ;;  %v6822_v25 = vmax.f32 %v6811_v8, %v6815_v24  ;;  %v6830_v54 = vmul.f32 %v6829_v38, %v6829_v38 }
0x15bc   :  { %v6825_v48 = vadd.f32 %v6824_v20, %v6674_v63  ;;  %v6835_v44 = vsub.f32 %v6746_v15, %v6820_v3  ;;  %v6748_v13 = vmax.f32 %v6737_v26, %v6741_v42  ;;  %v6816_v45 = vmax.f32 %v6805_v46, %v6813_v60 }
0x15bd   :  { %v6833_v11 = vmul.f32 %v6832_v36, %v6832_v36  ;;  %v6838_v32 = vsub.f32 %v6747_v40, %v6821_v47  ;;  %v6742_v41 = vmax.f32 %v6731_v14, %v6739_v30 }
0x15be   :  { %v6828_v19 = vadd.f32 %v6827_v58, %v6825_v48  ;;  %v6836_v52 = vmul.f32 %v6835_v44, %v6835_v44  ;;  %v6841_v0 = vsub.f32 %v6748_v13, %v6822_v25 }
0x15bf   :  { %v6839_v6 = vmul.f32 %v6838_v32, %v6838_v32  ;;  %v6844_v1 = vsub.f32 %v6742_v41, %v6816_v45 }
0x15c0   :  { %v6831_v33 = vadd.f32 %v6830_v54, %v6828_v19  ;;  %v6842_v5 = vmul.f32 %v6841_v0, %v6841_v0 }
0x15c1   :  { %v6845_v57 = vmul.f32 %v6844_v1, %v6844_v1 }
0x15c2   :  { %v6834_v43 = vadd.f32 %v6833_v11, %v6831_v33 }
0x15c4   :  { %v6837_v4 = vadd.f32 %v6836_v52, %v6834_v43 }
0x15c6   :  { %v6840_v49 = vadd.f32 %v6839_v6, %v6837_v4 }
0x15c8   :  { %v6843_v9 = vadd.f32 %v6842_v5, %v6840_v49 }
0x15ca   :  { %v6846_v34 = vadd.f32 %v6845_v57, %v6843_v9 }
0x15cc   :  { %v6848_v62 = vsel %vm6847_vm6, %v6846_v34, 0.0 }
0x15cd   :  { %6849 = vadd.xlane.f32.xlu0 %v6848_v62 }
0x1656   :  { %v6850_v10 = vpop.xlane.xlu0 %6849 }
0x1657   :  { %v6851_v21 = vrot.slane %v6850_v10, 4 }
0x1659   :  { %v6852_v22 = vadd.f32 %v6851_v21, %v6850_v10 }
0x165b   :  { %v6853_v59 = vrot.slane %v6852_v22, 2 }
0x165d   :  { %v6854_v16 = vadd.f32 %v6853_v59, %v6852_v22 }
0x165f   :  { %v6855_v14 = vrot.slane %v6854_v16, 1 }
0x1661   :  { %v6856_v28 = vadd.f32 %v6855_v14, %v6854_v16 }
0x1663   :  { %7965 = vpush %v6856_v28 }
0x1694   :  { %s7966_s4 = spop %7965 }
0x1695   :  { %s6858_s1 = smul.f32 0.00125, %s7966_s4 }
0x1697   :  { %v6859_v50 = vstv %s6858_s1 }
0x1698   :  { %6861 = vst.msk [vmem:[#allocation3] sm:$0x1] %vm6860_vm7, %v6859_v50 }
0x1699   :  { %8118 = shalt.err (!%p8115_p4)
}
0x169a   :  { %6873 = dma.vmem_to_hbm [thread:$0]  %s6871_s6, 16, %s8348_s20, [#allocation4]  }
0x169b   :  { %8127 = dma.done.wait [#allocation4], 16  }
0x169c   :  { %8128 = vsyncadd [#allocation4], 4294967280 }
0x169d   :  { %6879 = vsyncpa [#allocation4], 1 }

</bundles_post_ra>
